<compile_context>
chip_gen: v6e
topology: v6e:2x2x1
jax: 0.10.0
libtpu: 0.0.40
codegen_flags: <defaults>
</compile_context>

<pallas_src>
import math

import jax
import jax.numpy as jnp
from jax.experimental import pallas as pl
from jax.experimental.pallas import tpu as pltpu

# ---------------------------------------------------------------------------
# Model hyper-parameters (small, but consistent with the module's structure).
# ---------------------------------------------------------------------------
HID_DIM = 32          # lxrt_encoder.dim (768 in the real model)
NUM_HEADS = 4
HEAD_DIM = HID_DIM // NUM_HEADS
INTER_DIM = HID_DIM * 4
VISUAL_FEAT_DIM = 64  # f (2048 in the real model)
POS_DIM = 4
MAX_SEQ = 8           # <= MAX_GQA_LENGTH (20)
NUM_OBJ = 8           # o (36 in the real model)
VOCAB = 64
L_LAYERS = 2          # language-only layers
R_LAYERS = 1          # vision-only layers
X_LAYERS = 1          # cross-modality layers
LN_EPS = 1e-12
_ATT_SCALE = 1.0 / math.sqrt(HEAD_DIM)
_GELU_C = math.sqrt(2.0 / math.pi)

_ATT_KEYS = ("wq", "bq", "wkv", "bkv", "wo", "bo", "g", "b")
_FFN_KEYS = ("wi", "bi", "wo", "bo", "g", "b")


# ---------------------------------------------------------------------------
# In-kernel helpers (traced into the Pallas bodies)
# ---------------------------------------------------------------------------
def _gelu(x):
    # BERT GeLU; tanh approximation of the erf form (erf has no direct Mosaic lowering).
    return 0.5 * x * (1.0 + jnp.tanh(_GELU_C * (x + 0.044715 * x * x * x)))


def _layernorm(x, g, b):
    mean = jnp.mean(x, axis=-1, keepdims=True)
    var = jnp.mean((x - mean) ** 2, axis=-1, keepdims=True)
    return (x - mean) * jax.lax.rsqrt(var + LN_EPS) * g + b


def _attn_block(x_q, x_kv, add_mask, wq, bq, wkv, bkv, wo, bo, g, b):
    """Fused attention sub-layer on loaded VMEM values.  x_q: (Sq,H), x_kv: (Sk,H)."""
    q = jnp.dot(x_q, wq, preferred_element_type=jnp.float32) + bq
    kv = jnp.dot(x_kv, wkv, preferred_element_type=jnp.float32) + bkv
    k = kv[:, :HID_DIM]
    v = kv[:, HID_DIM:]
    y = jnp.zeros((x_q.shape[0], HID_DIM), jnp.float32)
    for h in range(NUM_HEADS):                       # static unrolled loop over heads
        lo, hi = h * HEAD_DIM, (h + 1) * HEAD_DIM
        s = (jnp.dot(q[:, lo:hi], k[:, lo:hi].T,
                     preferred_element_type=jnp.float32) * _ATT_SCALE + add_mask)
        s = s - jnp.max(s, axis=-1, keepdims=True)
        p = jnp.exp(s)
        p = p * pl.reciprocal(jnp.sum(p, axis=-1, keepdims=True), approx=True)
        ctx = jnp.dot(p, v[:, lo:hi], preferred_element_type=jnp.float32)     # (Sq, D)
        # concat(ctx_h) @ Wo  ==  sum_h ctx_h @ Wo[h*D:(h+1)*D, :]
        y = y + jnp.dot(ctx, wo[lo:hi, :], preferred_element_type=jnp.float32)
    y = y + bo + x_q                                  # output bias + residual
    return _layernorm(y, g, b)


def _ffn_block(x, wi, bi, wo, bo, g, b):
    h = _gelu(jnp.dot(x, wi, preferred_element_type=jnp.float32) + bi)
    y = jnp.dot(h, wo, preferred_element_type=jnp.float32) + bo + x
    return _layernorm(y, g, b)


# ---------------------------------------------------------------------------
# Kernel 1: fused self-attention transformer layer (attention + FFN sub-layers)
# ---------------------------------------------------------------------------
def _self_layer_kernel(x_ref, mask_ref,
                       a_wq, a_bq, a_wkv, a_bkv, a_wo, a_bo, a_g, a_b,
                       f_wi, f_bi, f_wo, f_bo, f_g, f_b,
                       o_ref):
    x = x_ref[0].astype(jnp.float32)                 # (S, H)
    mask = mask_ref[0]                               # (1, S) additive
    y = _attn_block(x, x, mask,
                    a_wq[...], a_bq[...], a_wkv[...], a_bkv[...],
                    a_wo[...], a_bo[...], a_g[...], a_b[...])
    z = _ffn_block(y, f_wi[...], f_bi[...], f_wo[...], f_bo[...], f_g[...], f_b[...])
    o_ref[0] = z.astype(o_ref.dtype)


def self_layer(layer_p, x, add_mask):
    """x: (B, S, H), add_mask: (B, 1, S) additive."""
    B, S, H = x.shape
    weights = [layer_p["att"][k] for k in _ATT_KEYS] + [layer_p["ffn"][k] for k in _FFN_KEYS]
    return pl.pallas_call(
        _self_layer_kernel,
        out_shape=jax.ShapeDtypeStruct((B, S, H), x.dtype),
        grid=(B,),
        in_specs=[
            pl.BlockSpec((1, S, H), lambda b: (b, 0, 0)),
            pl.BlockSpec((1, 1, S), lambda b: (b, 0, 0)),
        ] + [pl.BlockSpec(w.shape, lambda b: (0, 0)) for w in weights],
        out_specs=pl.BlockSpec((1, S, H), lambda b: (b, 0, 0)),
        compiler_params=pltpu.CompilerParams(dimension_semantics=("parallel",)),
    )(x, add_mask, *weights)


# ---------------------------------------------------------------------------
# Kernel 2: fused cross-modality layer path for one modality
#   cross-attention (keys/values from the other modality, shared weights)
#   -> self-attention -> FFN, all residual+LN fused.
# ---------------------------------------------------------------------------
def _cross_layer_kernel(x_ref, ctx_ref, cmask_ref, smask_ref,
                        c_wq, c_bq, c_wkv, c_bkv, c_wo, c_bo, c_g, c_b,
                        s_wq, s_bq, s_wkv, s_bkv, s_wo, s_bo, s_g, s_b,
                        f_wi, f_bi, f_wo, f_bo, f_g, f_b,
                        o_ref):
    x = x_ref[0].astype(jnp.float32)                 # (Sq, H)
    ctx = ctx_ref[0].astype(jnp.float32)             # (Sk, H)
    cm = cmask_ref[0]                                # (1, Sk)
    sm = smask_ref[0]                                # (1, Sq)
    y = _attn_block(x, ctx, cm,
                    c_wq[...], c_bq[...], c_wkv[...], c_bkv[...],
                    c_wo[...], c_bo[...], c_g[...], c_b[...])
    y = _attn_block(y, y, sm,
                    s_wq[...], s_bq[...], s_wkv[...], s_bkv[...],
                    s_wo[...], s_bo[...], s_g[...], s_b[...])
    z = _ffn_block(y, f_wi[...], f_bi[...], f_wo[...], f_bo[...], f_g[...], f_b[...])
    o_ref[0] = z.astype(o_ref.dtype)


def cross_path(cross_p, self_p, ffn_p, x, ctx, ctx_mask, self_mask):
    """x: (B, Sq, H), ctx: (B, Sk, H), ctx_mask: (B,1,Sk), self_mask: (B,1,Sq)."""
    B, Sq, H = x.shape
    Sk = ctx.shape[1]
    weights = ([cross_p[k] for k in _ATT_KEYS]
               + [self_p[k] for k in _ATT_KEYS]
               + [ffn_p[k] for k in _FFN_KEYS])
    return pl.pallas_call(
        _cross_layer_kernel,
        out_shape=jax.ShapeDtypeStruct((B, Sq, H), x.dtype),
        grid=(B,),
        in_specs=[
            pl.BlockSpec((1, Sq, H), lambda b: (b, 0, 0)),
            pl.BlockSpec((1, Sk, H), lambda b: (b, 0, 0)),
            pl.BlockSpec((1, 1, Sk), lambda b: (b, 0, 0)),
            pl.BlockSpec((1, 1, Sq), lambda b: (b, 0, 0)),
        ] + [pl.BlockSpec(w.shape, lambda b: (0, 0)) for w in weights],
        out_specs=pl.BlockSpec((1, Sq, H), lambda b: (b, 0, 0)),
        compiler_params=pltpu.CompilerParams(dimension_semantics=("parallel",)),
    )(x, ctx, ctx_mask, self_mask, *weights)


# ---------------------------------------------------------------------------
# Kernel 3: LayerNorm over collapsed rows (embeddings) — single block, no grid.
# ---------------------------------------------------------------------------
def _layernorm_kernel(x_ref, g_ref, b_ref, o_ref):
    x = x_ref[...].astype(jnp.float32)
    o_ref[...] = _layernorm(x, g_ref[...], b_ref[...]).astype(o_ref.dtype)


def pallas_layernorm_rows(x2d, g, b):
    return pl.pallas_call(
        _layernorm_kernel,
        out_shape=jax.ShapeDtypeStruct(x2d.shape, x2d.dtype),
    )(x2d, g, b)


# ---------------------------------------------------------------------------
# Kernel 4: fused visual-feature encoder
#   LN(feat @ Wf + bf) and LN(pos @ Wb + bb) averaged, on collapsed (B*O) rows.
# ---------------------------------------------------------------------------
def _visn_encoder_kernel(feat_ref, pos_ref, wf_ref, bf_ref, gf_ref, bfln_ref,
                         wb_ref, bb_ref, gb_ref, bbln_ref, o_ref):
    f = feat_ref[...].astype(jnp.float32)            # (N, F)
    p4 = pos_ref[...].astype(jnp.float32)            # (N, 4)
    x = _layernorm(
        jnp.dot(f, wf_ref[...], preferred_element_type=jnp.float32) + bf_ref[...],
        gf_ref[...], bfln_ref[...])
    y = _layernorm(
        jnp.dot(p4, wb_ref[...], preferred_element_type=jnp.float32) + bb_ref[...],
        gb_ref[...], bbln_ref[...])
    o_ref[...] = (0.5 * (x + y)).astype(o_ref.dtype)


def visual_encoder(p, feat, pos):
    B, O, F = feat.shape
    out = pl.pallas_call(
        _visn_encoder_kernel,
        out_shape=jax.ShapeDtypeStruct((B * O, HID_DIM), feat.dtype),
    )(feat.reshape(B * O, F), pos.reshape(B * O, POS_DIM),
      p["wf"], p["bf"], p["gf"], p["bfln"],
      p["wb"], p["bb"], p["gb"], p["bbln"])
    return out.reshape(B, O, HID_DIM)


# ---------------------------------------------------------------------------
# Parameter initialization (deterministic, BERT-style)
# ---------------------------------------------------------------------------
def _normal(key, shape, std=0.02):
    return std * jax.random.normal(key, shape, jnp.float32)


def _zeros(shape):
    return jnp.zeros(shape, jnp.float32)


def _ones(shape):
    return jnp.ones(shape, jnp.float32)


def init_attn(keys, H):
    return {
        "wq": _normal(next(keys), (H, H)), "bq": _zeros((1, H)),
        "wkv": _normal(next(keys), (H, 2 * H)), "bkv": _zeros((1, 2 * H)),
        "wo": _normal(next(keys), (H, H)), "bo": _zeros((1, H)),
        "g": _ones((1, H)), "b": _zeros((1, H)),
    }


def init_ffn(keys, H, I):
    return {
        "wi": _normal(next(keys), (H, I)), "bi": _zeros((1, I)),
        "wo": _normal(next(keys), (I, H)), "bo": _zeros((1, H)),
        "g": _ones((1, H)), "b": _zeros((1, H)),
    }


def init_self_layer(keys, H, I):
    return {"att": init_attn(keys, H), "ffn": init_ffn(keys, H, I)}


def init_cross_layer(keys, H, I):
    return {
        "cross": init_attn(keys, H),        # shared bi-directional cross-attention
        "l_self": init_attn(keys, H),
        "v_self": init_attn(keys, H),
        "l_ffn": init_ffn(keys, H, I),
        "v_ffn": init_ffn(keys, H, I),
    }


def init_params(seed=0):
    keys = iter(jax.random.split(jax.random.PRNGKey(seed), 512))
    return {
        "emb": {
            "word": _normal(next(keys), (VOCAB, HID_DIM)),
            "pos": _normal(next(keys), (MAX_SEQ, HID_DIM)),
            "type": _normal(next(keys), (2, HID_DIM)),
            "g": _ones((1, HID_DIM)), "b": _zeros((1, HID_DIM)),
        },
        "vis_enc": {
            "wf": _normal(next(keys), (VISUAL_FEAT_DIM, HID_DIM)), "bf": _zeros((1, HID_DIM)),
            "gf": _ones((1, HID_DIM)), "bfln": _zeros((1, HID_DIM)),
            "wb": _normal(next(keys), (POS_DIM, HID_DIM)), "bb": _zeros((1, HID_DIM)),
            "gb": _ones((1, HID_DIM)), "bbln": _zeros((1, HID_DIM)),
        },
        "l_layers": [init_self_layer(keys, HID_DIM, INTER_DIM) for _ in range(L_LAYERS)],
        "r_layers": [init_self_layer(keys, HID_DIM, INTER_DIM) for _ in range(R_LAYERS)],
        "x_layers": [init_cross_layer(keys, HID_DIM, INTER_DIM) for _ in range(X_LAYERS)],
        "pooler": {"w": _normal(next(keys), (HID_DIM, HID_DIM)), "b": _zeros((HID_DIM,))},
    }


# ---------------------------------------------------------------------------
# Model forward (glue in JAX, compute in fused Pallas kernels)
# ---------------------------------------------------------------------------
@jax.jit
def gqa_model_gcn_forward(params, feat, pos, token_ids, input_mask):
    """
    feat: (B, O, F), pos: (B, O, 4), token_ids: (B, S), input_mask: (B, S)
    Returns (feat_seq=(lang_feats, visn_feats), que_mask, pooled_x) as in forward().
    """
    B, S = token_ids.shape
    O = feat.shape[1]

    # Additive attention masks, BERT style: (1 - mask) * -10000; shape (B, 1, Sk).
    lang_add_mask = ((1.0 - input_mask.astype(jnp.float32)) * -10000.0)[:, None, :]
    vis_add_mask = jnp.zeros((B, 1, O), jnp.float32)   # no object padding

    # BERT embeddings: gather + adds stay in JAX (tiny), LayerNorm in Pallas.
    pe = params["emb"]
    we = jnp.take(pe["word"], token_ids, axis=0)                 # (B, S, H)
    x = we + pe["pos"][:S][None, :, :] + pe["type"][0][None, None, :]
    lang = pallas_layernorm_rows(
        x.reshape(B * S, HID_DIM), pe["g"], pe["b"]).reshape(B, S, HID_DIM)

    # Visual feature encoder (fully fused).
    visn = visual_encoder(params["vis_enc"], feat, pos)

    # Language-only layers: one fused kernel per layer.
    for lp in params["l_layers"]:
        lang = self_layer(lp, lang, lang_add_mask)
    # Vision-only layers.
    for rp in params["r_layers"]:
        visn = self_layer(rp, visn, vis_add_mask)
    # Cross-modality layers (LXMERT: shared cross-attn, then self-attn, then FFN);
    # both paths read the PRE-update features of the other modality.
    for xp in params["x_layers"]:
        new_lang = cross_path(xp["cross"], xp["l_self"], xp["l_ffn"],
                              lang, visn, vis_add_mask, lang_add_mask)
        new_visn = cross_path(xp["cross"], xp["v_self"], xp["v_ffn"],
                              visn, lang, lang_add_mask, vis_add_mask)
        lang, visn = new_lang, new_visn

    # Pooler: tanh(W * [CLS]) — too small to justify a kernel launch; plain jnp.
    pooled = jnp.tanh(lang[:, 0, :] @ params["pooler"]["w"] + params["pooler"]["b"])

    feat_seq = (lang, visn)
    que_mask = input_mask
    return feat_seq, que_mask, pooled


# ---------------------------------------------------------------------------
# Deterministic "tokenizer" stand-in
# ---------------------------------------------------------------------------
def tokenize(sentences, max_seq=MAX_SEQ, vocab=VOCAB):
    # TODO(synk): real model uses the BERT WordPiece tokenizer; a deterministic
    # hash of each word stands in so the forward stays self-contained.
    ids, mask = [], []
    for s in sentences:
        toks = [1] + [(sum(ord(c) for c in w) % (vocab - 2)) + 2
                      for w in s.split()][: max_seq - 2] + [2]
        m = [1] * len(toks)
        toks = toks + [0] * (max_seq - len(toks))
        m = m + [0] * (max_seq - len(m))
        ids.append(toks)
        mask.append(m)
    return jnp.asarray(ids, jnp.int32), jnp.asarray(mask, jnp.int32)


# ---------------------------------------------------------------------------
# Main
# ---------------------------------------------------------------------------
if __name__ == "__main__":
    key = jax.random.PRNGKey(0)
    k_feat, k_pos = jax.random.split(key)

    B = 2
    feat = jax.random.normal(k_feat, (B, NUM_OBJ, VISUAL_FEAT_DIM), jnp.float32)
    pos = jax.random.uniform(k_pos, (B, NUM_OBJ, POS_DIM), jnp.float32)
    sent = ["is the man wearing a hat", "what color is the car on the left"]

    token_ids, input_mask = tokenize(sent)
    params = init_params(seed=0)

    (lang_feats, visn_feats), que_mask, pooled = gqa_model_gcn_forward(
        params, feat, pos, token_ids, input_mask)

    jax.block_until_ready((lang_feats, visn_feats, que_mask, pooled))

    assert lang_feats.shape == (B, MAX_SEQ, HID_DIM)
    assert visn_feats.shape == (B, NUM_OBJ, HID_DIM)
    assert que_mask.shape == (B, MAX_SEQ)
    assert pooled.shape == (B, HID_DIM)
    assert jnp.all(jnp.isfinite(lang_feats)) and jnp.all(jnp.isfinite(visn_feats))
    assert jnp.all(jnp.isfinite(pooled))

    print("KERNEL_OK")
</pallas_src>

<mosaic_0001>
module attributes {stable_mosaic.version = 11 : i64} {
  func.func @_layernorm_kernel(%arg0: memref<16x32xf32, #tpu.memory_space<vmem>>, %arg1: memref<1x32xf32, #tpu.memory_space<vmem>>, %arg2: memref<1x32xf32, #tpu.memory_space<vmem>>, %arg3: memref<16x32xf32, #tpu.memory_space<vmem>>) attributes {dimension_semantics = [], scalar_prefetch = 0 : i64, scratch_operands = 0 : i64, tpu.core_type = #tpu.core_type<tc>} {
    %c0 = arith.constant 0 : index
    %c0_0 = arith.constant 0 : index
    %0 = vector.load %arg0[%c0, %c0_0] : memref<16x32xf32, #tpu.memory_space<vmem>>, vector<16x32xf32>
    %c0_1 = arith.constant 0 : index
    %c0_2 = arith.constant 0 : index
    %1 = vector.load %arg1[%c0_1, %c0_2] : memref<1x32xf32, #tpu.memory_space<vmem>>, vector<1x32xf32>
    %c0_3 = arith.constant 0 : index
    %c0_4 = arith.constant 0 : index
    %2 = vector.load %arg2[%c0_3, %c0_4] : memref<1x32xf32, #tpu.memory_space<vmem>>, vector<1x32xf32>
    %cst = arith.constant dense<0.000000e+00> : vector<16xf32>
    %3 = vector.multi_reduction <add>, %0, %cst [1] : vector<16x32xf32> to vector<16xf32>
    %4 = vector.shape_cast %3 : vector<16xf32> to vector<16x1xf32>
    %cst_5 = arith.constant 3.200000e+01 : f32
    %5 = vector.broadcast %cst_5 : f32 to vector<16x1xf32>
    %6 = arith.divf %4, %5 : vector<16x1xf32>
    %7 = vector.broadcast %6 : vector<16x1xf32> to vector<16x32xf32>
    %8 = arith.subf %0, %7 : vector<16x32xf32>
    %9 = arith.mulf %8, %8 : vector<16x32xf32>
    %cst_6 = arith.constant dense<0.000000e+00> : vector<16xf32>
    %10 = vector.multi_reduction <add>, %9, %cst_6 [1] : vector<16x32xf32> to vector<16xf32>
    %11 = vector.shape_cast %10 : vector<16xf32> to vector<16x1xf32>
    %cst_7 = arith.constant 3.200000e+01 : f32
    %12 = vector.broadcast %cst_7 : f32 to vector<16x1xf32>
    %13 = arith.divf %11, %12 : vector<16x1xf32>
    %14 = vector.broadcast %6 : vector<16x1xf32> to vector<16x32xf32>
    %15 = arith.subf %0, %14 : vector<16x32xf32>
    %cst_8 = arith.constant 9.99999996E-13 : f32
    %16 = vector.broadcast %cst_8 : f32 to vector<16x1xf32>
    %17 = arith.addf %13, %16 : vector<16x1xf32>
    %18 = math.rsqrt %17 : vector<16x1xf32>
    %19 = vector.broadcast %18 : vector<16x1xf32> to vector<16x32xf32>
    %20 = arith.mulf %15, %19 : vector<16x32xf32>
    %21 = vector.broadcast %1 : vector<1x32xf32> to vector<16x32xf32>
    %22 = arith.mulf %20, %21 : vector<16x32xf32>
    %23 = vector.broadcast %2 : vector<1x32xf32> to vector<16x32xf32>
    %24 = arith.addf %22, %23 : vector<16x32xf32>
    %c0_9 = arith.constant 0 : index
    %c0_10 = arith.constant 0 : index
    %25 = vector.load %arg3[%c0_9, %c0_10] : memref<16x32xf32, #tpu.memory_space<vmem>>, vector<16x32xf32>
    tpu.vector_store %arg3[%c0_9, %c0_10], %24 {strides = array<i32>} : memref<16x32xf32, #tpu.memory_space<vmem>>, vector<16x32xf32>,
    return
  }
}

module attributes {stable_mosaic.version = 11 : i64} {
  func.func @_self_layer_kernel(%arg0: i32, %arg1: memref<1x8x32xf32, #tpu.memory_space<vmem>>, %arg2: memref<1x1x8xf32, #tpu.memory_space<vmem>>, %arg3: memref<32x32xf32, #tpu.memory_space<vmem>>, %arg4: memref<1x32xf32, #tpu.memory_space<vmem>>, %arg5: memref<32x64xf32, #tpu.memory_space<vmem>>, %arg6: memref<1x64xf32, #tpu.memory_space<vmem>>, %arg7: memref<32x32xf32, #tpu.memory_space<vmem>>, %arg8: memref<1x32xf32, #tpu.memory_space<vmem>>, %arg9: memref<1x32xf32, #tpu.memory_space<vmem>>, %arg10: memref<1x32xf32, #tpu.memory_space<vmem>>, %arg11: memref<32x128xf32, #tpu.memory_space<vmem>>, %arg12: memref<1x128xf32, #tpu.memory_space<vmem>>, %arg13: memref<128x32xf32, #tpu.memory_space<vmem>>, %arg14: memref<1x32xf32, #tpu.memory_space<vmem>>, %arg15: memref<1x32xf32, #tpu.memory_space<vmem>>, %arg16: memref<1x32xf32, #tpu.memory_space<vmem>>, %arg17: memref<1x8x32xf32, #tpu.memory_space<vmem>>) attributes {dimension_semantics = [#tpu.dimension_semantics<parallel>], iteration_bounds = array<i64: 2>, scalar_prefetch = 0 : i64, scratch_operands = 0 : i64, tpu.core_type = #tpu.core_type<tc>, window_params = [{transform_indices = @transform_0, window_bounds = array<i64: 1, 8, 32>}, {transform_indices = @transform_1, window_bounds = array<i64: 1, 1, 8>}, {pipeline_mode = #tpu.pipeline_mode<synchronous>, transform_indices = @transform_2, window_bounds = array<i64: 32, 32>}, {pipeline_mode = #tpu.pipeline_mode<synchronous>, transform_indices = @transform_3, window_bounds = array<i64: 1, 32>}, {pipeline_mode = #tpu.pipeline_mode<synchronous>, transform_indices = @transform_4, window_bounds = array<i64: 32, 64>}, {pipeline_mode = #tpu.pipeline_mode<synchronous>, transform_indices = @transform_5, window_bounds = array<i64: 1, 64>}, {pipeline_mode = #tpu.pipeline_mode<synchronous>, transform_indices = @transform_6, window_bounds = array<i64: 32, 32>}, {pipeline_mode = #tpu.pipeline_mode<synchronous>, transform_indices = @transform_7, window_bounds = array<i64: 1, 32>}, {pipeline_mode = #tpu.pipeline_mode<synchronous>, transform_indices = @transform_8, window_bounds = array<i64: 1, 32>}, {pipeline_mode = #tpu.pipeline_mode<synchronous>, transform_indices = @transform_9, window_bounds = array<i64: 1, 32>}, {pipeline_mode = #tpu.pipeline_mode<synchronous>, transform_indices = @transform_10, window_bounds = array<i64: 32, 128>}, {pipeline_mode = #tpu.pipeline_mode<synchronous>, transform_indices = @transform_11, window_bounds = array<i64: 1, 128>}, {pipeline_mode = #tpu.pipeline_mode<synchronous>, transform_indices = @transform_12, window_bounds = array<i64: 128, 32>}, {pipeline_mode = #tpu.pipeline_mode<synchronous>, transform_indices = @transform_13, window_bounds = array<i64: 1, 32>}, {pipeline_mode = #tpu.pipeline_mode<synchronous>, transform_indices = @transform_14, window_bounds = array<i64: 1, 32>}, {pipeline_mode = #tpu.pipeline_mode<synchronous>, transform_indices = @transform_15, window_bounds = array<i64: 1, 32>}, {transform_indices = @transform_16, window_bounds = array<i64: 1, 8, 32>}]} {
    %c0 = arith.constant 0 : index
    %c0_0 = arith.constant 0 : index
    %c0_1 = arith.constant 0 : index
    %0 = vector.load %arg1[%c0, %c0_0, %c0_1] : memref<1x8x32xf32, #tpu.memory_space<vmem>>, vector<1x8x32xf32>
    %1 = vector.shape_cast %0 : vector<1x8x32xf32> to vector<8x32xf32>
    %c0_2 = arith.constant 0 : index
    %c0_3 = arith.constant 0 : index
    %c0_4 = arith.constant 0 : index
    %2 = vector.load %arg2[%c0_2, %c0_3, %c0_4] : memref<1x1x8xf32, #tpu.memory_space<vmem>>, vector<1x1x8xf32>
    %3 = vector.shape_cast %2 : vector<1x1x8xf32> to vector<1x8xf32>
    %c0_5 = arith.constant 0 : index
    %c0_6 = arith.constant 0 : index
    %4 = vector.load %arg3[%c0_5, %c0_6] : memref<32x32xf32, #tpu.memory_space<vmem>>, vector<32x32xf32>
    %c0_7 = arith.constant 0 : index
    %c0_8 = arith.constant 0 : index
    %5 = vector.load %arg4[%c0_7, %c0_8] : memref<1x32xf32, #tpu.memory_space<vmem>>, vector<1x32xf32>
    %c0_9 = arith.constant 0 : index
    %c0_10 = arith.constant 0 : index
    %6 = vector.load %arg5[%c0_9, %c0_10] : memref<32x64xf32, #tpu.memory_space<vmem>>, vector<32x64xf32>
    %c0_11 = arith.constant 0 : index
    %c0_12 = arith.constant 0 : index
    %7 = vector.load %arg6[%c0_11, %c0_12] : memref<1x64xf32, #tpu.memory_space<vmem>>, vector<1x64xf32>
    %c0_13 = arith.constant 0 : index
    %c0_14 = arith.constant 0 : index
    %8 = vector.load %arg7[%c0_13, %c0_14] : memref<32x32xf32, #tpu.memory_space<vmem>>, vector<32x32xf32>
    %c0_15 = arith.constant 0 : index
    %c0_16 = arith.constant 0 : index
    %9 = vector.load %arg8[%c0_15, %c0_16] : memref<1x32xf32, #tpu.memory_space<vmem>>, vector<1x32xf32>
    %c0_17 = arith.constant 0 : index
    %c0_18 = arith.constant 0 : index
    %10 = vector.load %arg9[%c0_17, %c0_18] : memref<1x32xf32, #tpu.memory_space<vmem>>, vector<1x32xf32>
    %c0_19 = arith.constant 0 : index
    %c0_20 = arith.constant 0 : index
    %11 = vector.load %arg10[%c0_19, %c0_20] : memref<1x32xf32, #tpu.memory_space<vmem>>, vector<1x32xf32>
    %cst = arith.constant dense<0.000000e+00> : vector<8x32xf32>
    %12 = tpu.matmul %1, %4, %cst {dimension_numbers = #tpu.dot_dimension_numbers<[1], [0], [0], [1], [0, 0, 1, 1], [], []>} : vector<8x32xf32>, vector<32x32xf32>, vector<8x32xf32> -> vector<8x32xf32>
    %13 = vector.broadcast %5 : vector<1x32xf32> to vector<8x32xf32>
    %14 = arith.addf %12, %13 : vector<8x32xf32>
    %cst_21 = arith.constant dense<0.000000e+00> : vector<8x64xf32>
    %15 = tpu.matmul %1, %6, %cst_21 {dimension_numbers = #tpu.dot_dimension_numbers<[1], [0], [0], [1], [0, 0, 1, 1], [], []>} : vector<8x32xf32>, vector<32x64xf32>, vector<8x64xf32> -> vector<8x64xf32>
    %16 = vector.broadcast %7 : vector<1x64xf32> to vector<8x64xf32>
    %17 = arith.addf %15, %16 : vector<8x64xf32>
    %18 = vector.extract_strided_slice %17 {offsets = [0, 0], sizes = [8, 32], strides = [1, 1]} : vector<8x64xf32> to vector<8x32xf32>
    %19 = vector.extract_strided_slice %17 {offsets = [0, 32], sizes = [8, 32], strides = [1, 1]} : vector<8x64xf32> to vector<8x32xf32>
    %cst_22 = arith.constant 0.000000e+00 : f32
    %20 = vector.broadcast %cst_22 : f32 to vector<8x32xf32>
    %21 = vector.extract_strided_slice %14 {offsets = [0, 0], sizes = [8, 8], strides = [1, 1]} : vector<8x32xf32> to vector<8x8xf32>
    %22 = vector.extract_strided_slice %18 {offsets = [0, 0], sizes = [8, 8], strides = [1, 1]} : vector<8x32xf32> to vector<8x8xf32>
    %23 = tpu.transpose %22, [1, 0] : vector<8x8xf32> -> vector<8x8xf32>
    %cst_23 = arith.constant dense<0.000000e+00> : vector<8x8xf32>
    %24 = tpu.matmul %21, %23, %cst_23 {dimension_numbers = #tpu.dot_dimension_numbers<[1], [0], [0], [1], [0, 0, 1, 1], [], []>} : vector<8x8xf32>, vector<8x8xf32>, vector<8x8xf32> -> vector<8x8xf32>
    %cst_24 = arith.constant 0.353553385 : f32
    %25 = vector.broadcast %cst_24 : f32 to vector<8x8xf32>
    %26 = arith.mulf %24, %25 : vector<8x8xf32>
    %27 = vector.broadcast %3 : vector<1x8xf32> to vector<8x8xf32>
    %28 = arith.addf %26, %27 : vector<8x8xf32>
    %cst_25 = arith.constant dense<0xFF800000> : vector<8xf32>
    %29 = vector.multi_reduction <maximumf>, %28, %cst_25 [1] : vector<8x8xf32> to vector<8xf32>
    %30 = vector.shape_cast %29 : vector<8xf32> to vector<8x1xf32>
    %31 = vector.broadcast %30 : vector<8x1xf32> to vector<8x8xf32>
    %32 = arith.subf %28, %31 : vector<8x8xf32>
    %33 = math.exp %32 : vector<8x8xf32>
    %cst_26 = arith.constant dense<0.000000e+00> : vector<8xf32>
    %34 = vector.multi_reduction <add>, %33, %cst_26 [1] : vector<8x8xf32> to vector<8xf32>
    %35 = vector.shape_cast %34 : vector<8xf32> to vector<8x1xf32>
    %36 = tpu.reciprocal %35 {approx = true} : vector<8x1xf32> -> vector<8x1xf32>
    %37 = vector.broadcast %36 : vector<8x1xf32> to vector<8x8xf32>
    %38 = arith.mulf %33, %37 : vector<8x8xf32>
    %39 = vector.extract_strided_slice %19 {offsets = [0, 0], sizes = [8, 8], strides = [1, 1]} : vector<8x32xf32> to vector<8x8xf32>
    %cst_27 = arith.constant dense<0.000000e+00> : vector<8x8xf32>
    %40 = tpu.matmul %38, %39, %cst_27 {dimension_numbers = #tpu.dot_dimension_numbers<[1], [0], [0], [1], [0, 0, 1, 1], [], []>} : vector<8x8xf32>, vector<8x8xf32>, vector<8x8xf32> -> vector<8x8xf32>
    %41 = vector.extract_strided_slice %8 {offsets = [0, 0], sizes = [8, 32], strides = [1, 1]} : vector<32x32xf32> to vector<8x32xf32>
    %cst_28 = arith.constant dense<0.000000e+00> : vector<8x32xf32>
    %42 = tpu.matmul %40, %41, %cst_28 {dimension_numbers = #tpu.dot_dimension_numbers<[1], [0], [0], [1], [0, 0, 1, 1], [], []>} : vector<8x8xf32>, vector<8x32xf32>, vector<8x32xf32> -> vector<8x32xf32>
    %43 = arith.addf %20, %42 : vector<8x32xf32>
    %44 = vector.extract_strided_slice %14 {offsets = [0, 8], sizes = [8, 8], strides = [1, 1]} : vector<8x32xf32> to vector<8x8xf32>
    %45 = vector.extract_strided_slice %18 {offsets = [0, 8], sizes = [8, 8], strides = [1, 1]} : vector<8x32xf32> to vector<8x8xf32>
    %46 = tpu.transpose %45, [1, 0] : vector<8x8xf32> -> vector<8x8xf32>
    %cst_29 = arith.constant dense<0.000000e+00> : vector<8x8xf32>
    %47 = tpu.matmul %44, %46, %cst_29 {dimension_numbers = #tpu.dot_dimension_numbers<[1], [0], [0], [1], [0, 0, 1, 1], [], []>} : vector<8x8xf32>, vector<8x8xf32>, vector<8x8xf32> -> vector<8x8xf32>
    %cst_30 = arith.constant 0.353553385 : f32
    %48 = vector.broadcast %cst_30 : f32 to vector<8x8xf32>
    %49 = arith.mulf %47, %48 : vector<8x8xf32>
    %50 = vector.broadcast %3 : vector<1x8xf32> to vector<8x8xf32>
    %51 = arith.addf %49, %50 : vector<8x8xf32>
    %cst_31 = arith.constant dense<0xFF800000> : vector<8xf32>
    %52 = vector.multi_reduction <maximumf>, %51, %cst_31 [1] : vector<8x8xf32> to vector<8xf32>
    %53 = vector.shape_cast %52 : vector<8xf32> to vector<8x1xf32>
    %54 = vector.broadcast %53 : vector<8x1xf32> to vector<8x8xf32>
    %55 = arith.subf %51, %54 : vector<8x8xf32>
    %56 = math.exp %55 : vector<8x8xf32>
    %cst_32 = arith.constant dense<0.000000e+00> : vector<8xf32>
    %57 = vector.multi_reduction <add>, %56, %cst_32 [1] : vector<8x8xf32> to vector<8xf32>
    %58 = vector.shape_cast %57 : vector<8xf32> to vector<8x1xf32>
    %59 = tpu.reciprocal %58 {approx = true} : vector<8x1xf32> -> vector<8x1xf32>
    %60 = vector.broadcast %59 : vector<8x1xf32> to vector<8x8xf32>
    %61 = arith.mulf %56, %60 : vector<8x8xf32>
    %62 = vector.extract_strided_slice %19 {offsets = [0, 8], sizes = [8, 8], strides = [1, 1]} : vector<8x32xf32> to vector<8x8xf32>
    %cst_33 = arith.constant dense<0.000000e+00> : vector<8x8xf32>
    %63 = tpu.matmul %61, %62, %cst_33 {dimension_numbers = #tpu.dot_dimension_numbers<[1], [0], [0], [1], [0, 0, 1, 1], [], []>} : vector<8x8xf32>, vector<8x8xf32>, vector<8x8xf32> -> vector<8x8xf32>
    %64 = vector.extract_strided_slice %8 {offsets = [8, 0], sizes = [8, 32], strides = [1, 1]} : vector<32x32xf32> to vector<8x32xf32>
    %cst_34 = arith.constant dense<0.000000e+00> : vector<8x32xf32>
    %65 = tpu.matmul %63, %64, %cst_34 {dimension_numbers = #tpu.dot_dimension_numbers<[1], [0], [0], [1], [0, 0, 1, 1], [], []>} : vector<8x8xf32>, vector<8x32xf32>, vector<8x32xf32> -> vector<8x32xf32>
    %66 = arith.addf %43, %65 : vector<8x32xf32>
    %67 = vector.extract_strided_slice %14 {offsets = [0, 16], sizes = [8, 8], strides = [1, 1]} : vector<8x32xf32> to vector<8x8xf32>
    %68 = vector.extract_strided_slice %18 {offsets = [0, 16], sizes = [8, 8], strides = [1, 1]} : vector<8x32xf32> to vector<8x8xf32>
    %69 = tpu.transpose %68, [1, 0] : vector<8x8xf32> -> vector<8x8xf32>
    %cst_35 = arith.constant dense<0.000000e+00> : vector<8x8xf32>
    %70 = tpu.matmul %67, %69, %cst_35 {dimension_numbers = #tpu.dot_dimension_numbers<[1], [0], [0], [1], [0, 0, 1, 1], [], []>} : vector<8x8xf32>, vector<8x8xf32>, vector<8x8xf32> -> vector<8x8xf32>
    %cst_36 = arith.constant 0.353553385 : f32
    %71 = vector.broadcast %cst_36 : f32 to vector<8x8xf32>
    %72 = arith.mulf %70, %71 : vector<8x8xf32>
    %73 = vector.broadcast %3 : vector<1x8xf32> to vector<8x8xf32>
    %74 = arith.addf %72, %73 : vector<8x8xf32>
    %cst_37 = arith.constant dense<0xFF800000> : vector<8xf32>
    %75 = vector.multi_reduction <maximumf>, %74, %cst_37 [1] : vector<8x8xf32> to vector<8xf32>
    %76 = vector.shape_cast %75 : vector<8xf32> to vector<8x1xf32>
    %77 = vector.broadcast %76 : vector<8x1xf32> to vector<8x8xf32>
    %78 = arith.subf %74, %77 : vector<8x8xf32>
    %79 = math.exp %78 : vector<8x8xf32>
    %cst_38 = arith.constant dense<0.000000e+00> : vector<8xf32>
    %80 = vector.multi_reduction <add>, %79, %cst_38 [1] : vector<8x8xf32> to vector<8xf32>
    %81 = vector.shape_cast %80 : vector<8xf32> to vector<8x1xf32>
    %82 = tpu.reciprocal %81 {approx = true} : vector<8x1xf32> -> vector<8x1xf32>
    %83 = vector.broadcast %82 : vector<8x1xf32> to vector<8x8xf32>
    %84 = arith.mulf %79, %83 : vector<8x8xf32>
    %85 = vector.extract_strided_slice %19 {offsets = [0, 16], sizes = [8, 8], strides = [1, 1]} : vector<8x32xf32> to vector<8x8xf32>
    %cst_39 = arith.constant dense<0.000000e+00> : vector<8x8xf32>
    %86 = tpu.matmul %84, %85, %cst_39 {dimension_numbers = #tpu.dot_dimension_numbers<[1], [0], [0], [1], [0, 0, 1, 1], [], []>} : vector<8x8xf32>, vector<8x8xf32>, vector<8x8xf32> -> vector<8x8xf32>
    %87 = vector.extract_strided_slice %8 {offsets = [16, 0], sizes = [8, 32], strides = [1, 1]} : vector<32x32xf32> to vector<8x32xf32>
    %cst_40 = arith.constant dense<0.000000e+00> : vector<8x32xf32>
    %88 = tpu.matmul %86, %87, %cst_40 {dimension_numbers = #tpu.dot_dimension_numbers<[1], [0], [0], [1], [0, 0, 1, 1], [], []>} : vector<8x8xf32>, vector<8x32xf32>, vector<8x32xf32> -> vector<8x32xf32>
    %89 = arith.addf %66, %88 : vector<8x32xf32>
    %90 = vector.extract_strided_slice %14 {offsets = [0, 24], sizes = [8, 8], strides = [1, 1]} : vector<8x32xf32> to vector<8x8xf32>
    %91 = vector.extract_strided_slice %18 {offsets = [0, 24], sizes = [8, 8], strides = [1, 1]} : vector<8x32xf32> to vector<8x8xf32>
    %92 = tpu.transpose %91, [1, 0] : vector<8x8xf32> -> vector<8x8xf32>
    %cst_41 = arith.constant dense<0.000000e+00> : vector<8x8xf32>
    %93 = tpu.matmul %90, %92, %cst_41 {dimension_numbers = #tpu.dot_dimension_numbers<[1], [0], [0], [1], [0, 0, 1, 1], [], []>} : vector<8x8xf32>, vector<8x8xf32>, vector<8x8xf32> -> vector<8x8xf32>
    %cst_42 = arith.constant 0.353553385 : f32
    %94 = vector.broadcast %cst_42 : f32 to vector<8x8xf32>
    %95 = arith.mulf %93, %94 : vector<8x8xf32>
    %96 = vector.broadcast %3 : vector<1x8xf32> to vector<8x8xf32>
    %97 = arith.addf %95, %96 : vector<8x8xf32>
    %cst_43 = arith.constant dense<0xFF800000> : vector<8xf32>
    %98 = vector.multi_reduction <maximumf>, %97, %cst_43 [1] : vector<8x8xf32> to vector<8xf32>
    %99 = vector.shape_cast %98 : vector<8xf32> to vector<8x1xf32>
    %100 = vector.broadcast %99 : vector<8x1xf32> to vector<8x8xf32>
    %101 = arith.subf %97, %100 : vector<8x8xf32>
    %102 = math.exp %101 : vector<8x8xf32>
    %cst_44 = arith.constant dense<0.000000e+00> : vector<8xf32>
    %103 = vector.multi_reduction <add>, %102, %cst_44 [1] : vector<8x8xf32> to vector<8xf32>
    %104 = vector.shape_cast %103 : vector<8xf32> to vector<8x1xf32>
    %105 = tpu.reciprocal %104 {approx = true} : vector<8x1xf32> -> vector<8x1xf32>
    %106 = vector.broadcast %105 : vector<8x1xf32> to vector<8x8xf32>
    %107 = arith.mulf %102, %106 : vector<8x8xf32>
    %108 = vector.extract_strided_slice %19 {offsets = [0, 24], sizes = [8, 8], strides = [1, 1]} : vector<8x32xf32> to vector<8x8xf32>
    %cst_45 = arith.constant dense<0.000000e+00> : vector<8x8xf32>
    %109 = tpu.matmul %107, %108, %cst_45 {dimension_numbers = #tpu.dot_dimension_numbers<[1], [0], [0], [1], [0, 0, 1, 1], [], []>} : vector<8x8xf32>, vector<8x8xf32>, vector<8x8xf32> -> vector<8x8xf32>
    %110 = vector.extract_strided_slice %8 {offsets = [24, 0], sizes = [8, 32], strides = [1, 1]} : vector<32x32xf32> to vector<8x32xf32>
    %cst_46 = arith.constant dense<0.000000e+00> : vector<8x32xf32>
    %111 = tpu.matmul %109, %110, %cst_46 {dimension_numbers = #tpu.dot_dimension_numbers<[1], [0], [0], [1], [0, 0, 1, 1], [], []>} : vector<8x8xf32>, vector<8x32xf32>, vector<8x32xf32> -> vector<8x32xf32>
    %112 = arith.addf %89, %111 : vector<8x32xf32>
    %113 = vector.broadcast %9 : vector<1x32xf32> to vector<8x32xf32>
    %114 = arith.addf %112, %113 : vector<8x32xf32>
    %115 = arith.addf %114, %1 : vector<8x32xf32>
    %cst_47 = arith.constant dense<0.000000e+00> : vector<8xf32>
    %116 = vector.multi_reduction <add>, %115, %cst_47 [1] : vector<8x32xf32> to vector<8xf32>
    %117 = vector.shape_cast %116 : vector<8xf32> to vector<8x1xf32>
    %cst_48 = arith.constant 3.200000e+01 : f32
    %118 = vector.broadcast %cst_48 : f32 to vector<8x1xf32>
    %119 = arith.divf %117, %118 : vector<8x1xf32>
    %120 = vector.broadcast %119 : vector<8x1xf32> to vector<8x32xf32>
    %121 = arith.subf %115, %120 : vector<8x32xf32>
    %122 = arith.mulf %121, %121 : vector<8x32xf32>
    %cst_49 = arith.constant dense<0.000000e+00> : vector<8xf32>
    %123 = vector.multi_reduction <add>, %122, %cst_49 [1] : vector<8x32xf32> to vector<8xf32>
    %124 = vector.shape_cast %123 : vector<8xf32> to vector<8x1xf32>
    %cst_50 = arith.constant 3.200000e+01 : f32
    %125 = vector.broadcast %cst_50 : f32 to vector<8x1xf32>
    %126 = arith.divf %124, %125 : vector<8x1xf32>
    %127 = vector.broadcast %119 : vector<8x1xf32> to vector<8x32xf32>
    %128 = arith.subf %115, %127 : vector<8x32xf32>
    %cst_51 = arith.constant 9.99999996E-13 : f32
    %129 = vector.broadcast %cst_51 : f32 to vector<8x1xf32>
    %130 = arith.addf %126, %129 : vector<8x1xf32>
    %131 = math.rsqrt %130 : vector<8x1xf32>
    %132 = vector.broadcast %131 : vector<8x1xf32> to vector<8x32xf32>
    %133 = arith.mulf %128, %132 : vector<8x32xf32>
    %134 = vector.broadcast %10 : vector<1x32xf32> to vector<8x32xf32>
    %135 = arith.mulf %133, %134 : vector<8x32xf32>
    %136 = vector.broadcast %11 : vector<1x32xf32> to vector<8x32xf32>
    %137 = arith.addf %135, %136 : vector<8x32xf32>
    %c0_52 = arith.constant 0 : index
    %c0_53 = arith.constant 0 : index
    %138 = vector.load %arg11[%c0_52, %c0_53] : memref<32x128xf32, #tpu.memory_space<vmem>>, vector<32x128xf32>
    %c0_54 = arith.constant 0 : index
    %c0_55 = arith.constant 0 : index
    %139 = vector.load %arg12[%c0_54, %c0_55] : memref<1x128xf32, #tpu.memory_space<vmem>>, vector<1x128xf32>
    %c0_56 = arith.constant 0 : index
    %c0_57 = arith.constant 0 : index
    %140 = vector.load %arg13[%c0_56, %c0_57] : memref<128x32xf32, #tpu.memory_space<vmem>>, vector<128x32xf32>
    %c0_58 = arith.constant 0 : index
    %c0_59 = arith.constant 0 : index
    %141 = vector.load %arg14[%c0_58, %c0_59] : memref<1x32xf32, #tpu.memory_space<vmem>>, vector<1x32xf32>
    %c0_60 = arith.constant 0 : index
    %c0_61 = arith.constant 0 : index
    %142 = vector.load %arg15[%c0_60, %c0_61] : memref<1x32xf32, #tpu.memory_space<vmem>>, vector<1x32xf32>
    %c0_62 = arith.constant 0 : index
    %c0_63 = arith.constant 0 : index
    %143 = vector.load %arg16[%c0_62, %c0_63] : memref<1x32xf32, #tpu.memory_space<vmem>>, vector<1x32xf32>
    %cst_64 = arith.constant dense<0.000000e+00> : vector<8x128xf32>
    %144 = tpu.matmul %137, %138, %cst_64 {dimension_numbers = #tpu.dot_dimension_numbers<[1], [0], [0], [1], [0, 0, 1, 1], [], []>} : vector<8x32xf32>, vector<32x128xf32>, vector<8x128xf32> -> vector<8x128xf32>
    %145 = vector.broadcast %139 : vector<1x128xf32> to vector<8x128xf32>
    %146 = arith.addf %144, %145 : vector<8x128xf32>
    %cst_65 = arith.constant 5.000000e-01 : f32
    %147 = vector.broadcast %cst_65 : f32 to vector<8x128xf32>
    %148 = arith.mulf %147, %146 : vector<8x128xf32>
    %cst_66 = arith.constant 4.471500e-02 : f32
    %149 = vector.broadcast %cst_66 : f32 to vector<8x128xf32>
    %150 = arith.mulf %149, %146 : vector<8x128xf32>
    %151 = arith.mulf %150, %146 : vector<8x128xf32>
    %152 = arith.mulf %151, %146 : vector<8x128xf32>
    %153 = arith.addf %146, %152 : vector<8x128xf32>
    %cst_67 = arith.constant 0.797884583 : f32
    %154 = vector.broadcast %cst_67 : f32 to vector<8x128xf32>
    %155 = arith.mulf %154, %153 : vector<8x128xf32>
    %156 = math.tanh %155 : vector<8x128xf32>
    %cst_68 = arith.constant 1.000000e+00 : f32
    %157 = vector.broadcast %cst_68 : f32 to vector<8x128xf32>
    %158 = arith.addf %157, %156 : vector<8x128xf32>
    %159 = arith.mulf %148, %158 : vector<8x128xf32>
    %cst_69 = arith.constant dense<0.000000e+00> : vector<8x32xf32>
    %160 = tpu.matmul %159, %140, %cst_69 {dimension_numbers = #tpu.dot_dimension_numbers<[1], [0], [0], [1], [0, 0, 1, 1], [], []>} : vector<8x128xf32>, vector<128x32xf32>, vector<8x32xf32> -> vector<8x32xf32>
    %161 = vector.broadcast %141 : vector<1x32xf32> to vector<8x32xf32>
    %162 = arith.addf %160, %161 : vector<8x32xf32>
    %163 = arith.addf %162, %137 : vector<8x32xf32>
    %cst_70 = arith.constant dense<0.000000e+00> : vector<8xf32>
    %164 = vector.multi_reduction <add>, %163, %cst_70 [1] : vector<8x32xf32> to vector<8xf32>
    %165 = vector.shape_cast %164 : vector<8xf32> to vector<8x1xf32>
    %cst_71 = arith.constant 3.200000e+01 : f32
    %166 = vector.broadcast %cst_71 : f32 to vector<8x1xf32>
    %167 = arith.divf %165, %166 : vector<8x1xf32>
    %168 = vector.broadcast %167 : vector<8x1xf32> to vector<8x32xf32>
    %169 = arith.subf %163, %168 : vector<8x32xf32>
    %170 = arith.mulf %169, %169 : vector<8x32xf32>
    %cst_72 = arith.constant dense<0.000000e+00> : vector<8xf32>
    %171 = vector.multi_reduction <add>, %170, %cst_72 [1] : vector<8x32xf32> to vector<8xf32>
    %172 = vector.shape_cast %171 : vector<8xf32> to vector<8x1xf32>
    %cst_73 = arith.constant 3.200000e+01 : f32
    %173 = vector.broadcast %cst_73 : f32 to vector<8x1xf32>
    %174 = arith.divf %172, %173 : vector<8x1xf32>
    %175 = vector.broadcast %167 : vector<8x1xf32> to vector<8x32xf32>
    %176 = arith.subf %163, %175 : vector<8x32xf32>
    %cst_74 = arith.constant 9.99999996E-13 : f32
    %177 = vector.broadcast %cst_74 : f32 to vector<8x1xf32>
    %178 = arith.addf %174, %177 : vector<8x1xf32>
    %179 = math.rsqrt %178 : vector<8x1xf32>
    %180 = vector.broadcast %179 : vector<8x1xf32> to vector<8x32xf32>
    %181 = arith.mulf %176, %180 : vector<8x32xf32>
    %182 = vector.broadcast %142 : vector<1x32xf32> to vector<8x32xf32>
    %183 = arith.mulf %181, %182 : vector<8x32xf32>
    %184 = vector.broadcast %143 : vector<1x32xf32> to vector<8x32xf32>
    %185 = arith.addf %183, %184 : vector<8x32xf32>
    %c0_75 = arith.constant 0 : index
    %c0_76 = arith.constant 0 : index
    %c0_77 = arith.constant 0 : index
    %186 = vector.load %arg17[%c0_75, %c0_76, %c0_77] : memref<1x8x32xf32, #tpu.memory_space<vmem>>, vector<1x8x32xf32>
    %187 = vector.shape_cast %186 : vector<1x8x32xf32> to vector<8x32xf32>
    %188 = vector.shape_cast %185 : vector<8x32xf32> to vector<1x8x32xf32>
    tpu.vector_store %arg17[%c0_75, %c0_76, %c0_77], %188 {strides = array<i32>} : memref<1x8x32xf32, #tpu.memory_space<vmem>>, vector<1x8x32xf32>,
    return
  }
  func.func @transform_0(%arg0: i32) -> (i32, i32, i32) {
    %c0_i32 = arith.constant 0 : i32
    %c0_i32_0 = arith.constant 0 : i32
    %c0_i32_1 = arith.constant 0 : i32
    return %arg0, %c0_i32, %c0_i32_0 : i32, i32, i32
  }
  func.func @transform_1(%arg0: i32) -> (i32, i32, i32) {
    %c0_i32 = arith.constant 0 : i32
    %c0_i32_0 = arith.constant 0 : i32
    %c0_i32_1 = arith.constant 0 : i32
    return %arg0, %c0_i32, %c0_i32_0 : i32, i32, i32
  }
  func.func @transform_2(%arg0: i32) -> (i32, i32) {
    %c0_i32 = arith.constant 0 : i32
    %c0_i32_0 = arith.constant 0 : i32
    %c0_i32_1 = arith.constant 0 : i32
    return %c0_i32, %c0_i32_0 : i32, i32
  }
  func.func @transform_3(%arg0: i32) -> (i32, i32) {
    %c0_i32 = arith.constant 0 : i32
    %c0_i32_0 = arith.constant 0 : i32
    %c0_i32_1 = arith.constant 0 : i32
    return %c0_i32, %c0_i32_0 : i32, i32
  }
  func.func @transform_4(%arg0: i32) -> (i32, i32) {
    %c0_i32 = arith.constant 0 : i32
    %c0_i32_0 = arith.constant 0 : i32
    %c0_i32_1 = arith.constant 0 : i32
    return %c0_i32, %c0_i32_0 : i32, i32
  }
  func.func @transform_5(%arg0: i32) -> (i32, i32) {
    %c0_i32 = arith.constant 0 : i32
    %c0_i32_0 = arith.constant 0 : i32
    %c0_i32_1 = arith.constant 0 : i32
    return %c0_i32, %c0_i32_0 : i32, i32
  }
  func.func @transform_6(%arg0: i32) -> (i32, i32) {
    %c0_i32 = arith.constant 0 : i32
    %c0_i32_0 = arith.constant 0 : i32
    %c0_i32_1 = arith.constant 0 : i32
    return %c0_i32, %c0_i32_0 : i32, i32
  }
  func.func @transform_7(%arg0: i32) -> (i32, i32) {
    %c0_i32 = arith.constant 0 : i32
    %c0_i32_0 = arith.constant 0 : i32
    %c0_i32_1 = arith.constant 0 : i32
    return %c0_i32, %c0_i32_0 : i32, i32
  }
  func.func @transform_8(%arg0: i32) -> (i32, i32) {
    %c0_i32 = arith.constant 0 : i32
    %c0_i32_0 = arith.constant 0 : i32
    %c0_i32_1 = arith.constant 0 : i32
    return %c0_i32, %c0_i32_0 : i32, i32
  }
  func.func @transform_9(%arg0: i32) -> (i32, i32) {
    %c0_i32 = arith.constant 0 : i32
    %c0_i32_0 = arith.constant 0 : i32
    %c0_i32_1 = arith.constant 0 : i32
    return %c0_i32, %c0_i32_0 : i32, i32
  }
  func.func @transform_10(%arg0: i32) -> (i32, i32) {
    %c0_i32 = arith.constant 0 : i32
    %c0_i32_0 = arith.constant 0 : i32
    %c0_i32_1 = arith.constant 0 : i32
    return %c0_i32, %c0_i32_0 : i32, i32
  }
  func.func @transform_11(%arg0: i32) -> (i32, i32) {
    %c0_i32 = arith.constant 0 : i32
    %c0_i32_0 = arith.constant 0 : i32
    %c0_i32_1 = arith.constant 0 : i32
    return %c0_i32, %c0_i32_0 : i32, i32
  }
  func.func @transform_12(%arg0: i32) -> (i32, i32) {
    %c0_i32 = arith.constant 0 : i32
    %c0_i32_0 = arith.constant 0 : i32
    %c0_i32_1 = arith.constant 0 : i32
    return %c0_i32, %c0_i32_0 : i32, i32
  }
  func.func @transform_13(%arg0: i32) -> (i32, i32) {
    %c0_i32 = arith.constant 0 : i32
    %c0_i32_0 = arith.constant 0 : i32
    %c0_i32_1 = arith.constant 0 : i32
    return %c0_i32, %c0_i32_0 : i32, i32
  }
  func.func @transform_14(%arg0: i32) -> (i32, i32) {
    %c0_i32 = arith.constant 0 : i32
    %c0_i32_0 = arith.constant 0 : i32
    %c0_i32_1 = arith.constant 0 : i32
    return %c0_i32, %c0_i32_0 : i32, i32
  }
  func.func @transform_15(%arg0: i32) -> (i32, i32) {
    %c0_i32 = arith.constant 0 : i32
    %c0_i32_0 = arith.constant 0 : i32
    %c0_i32_1 = arith.constant 0 : i32
    return %c0_i32, %c0_i32_0 : i32, i32
  }
  func.func @transform_16(%arg0: i32) -> (i32, i32, i32) {
    %c0_i32 = arith.constant 0 : i32
    %c0_i32_0 = arith.constant 0 : i32
    %c0_i32_1 = arith.constant 0 : i32
    return %arg0, %c0_i32, %c0_i32_0 : i32, i32, i32
  }
}

module attributes {stable_mosaic.version = 11 : i64} {
  func.func @_visn_encoder_kernel(%arg0: memref<16x64xf32, #tpu.memory_space<vmem>>, %arg1: memref<16x4xf32, #tpu.memory_space<vmem>>, %arg2: memref<64x32xf32, #tpu.memory_space<vmem>>, %arg3: memref<1x32xf32, #tpu.memory_space<vmem>>, %arg4: memref<1x32xf32, #tpu.memory_space<vmem>>, %arg5: memref<1x32xf32, #tpu.memory_space<vmem>>, %arg6: memref<4x32xf32, #tpu.memory_space<vmem>>, %arg7: memref<1x32xf32, #tpu.memory_space<vmem>>, %arg8: memref<1x32xf32, #tpu.memory_space<vmem>>, %arg9: memref<1x32xf32, #tpu.memory_space<vmem>>, %arg10: memref<16x32xf32, #tpu.memory_space<vmem>>) attributes {dimension_semantics = [], scalar_prefetch = 0 : i64, scratch_operands = 0 : i64, tpu.core_type = #tpu.core_type<tc>} {
    %c0 = arith.constant 0 : index
    %c0_0 = arith.constant 0 : index
    %0 = vector.load %arg0[%c0, %c0_0] : memref<16x64xf32, #tpu.memory_space<vmem>>, vector<16x64xf32>
    %c0_1 = arith.constant 0 : index
    %c0_2 = arith.constant 0 : index
    %1 = vector.load %arg1[%c0_1, %c0_2] : memref<16x4xf32, #tpu.memory_space<vmem>>, vector<16x4xf32>
    %c0_3 = arith.constant 0 : index
    %c0_4 = arith.constant 0 : index
    %2 = vector.load %arg2[%c0_3, %c0_4] : memref<64x32xf32, #tpu.memory_space<vmem>>, vector<64x32xf32>
    %cst = arith.constant dense<0.000000e+00> : vector<16x32xf32>
    %3 = tpu.matmul %0, %2, %cst {dimension_numbers = #tpu.dot_dimension_numbers<[1], [0], [0], [1], [0, 0, 1, 1], [], []>} : vector<16x64xf32>, vector<64x32xf32>, vector<16x32xf32> -> vector<16x32xf32>
    %c0_5 = arith.constant 0 : index
    %c0_6 = arith.constant 0 : index
    %4 = vector.load %arg3[%c0_5, %c0_6] : memref<1x32xf32, #tpu.memory_space<vmem>>, vector<1x32xf32>
    %5 = vector.broadcast %4 : vector<1x32xf32> to vector<16x32xf32>
    %6 = arith.addf %3, %5 : vector<16x32xf32>
    %c0_7 = arith.constant 0 : index
    %c0_8 = arith.constant 0 : index
    %7 = vector.load %arg4[%c0_7, %c0_8] : memref<1x32xf32, #tpu.memory_space<vmem>>, vector<1x32xf32>
    %c0_9 = arith.constant 0 : index
    %c0_10 = arith.constant 0 : index
    %8 = vector.load %arg5[%c0_9, %c0_10] : memref<1x32xf32, #tpu.memory_space<vmem>>, vector<1x32xf32>
    %cst_11 = arith.constant dense<0.000000e+00> : vector<16xf32>
    %9 = vector.multi_reduction <add>, %6, %cst_11 [1] : vector<16x32xf32> to vector<16xf32>
    %10 = vector.shape_cast %9 : vector<16xf32> to vector<16x1xf32>
    %cst_12 = arith.constant 3.200000e+01 : f32
    %11 = vector.broadcast %cst_12 : f32 to vector<16x1xf32>
    %12 = arith.divf %10, %11 : vector<16x1xf32>
    %13 = vector.broadcast %12 : vector<16x1xf32> to vector<16x32xf32>
    %14 = arith.subf %6, %13 : vector<16x32xf32>
    %15 = arith.mulf %14, %14 : vector<16x32xf32>
    %cst_13 = arith.constant dense<0.000000e+00> : vector<16xf32>
    %16 = vector.multi_reduction <add>, %15, %cst_13 [1] : vector<16x32xf32> to vector<16xf32>
    %17 = vector.shape_cast %16 : vector<16xf32> to vector<16x1xf32>
    %cst_14 = arith.constant 3.200000e+01 : f32
    %18 = vector.broadcast %cst_14 : f32 to vector<16x1xf32>
    %19 = arith.divf %17, %18 : vector<16x1xf32>
    %20 = vector.broadcast %12 : vector<16x1xf32> to vector<16x32xf32>
    %21 = arith.subf %6, %20 : vector<16x32xf32>
    %cst_15 = arith.constant 9.99999996E-13 : f32
    %22 = vector.broadcast %cst_15 : f32 to vector<16x1xf32>
    %23 = arith.addf %19, %22 : vector<16x1xf32>
    %24 = math.rsqrt %23 : vector<16x1xf32>
    %25 = vector.broadcast %24 : vector<16x1xf32> to vector<16x32xf32>
    %26 = arith.mulf %21, %25 : vector<16x32xf32>
    %27 = vector.broadcast %7 : vector<1x32xf32> to vector<16x32xf32>
    %28 = arith.mulf %26, %27 : vector<16x32xf32>
    %29 = vector.broadcast %8 : vector<1x32xf32> to vector<16x32xf32>
    %30 = arith.addf %28, %29 : vector<16x32xf32>
    %c0_16 = arith.constant 0 : index
    %c0_17 = arith.constant 0 : index
    %31 = vector.load %arg6[%c0_16, %c0_17] : memref<4x32xf32, #tpu.memory_space<vmem>>, vector<4x32xf32>
    %cst_18 = arith.constant dense<0.000000e+00> : vector<16x32xf32>
    %32 = tpu.matmul %1, %31, %cst_18 {dimension_numbers = #tpu.dot_dimension_numbers<[1], [0], [0], [1], [0, 0, 1, 1], [], []>} : vector<16x4xf32>, vector<4x32xf32>, vector<16x32xf32> -> vector<16x32xf32>
    %c0_19 = arith.constant 0 : index
    %c0_20 = arith.constant 0 : index
    %33 = vector.load %arg7[%c0_19, %c0_20] : memref<1x32xf32, #tpu.memory_space<vmem>>, vector<1x32xf32>
    %34 = vector.broadcast %33 : vector<1x32xf32> to vector<16x32xf32>
    %35 = arith.addf %32, %34 : vector<16x32xf32>
    %c0_21 = arith.constant 0 : index
    %c0_22 = arith.constant 0 : index
    %36 = vector.load %arg8[%c0_21, %c0_22] : memref<1x32xf32, #tpu.memory_space<vmem>>, vector<1x32xf32>
    %c0_23 = arith.constant 0 : index
    %c0_24 = arith.constant 0 : index
    %37 = vector.load %arg9[%c0_23, %c0_24] : memref<1x32xf32, #tpu.memory_space<vmem>>, vector<1x32xf32>
    %cst_25 = arith.constant dense<0.000000e+00> : vector<16xf32>
    %38 = vector.multi_reduction <add>, %35, %cst_25 [1] : vector<16x32xf32> to vector<16xf32>
    %39 = vector.shape_cast %38 : vector<16xf32> to vector<16x1xf32>
    %cst_26 = arith.constant 3.200000e+01 : f32
    %40 = vector.broadcast %cst_26 : f32 to vector<16x1xf32>
    %41 = arith.divf %39, %40 : vector<16x1xf32>
    %42 = vector.broadcast %41 : vector<16x1xf32> to vector<16x32xf32>
    %43 = arith.subf %35, %42 : vector<16x32xf32>
    %44 = arith.mulf %43, %43 : vector<16x32xf32>
    %cst_27 = arith.constant dense<0.000000e+00> : vector<16xf32>
    %45 = vector.multi_reduction <add>, %44, %cst_27 [1] : vector<16x32xf32> to vector<16xf32>
    %46 = vector.shape_cast %45 : vector<16xf32> to vector<16x1xf32>
    %cst_28 = arith.constant 3.200000e+01 : f32
    %47 = vector.broadcast %cst_28 : f32 to vector<16x1xf32>
    %48 = arith.divf %46, %47 : vector<16x1xf32>
    %49 = vector.broadcast %41 : vector<16x1xf32> to vector<16x32xf32>
    %50 = arith.subf %35, %49 : vector<16x32xf32>
    %cst_29 = arith.constant 9.99999996E-13 : f32
    %51 = vector.broadcast %cst_29 : f32 to vector<16x1xf32>
    %52 = arith.addf %48, %51 : vector<16x1xf32>
    %53 = math.rsqrt %52 : vector<16x1xf32>
    %54 = vector.broadcast %53 : vector<16x1xf32> to vector<16x32xf32>
    %55 = arith.mulf %50, %54 : vector<16x32xf32>
    %56 = vector.broadcast %36 : vector<1x32xf32> to vector<16x32xf32>
    %57 = arith.mulf %55, %56 : vector<16x32xf32>
    %58 = vector.broadcast %37 : vector<1x32xf32> to vector<16x32xf32>
    %59 = arith.addf %57, %58 : vector<16x32xf32>
    %60 = arith.addf %30, %59 : vector<16x32xf32>
    %cst_30 = arith.constant 5.000000e-01 : f32
    %61 = vector.broadcast %cst_30 : f32 to vector<16x32xf32>
    %62 = arith.mulf %61, %60 : vector<16x32xf32>
    %c0_31 = arith.constant 0 : index
    %c0_32 = arith.constant 0 : index
    %63 = vector.load %arg10[%c0_31, %c0_32] : memref<16x32xf32, #tpu.memory_space<vmem>>, vector<16x32xf32>
    tpu.vector_store %arg10[%c0_31, %c0_32], %62 {strides = array<i32>} : memref<16x32xf32, #tpu.memory_space<vmem>>, vector<16x32xf32>,
    return
  }
}

module attributes {stable_mosaic.version = 11 : i64} {
  func.func @_cross_layer_kernel(%arg0: i32, %arg1: memref<1x8x32xf32, #tpu.memory_space<vmem>>, %arg2: memref<1x8x32xf32, #tpu.memory_space<vmem>>, %arg3: memref<1x1x8xf32, #tpu.memory_space<vmem>>, %arg4: memref<1x1x8xf32, #tpu.memory_space<vmem>>, %arg5: memref<32x32xf32, #tpu.memory_space<vmem>>, %arg6: memref<1x32xf32, #tpu.memory_space<vmem>>, %arg7: memref<32x64xf32, #tpu.memory_space<vmem>>, %arg8: memref<1x64xf32, #tpu.memory_space<vmem>>, %arg9: memref<32x32xf32, #tpu.memory_space<vmem>>, %arg10: memref<1x32xf32, #tpu.memory_space<vmem>>, %arg11: memref<1x32xf32, #tpu.memory_space<vmem>>, %arg12: memref<1x32xf32, #tpu.memory_space<vmem>>, %arg13: memref<32x32xf32, #tpu.memory_space<vmem>>, %arg14: memref<1x32xf32, #tpu.memory_space<vmem>>, %arg15: memref<32x64xf32, #tpu.memory_space<vmem>>, %arg16: memref<1x64xf32, #tpu.memory_space<vmem>>, %arg17: memref<32x32xf32, #tpu.memory_space<vmem>>, %arg18: memref<1x32xf32, #tpu.memory_space<vmem>>, %arg19: memref<1x32xf32, #tpu.memory_space<vmem>>, %arg20: memref<1x32xf32, #tpu.memory_space<vmem>>, %arg21: memref<32x128xf32, #tpu.memory_space<vmem>>, %arg22: memref<1x128xf32, #tpu.memory_space<vmem>>, %arg23: memref<128x32xf32, #tpu.memory_space<vmem>>, %arg24: memref<1x32xf32, #tpu.memory_space<vmem>>, %arg25: memref<1x32xf32, #tpu.memory_space<vmem>>, %arg26: memref<1x32xf32, #tpu.memory_space<vmem>>, %arg27: memref<1x8x32xf32, #tpu.memory_space<vmem>>) attributes {dimension_semantics = [#tpu.dimension_semantics<parallel>], iteration_bounds = array<i64: 2>, scalar_prefetch = 0 : i64, scratch_operands = 0 : i64, tpu.core_type = #tpu.core_type<tc>, window_params = [{transform_indices = @transform_0, window_bounds = array<i64: 1, 8, 32>}, {transform_indices = @transform_1, window_bounds = array<i64: 1, 8, 32>}, {transform_indices = @transform_2, window_bounds = array<i64: 1, 1, 8>}, {transform_indices = @transform_3, window_bounds = array<i64: 1, 1, 8>}, {pipeline_mode = #tpu.pipeline_mode<synchronous>, transform_indices = @transform_4, window_bounds = array<i64: 32, 32>}, {pipeline_mode = #tpu.pipeline_mode<synchronous>, transform_indices = @transform_5, window_bounds = array<i64: 1, 32>}, {pipeline_mode = #tpu.pipeline_mode<synchronous>, transform_indices = @transform_6, window_bounds = array<i64: 32, 64>}, {pipeline_mode = #tpu.pipeline_mode<synchronous>, transform_indices = @transform_7, window_bounds = array<i64: 1, 64>}, {pipeline_mode = #tpu.pipeline_mode<synchronous>, transform_indices = @transform_8, window_bounds = array<i64: 32, 32>}, {pipeline_mode = #tpu.pipeline_mode<synchronous>, transform_indices = @transform_9, window_bounds = array<i64: 1, 32>}, {pipeline_mode = #tpu.pipeline_mode<synchronous>, transform_indices = @transform_10, window_bounds = array<i64: 1, 32>}, {pipeline_mode = #tpu.pipeline_mode<synchronous>, transform_indices = @transform_11, window_bounds = array<i64: 1, 32>}, {pipeline_mode = #tpu.pipeline_mode<synchronous>, transform_indices = @transform_12, window_bounds = array<i64: 32, 32>}, {pipeline_mode = #tpu.pipeline_mode<synchronous>, transform_indices = @transform_13, window_bounds = array<i64: 1, 32>}, {pipeline_mode = #tpu.pipeline_mode<synchronous>, transform_indices = @transform_14, window_bounds = array<i64: 32, 64>}, {pipeline_mode = #tpu.pipeline_mode<synchronous>, transform_indices = @transform_15, window_bounds = array<i64: 1, 64>}, {pipeline_mode = #tpu.pipeline_mode<synchronous>, transform_indices = @transform_16, window_bounds = array<i64: 32, 32>}, {pipeline_mode = #tpu.pipeline_mode<synchronous>, transform_indices = @transform_17, window_bounds = array<i64: 1, 32>}, {pipeline_mode = #tpu.pipeline_mode<synchronous>, transform_indices = @transform_18, window_bounds = array<i64: 1, 32>}, {pipeline_mode = #tpu.pipeline_mode<synchronous>, transform_indices = @transform_19, window_bounds = array<i64: 1, 32>}, {pipeline_mode = #tpu.pipeline_mode<synchronous>, transform_indices = @transform_20, window_bounds = array<i64: 32, 128>}, {pipeline_mode = #tpu.pipeline_mode<synchronous>, transform_indices = @transform_21, window_bounds = array<i64: 1, 128>}, {pipeline_mode = #tpu.pipeline_mode<synchronous>, transform_indices = @transform_22, window_bounds = array<i64: 128, 32>}, {pipeline_mode = #tpu.pipeline_mode<synchronous>, transform_indices = @transform_23, window_bounds = array<i64: 1, 32>}, {pipeline_mode = #tpu.pipeline_mode<synchronous>, transform_indices = @transform_24, window_bounds = array<i64: 1, 32>}, {pipeline_mode = #tpu.pipeline_mode<synchronous>, transform_indices = @transform_25, window_bounds = array<i64: 1, 32>}, {transform_indices = @transform_26, window_bounds = array<i64: 1, 8, 32>}]} {
    %c0 = arith.constant 0 : index
    %c0_0 = arith.constant 0 : index
    %c0_1 = arith.constant 0 : index
    %0 = vector.load %arg1[%c0, %c0_0, %c0_1] : memref<1x8x32xf32, #tpu.memory_space<vmem>>, vector<1x8x32xf32>
    %1 = vector.shape_cast %0 : vector<1x8x32xf32> to vector<8x32xf32>
    %c0_2 = arith.constant 0 : index
    %c0_3 = arith.constant 0 : index
    %c0_4 = arith.constant 0 : index
    %2 = vector.load %arg2[%c0_2, %c0_3, %c0_4] : memref<1x8x32xf32, #tpu.memory_space<vmem>>, vector<1x8x32xf32>
    %3 = vector.shape_cast %2 : vector<1x8x32xf32> to vector<8x32xf32>
    %c0_5 = arith.constant 0 : index
    %c0_6 = arith.constant 0 : index
    %c0_7 = arith.constant 0 : index
    %4 = vector.load %arg3[%c0_5, %c0_6, %c0_7] : memref<1x1x8xf32, #tpu.memory_space<vmem>>, vector<1x1x8xf32>
    %5 = vector.shape_cast %4 : vector<1x1x8xf32> to vector<1x8xf32>
    %c0_8 = arith.constant 0 : index
    %c0_9 = arith.constant 0 : index
    %c0_10 = arith.constant 0 : index
    %6 = vector.load %arg4[%c0_8, %c0_9, %c0_10] : memref<1x1x8xf32, #tpu.memory_space<vmem>>, vector<1x1x8xf32>
    %7 = vector.shape_cast %6 : vector<1x1x8xf32> to vector<1x8xf32>
    %c0_11 = arith.constant 0 : index
    %c0_12 = arith.constant 0 : index
    %8 = vector.load %arg5[%c0_11, %c0_12] : memref<32x32xf32, #tpu.memory_space<vmem>>, vector<32x32xf32>
    %c0_13 = arith.constant 0 : index
    %c0_14 = arith.constant 0 : index
    %9 = vector.load %arg6[%c0_13, %c0_14] : memref<1x32xf32, #tpu.memory_space<vmem>>, vector<1x32xf32>
    %c0_15 = arith.constant 0 : index
    %c0_16 = arith.constant 0 : index
    %10 = vector.load %arg7[%c0_15, %c0_16] : memref<32x64xf32, #tpu.memory_space<vmem>>, vector<32x64xf32>
    %c0_17 = arith.constant 0 : index
    %c0_18 = arith.constant 0 : index
    %11 = vector.load %arg8[%c0_17, %c0_18] : memref<1x64xf32, #tpu.memory_space<vmem>>, vector<1x64xf32>
    %c0_19 = arith.constant 0 : index
    %c0_20 = arith.constant 0 : index
    %12 = vector.load %arg9[%c0_19, %c0_20] : memref<32x32xf32, #tpu.memory_space<vmem>>, vector<32x32xf32>
    %c0_21 = arith.constant 0 : index
    %c0_22 = arith.constant 0 : index
    %13 = vector.load %arg10[%c0_21, %c0_22] : memref<1x32xf32, #tpu.memory_space<vmem>>, vector<1x32xf32>
    %c0_23 = arith.constant 0 : index
    %c0_24 = arith.constant 0 : index
    %14 = vector.load %arg11[%c0_23, %c0_24] : memref<1x32xf32, #tpu.memory_space<vmem>>, vector<1x32xf32>
    %c0_25 = arith.constant 0 : index
    %c0_26 = arith.constant 0 : index
    %15 = vector.load %arg12[%c0_25, %c0_26] : memref<1x32xf32, #tpu.memory_space<vmem>>, vector<1x32xf32>
    %cst = arith.constant dense<0.000000e+00> : vector<8x32xf32>
    %16 = tpu.matmul %1, %8, %cst {dimension_numbers = #tpu.dot_dimension_numbers<[1], [0], [0], [1], [0, 0, 1, 1], [], []>} : vector<8x32xf32>, vector<32x32xf32>, vector<8x32xf32> -> vector<8x32xf32>
    %17 = vector.broadcast %9 : vector<1x32xf32> to vector<8x32xf32>
    %18 = arith.addf %16, %17 : vector<8x32xf32>
    %cst_27 = arith.constant dense<0.000000e+00> : vector<8x64xf32>
    %19 = tpu.matmul %3, %10, %cst_27 {dimension_numbers = #tpu.dot_dimension_numbers<[1], [0], [0], [1], [0, 0, 1, 1], [], []>} : vector<8x32xf32>, vector<32x64xf32>, vector<8x64xf32> -> vector<8x64xf32>
    %20 = vector.broadcast %11 : vector<1x64xf32> to vector<8x64xf32>
    %21 = arith.addf %19, %20 : vector<8x64xf32>
    %22 = vector.extract_strided_slice %21 {offsets = [0, 0], sizes = [8, 32], strides = [1, 1]} : vector<8x64xf32> to vector<8x32xf32>
    %23 = vector.extract_strided_slice %21 {offsets = [0, 32], sizes = [8, 32], strides = [1, 1]} : vector<8x64xf32> to vector<8x32xf32>
    %cst_28 = arith.constant 0.000000e+00 : f32
    %24 = vector.broadcast %cst_28 : f32 to vector<8x32xf32>
    %25 = vector.extract_strided_slice %18 {offsets = [0, 0], sizes = [8, 8], strides = [1, 1]} : vector<8x32xf32> to vector<8x8xf32>
    %26 = vector.extract_strided_slice %22 {offsets = [0, 0], sizes = [8, 8], strides = [1, 1]} : vector<8x32xf32> to vector<8x8xf32>
    %27 = tpu.transpose %26, [1, 0] : vector<8x8xf32> -> vector<8x8xf32>
    %cst_29 = arith.constant dense<0.000000e+00> : vector<8x8xf32>
    %28 = tpu.matmul %25, %27, %cst_29 {dimension_numbers = #tpu.dot_dimension_numbers<[1], [0], [0], [1], [0, 0, 1, 1], [], []>} : vector<8x8xf32>, vector<8x8xf32>, vector<8x8xf32> -> vector<8x8xf32>
    %cst_30 = arith.constant 0.353553385 : f32
    %29 = vector.broadcast %cst_30 : f32 to vector<8x8xf32>
    %30 = arith.mulf %28, %29 : vector<8x8xf32>
    %31 = vector.broadcast %5 : vector<1x8xf32> to vector<8x8xf32>
    %32 = arith.addf %30, %31 : vector<8x8xf32>
    %cst_31 = arith.constant dense<0xFF800000> : vector<8xf32>
    %33 = vector.multi_reduction <maximumf>, %32, %cst_31 [1] : vector<8x8xf32> to vector<8xf32>
    %34 = vector.shape_cast %33 : vector<8xf32> to vector<8x1xf32>
    %35 = vector.broadcast %34 : vector<8x1xf32> to vector<8x8xf32>
    %36 = arith.subf %32, %35 : vector<8x8xf32>
    %37 = math.exp %36 : vector<8x8xf32>
    %cst_32 = arith.constant dense<0.000000e+00> : vector<8xf32>
    %38 = vector.multi_reduction <add>, %37, %cst_32 [1] : vector<8x8xf32> to vector<8xf32>
    %39 = vector.shape_cast %38 : vector<8xf32> to vector<8x1xf32>
    %40 = tpu.reciprocal %39 {approx = true} : vector<8x1xf32> -> vector<8x1xf32>
    %41 = vector.broadcast %40 : vector<8x1xf32> to vector<8x8xf32>
    %42 = arith.mulf %37, %41 : vector<8x8xf32>
    %43 = vector.extract_strided_slice %23 {offsets = [0, 0], sizes = [8, 8], strides = [1, 1]} : vector<8x32xf32> to vector<8x8xf32>
    %cst_33 = arith.constant dense<0.000000e+00> : vector<8x8xf32>
    %44 = tpu.matmul %42, %43, %cst_33 {dimension_numbers = #tpu.dot_dimension_numbers<[1], [0], [0], [1], [0, 0, 1, 1], [], []>} : vector<8x8xf32>, vector<8x8xf32>, vector<8x8xf32> -> vector<8x8xf32>
    %45 = vector.extract_strided_slice %12 {offsets = [0, 0], sizes = [8, 32], strides = [1, 1]} : vector<32x32xf32> to vector<8x32xf32>
    %cst_34 = arith.constant dense<0.000000e+00> : vector<8x32xf32>
    %46 = tpu.matmul %44, %45, %cst_34 {dimension_numbers = #tpu.dot_dimension_numbers<[1], [0], [0], [1], [0, 0, 1, 1], [], []>} : vector<8x8xf32>, vector<8x32xf32>, vector<8x32xf32> -> vector<8x32xf32>
    %47 = arith.addf %24, %46 : vector<8x32xf32>
    %48 = vector.extract_strided_slice %18 {offsets = [0, 8], sizes = [8, 8], strides = [1, 1]} : vector<8x32xf32> to vector<8x8xf32>
    %49 = vector.extract_strided_slice %22 {offsets = [0, 8], sizes = [8, 8], strides = [1, 1]} : vector<8x32xf32> to vector<8x8xf32>
    %50 = tpu.transpose %49, [1, 0] : vector<8x8xf32> -> vector<8x8xf32>
    %cst_35 = arith.constant dense<0.000000e+00> : vector<8x8xf32>
    %51 = tpu.matmul %48, %50, %cst_35 {dimension_numbers = #tpu.dot_dimension_numbers<[1], [0], [0], [1], [0, 0, 1, 1], [], []>} : vector<8x8xf32>, vector<8x8xf32>, vector<8x8xf32> -> vector<8x8xf32>
    %cst_36 = arith.constant 0.353553385 : f32
    %52 = vector.broadcast %cst_36 : f32 to vector<8x8xf32>
    %53 = arith.mulf %51, %52 : vector<8x8xf32>
    %54 = vector.broadcast %5 : vector<1x8xf32> to vector<8x8xf32>
    %55 = arith.addf %53, %54 : vector<8x8xf32>
    %cst_37 = arith.constant dense<0xFF800000> : vector<8xf32>
    %56 = vector.multi_reduction <maximumf>, %55, %cst_37 [1] : vector<8x8xf32> to vector<8xf32>
    %57 = vector.shape_cast %56 : vector<8xf32> to vector<8x1xf32>
    %58 = vector.broadcast %57 : vector<8x1xf32> to vector<8x8xf32>
    %59 = arith.subf %55, %58 : vector<8x8xf32>
    %60 = math.exp %59 : vector<8x8xf32>
    %cst_38 = arith.constant dense<0.000000e+00> : vector<8xf32>
    %61 = vector.multi_reduction <add>, %60, %cst_38 [1] : vector<8x8xf32> to vector<8xf32>
    %62 = vector.shape_cast %61 : vector<8xf32> to vector<8x1xf32>
    %63 = tpu.reciprocal %62 {approx = true} : vector<8x1xf32> -> vector<8x1xf32>
    %64 = vector.broadcast %63 : vector<8x1xf32> to vector<8x8xf32>
    %65 = arith.mulf %60, %64 : vector<8x8xf32>
    %66 = vector.extract_strided_slice %23 {offsets = [0, 8], sizes = [8, 8], strides = [1, 1]} : vector<8x32xf32> to vector<8x8xf32>
    %cst_39 = arith.constant dense<0.000000e+00> : vector<8x8xf32>
    %67 = tpu.matmul %65, %66, %cst_39 {dimension_numbers = #tpu.dot_dimension_numbers<[1], [0], [0], [1], [0, 0, 1, 1], [], []>} : vector<8x8xf32>, vector<8x8xf32>, vector<8x8xf32> -> vector<8x8xf32>
    %68 = vector.extract_strided_slice %12 {offsets = [8, 0], sizes = [8, 32], strides = [1, 1]} : vector<32x32xf32> to vector<8x32xf32>
    %cst_40 = arith.constant dense<0.000000e+00> : vector<8x32xf32>
    %69 = tpu.matmul %67, %68, %cst_40 {dimension_numbers = #tpu.dot_dimension_numbers<[1], [0], [0], [1], [0, 0, 1, 1], [], []>} : vector<8x8xf32>, vector<8x32xf32>, vector<8x32xf32> -> vector<8x32xf32>
    %70 = arith.addf %47, %69 : vector<8x32xf32>
    %71 = vector.extract_strided_slice %18 {offsets = [0, 16], sizes = [8, 8], strides = [1, 1]} : vector<8x32xf32> to vector<8x8xf32>
    %72 = vector.extract_strided_slice %22 {offsets = [0, 16], sizes = [8, 8], strides = [1, 1]} : vector<8x32xf32> to vector<8x8xf32>
    %73 = tpu.transpose %72, [1, 0] : vector<8x8xf32> -> vector<8x8xf32>
    %cst_41 = arith.constant dense<0.000000e+00> : vector<8x8xf32>
    %74 = tpu.matmul %71, %73, %cst_41 {dimension_numbers = #tpu.dot_dimension_numbers<[1], [0], [0], [1], [0, 0, 1, 1], [], []>} : vector<8x8xf32>, vector<8x8xf32>, vector<8x8xf32> -> vector<8x8xf32>
    %cst_42 = arith.constant 0.353553385 : f32
    %75 = vector.broadcast %cst_42 : f32 to vector<8x8xf32>
    %76 = arith.mulf %74, %75 : vector<8x8xf32>
    %77 = vector.broadcast %5 : vector<1x8xf32> to vector<8x8xf32>
    %78 = arith.addf %76, %77 : vector<8x8xf32>
    %cst_43 = arith.constant dense<0xFF800000> : vector<8xf32>
    %79 = vector.multi_reduction <maximumf>, %78, %cst_43 [1] : vector<8x8xf32> to vector<8xf32>
    %80 = vector.shape_cast %79 : vector<8xf32> to vector<8x1xf32>
    %81 = vector.broadcast %80 : vector<8x1xf32> to vector<8x8xf32>
    %82 = arith.subf %78, %81 : vector<8x8xf32>
    %83 = math.exp %82 : vector<8x8xf32>
    %cst_44 = arith.constant dense<0.000000e+00> : vector<8xf32>
    %84 = vector.multi_reduction <add>, %83, %cst_44 [1] : vector<8x8xf32> to vector<8xf32>
    %85 = vector.shape_cast %84 : vector<8xf32> to vector<8x1xf32>
    %86 = tpu.reciprocal %85 {approx = true} : vector<8x1xf32> -> vector<8x1xf32>
    %87 = vector.broadcast %86 : vector<8x1xf32> to vector<8x8xf32>
    %88 = arith.mulf %83, %87 : vector<8x8xf32>
    %89 = vector.extract_strided_slice %23 {offsets = [0, 16], sizes = [8, 8], strides = [1, 1]} : vector<8x32xf32> to vector<8x8xf32>
    %cst_45 = arith.constant dense<0.000000e+00> : vector<8x8xf32>
    %90 = tpu.matmul %88, %89, %cst_45 {dimension_numbers = #tpu.dot_dimension_numbers<[1], [0], [0], [1], [0, 0, 1, 1], [], []>} : vector<8x8xf32>, vector<8x8xf32>, vector<8x8xf32> -> vector<8x8xf32>
    %91 = vector.extract_strided_slice %12 {offsets = [16, 0], sizes = [8, 32], strides = [1, 1]} : vector<32x32xf32> to vector<8x32xf32>
    %cst_46 = arith.constant dense<0.000000e+00> : vector<8x32xf32>
    %92 = tpu.matmul %90, %91, %cst_46 {dimension_numbers = #tpu.dot_dimension_numbers<[1], [0], [0], [1], [0, 0, 1, 1], [], []>} : vector<8x8xf32>, vector<8x32xf32>, vector<8x32xf32> -> vector<8x32xf32>
    %93 = arith.addf %70, %92 : vector<8x32xf32>
    %94 = vector.extract_strided_slice %18 {offsets = [0, 24], sizes = [8, 8], strides = [1, 1]} : vector<8x32xf32> to vector<8x8xf32>
    %95 = vector.extract_strided_slice %22 {offsets = [0, 24], sizes = [8, 8], strides = [1, 1]} : vector<8x32xf32> to vector<8x8xf32>
    %96 = tpu.transpose %95, [1, 0] : vector<8x8xf32> -> vector<8x8xf32>
    %cst_47 = arith.constant dense<0.000000e+00> : vector<8x8xf32>
    %97 = tpu.matmul %94, %96, %cst_47 {dimension_numbers = #tpu.dot_dimension_numbers<[1], [0], [0], [1], [0, 0, 1, 1], [], []>} : vector<8x8xf32>, vector<8x8xf32>, vector<8x8xf32> -> vector<8x8xf32>
    %cst_48 = arith.constant 0.353553385 : f32
    %98 = vector.broadcast %cst_48 : f32 to vector<8x8xf32>
    %99 = arith.mulf %97, %98 : vector<8x8xf32>
    %100 = vector.broadcast %5 : vector<1x8xf32> to vector<8x8xf32>
    %101 = arith.addf %99, %100 : vector<8x8xf32>
    %cst_49 = arith.constant dense<0xFF800000> : vector<8xf32>
    %102 = vector.multi_reduction <maximumf>, %101, %cst_49 [1] : vector<8x8xf32> to vector<8xf32>
    %103 = vector.shape_cast %102 : vector<8xf32> to vector<8x1xf32>
    %104 = vector.broadcast %103 : vector<8x1xf32> to vector<8x8xf32>
    %105 = arith.subf %101, %104 : vector<8x8xf32>
    %106 = math.exp %105 : vector<8x8xf32>
    %cst_50 = arith.constant dense<0.000000e+00> : vector<8xf32>
    %107 = vector.multi_reduction <add>, %106, %cst_50 [1] : vector<8x8xf32> to vector<8xf32>
    %108 = vector.shape_cast %107 : vector<8xf32> to vector<8x1xf32>
    %109 = tpu.reciprocal %108 {approx = true} : vector<8x1xf32> -> vector<8x1xf32>
    %110 = vector.broadcast %109 : vector<8x1xf32> to vector<8x8xf32>
    %111 = arith.mulf %106, %110 : vector<8x8xf32>
    %112 = vector.extract_strided_slice %23 {offsets = [0, 24], sizes = [8, 8], strides = [1, 1]} : vector<8x32xf32> to vector<8x8xf32>
    %cst_51 = arith.constant dense<0.000000e+00> : vector<8x8xf32>
    %113 = tpu.matmul %111, %112, %cst_51 {dimension_numbers = #tpu.dot_dimension_numbers<[1], [0], [0], [1], [0, 0, 1, 1], [], []>} : vector<8x8xf32>, vector<8x8xf32>, vector<8x8xf32> -> vector<8x8xf32>
    %114 = vector.extract_strided_slice %12 {offsets = [24, 0], sizes = [8, 32], strides = [1, 1]} : vector<32x32xf32> to vector<8x32xf32>
    %cst_52 = arith.constant dense<0.000000e+00> : vector<8x32xf32>
    %115 = tpu.matmul %113, %114, %cst_52 {dimension_numbers = #tpu.dot_dimension_numbers<[1], [0], [0], [1], [0, 0, 1, 1], [], []>} : vector<8x8xf32>, vector<8x32xf32>, vector<8x32xf32> -> vector<8x32xf32>
    %116 = arith.addf %93, %115 : vector<8x32xf32>
    %117 = vector.broadcast %13 : vector<1x32xf32> to vector<8x32xf32>
    %118 = arith.addf %116, %117 : vector<8x32xf32>
    %119 = arith.addf %118, %1 : vector<8x32xf32>
    %cst_53 = arith.constant dense<0.000000e+00> : vector<8xf32>
    %120 = vector.multi_reduction <add>, %119, %cst_53 [1] : vector<8x32xf32> to vector<8xf32>
    %121 = vector.shape_cast %120 : vector<8xf32> to vector<8x1xf32>
    %cst_54 = arith.constant 3.200000e+01 : f32
    %122 = vector.broadcast %cst_54 : f32 to vector<8x1xf32>
    %123 = arith.divf %121, %122 : vector<8x1xf32>
    %124 = vector.broadcast %123 : vector<8x1xf32> to vector<8x32xf32>
    %125 = arith.subf %119, %124 : vector<8x32xf32>
    %126 = arith.mulf %125, %125 : vector<8x32xf32>
    %cst_55 = arith.constant dense<0.000000e+00> : vector<8xf32>
    %127 = vector.multi_reduction <add>, %126, %cst_55 [1] : vector<8x32xf32> to vector<8xf32>
    %128 = vector.shape_cast %127 : vector<8xf32> to vector<8x1xf32>
    %cst_56 = arith.constant 3.200000e+01 : f32
    %129 = vector.broadcast %cst_56 : f32 to vector<8x1xf32>
    %130 = arith.divf %128, %129 : vector<8x1xf32>
    %131 = vector.broadcast %123 : vector<8x1xf32> to vector<8x32xf32>
    %132 = arith.subf %119, %131 : vector<8x32xf32>
    %cst_57 = arith.constant 9.99999996E-13 : f32
    %133 = vector.broadcast %cst_57 : f32 to vector<8x1xf32>
    %134 = arith.addf %130, %133 : vector<8x1xf32>
    %135 = math.rsqrt %134 : vector<8x1xf32>
    %136 = vector.broadcast %135 : vector<8x1xf32> to vector<8x32xf32>
    %137 = arith.mulf %132, %136 : vector<8x32xf32>
    %138 = vector.broadcast %14 : vector<1x32xf32> to vector<8x32xf32>
    %139 = arith.mulf %137, %138 : vector<8x32xf32>
    %140 = vector.broadcast %15 : vector<1x32xf32> to vector<8x32xf32>
    %141 = arith.addf %139, %140 : vector<8x32xf32>
    %c0_58 = arith.constant 0 : index
    %c0_59 = arith.constant 0 : index
    %142 = vector.load %arg13[%c0_58, %c0_59] : memref<32x32xf32, #tpu.memory_space<vmem>>, vector<32x32xf32>
    %c0_60 = arith.constant 0 : index
    %c0_61 = arith.constant 0 : index
    %143 = vector.load %arg14[%c0_60, %c0_61] : memref<1x32xf32, #tpu.memory_space<vmem>>, vector<1x32xf32>
    %c0_62 = arith.constant 0 : index
    %c0_63 = arith.constant 0 : index
    %144 = vector.load %arg15[%c0_62, %c0_63] : memref<32x64xf32, #tpu.memory_space<vmem>>, vector<32x64xf32>
    %c0_64 = arith.constant 0 : index
    %c0_65 = arith.constant 0 : index
    %145 = vector.load %arg16[%c0_64, %c0_65] : memref<1x64xf32, #tpu.memory_space<vmem>>, vector<1x64xf32>
    %c0_66 = arith.constant 0 : index
    %c0_67 = arith.constant 0 : index
    %146 = vector.load %arg17[%c0_66, %c0_67] : memref<32x32xf32, #tpu.memory_space<vmem>>, vector<32x32xf32>
    %c0_68 = arith.constant 0 : index
    %c0_69 = arith.constant 0 : index
    %147 = vector.load %arg18[%c0_68, %c0_69] : memref<1x32xf32, #tpu.memory_space<vmem>>, vector<1x32xf32>
    %c0_70 = arith.constant 0 : index
    %c0_71 = arith.constant 0 : index
    %148 = vector.load %arg19[%c0_70, %c0_71] : memref<1x32xf32, #tpu.memory_space<vmem>>, vector<1x32xf32>
    %c0_72 = arith.constant 0 : index
    %c0_73 = arith.constant 0 : index
    %149 = vector.load %arg20[%c0_72, %c0_73] : memref<1x32xf32, #tpu.memory_space<vmem>>, vector<1x32xf32>
    %cst_74 = arith.constant dense<0.000000e+00> : vector<8x32xf32>
    %150 = tpu.matmul %141, %142, %cst_74 {dimension_numbers = #tpu.dot_dimension_numbers<[1], [0], [0], [1], [0, 0, 1, 1], [], []>} : vector<8x32xf32>, vector<32x32xf32>, vector<8x32xf32> -> vector<8x32xf32>
    %151 = vector.broadcast %143 : vector<1x32xf32> to vector<8x32xf32>
    %152 = arith.addf %150, %151 : vector<8x32xf32>
    %cst_75 = arith.constant dense<0.000000e+00> : vector<8x64xf32>
    %153 = tpu.matmul %141, %144, %cst_75 {dimension_numbers = #tpu.dot_dimension_numbers<[1], [0], [0], [1], [0, 0, 1, 1], [], []>} : vector<8x32xf32>, vector<32x64xf32>, vector<8x64xf32> -> vector<8x64xf32>
    %154 = vector.broadcast %145 : vector<1x64xf32> to vector<8x64xf32>
    %155 = arith.addf %153, %154 : vector<8x64xf32>
    %156 = vector.extract_strided_slice %155 {offsets = [0, 0], sizes = [8, 32], strides = [1, 1]} : vector<8x64xf32> to vector<8x32xf32>
    %157 = vector.extract_strided_slice %155 {offsets = [0, 32], sizes = [8, 32], strides = [1, 1]} : vector<8x64xf32> to vector<8x32xf32>
    %cst_76 = arith.constant 0.000000e+00 : f32
    %158 = vector.broadcast %cst_76 : f32 to vector<8x32xf32>
    %159 = vector.extract_strided_slice %152 {offsets = [0, 0], sizes = [8, 8], strides = [1, 1]} : vector<8x32xf32> to vector<8x8xf32>
    %160 = vector.extract_strided_slice %156 {offsets = [0, 0], sizes = [8, 8], strides = [1, 1]} : vector<8x32xf32> to vector<8x8xf32>
    %161 = tpu.transpose %160, [1, 0] : vector<8x8xf32> -> vector<8x8xf32>
    %cst_77 = arith.constant dense<0.000000e+00> : vector<8x8xf32>
    %162 = tpu.matmul %159, %161, %cst_77 {dimension_numbers = #tpu.dot_dimension_numbers<[1], [0], [0], [1], [0, 0, 1, 1], [], []>} : vector<8x8xf32>, vector<8x8xf32>, vector<8x8xf32> -> vector<8x8xf32>
    %cst_78 = arith.constant 0.353553385 : f32
    %163 = vector.broadcast %cst_78 : f32 to vector<8x8xf32>
    %164 = arith.mulf %162, %163 : vector<8x8xf32>
    %165 = vector.broadcast %7 : vector<1x8xf32> to vector<8x8xf32>
    %166 = arith.addf %164, %165 : vector<8x8xf32>
    %cst_79 = arith.constant dense<0xFF800000> : vector<8xf32>
    %167 = vector.multi_reduction <maximumf>, %166, %cst_79 [1] : vector<8x8xf32> to vector<8xf32>
    %168 = vector.shape_cast %167 : vector<8xf32> to vector<8x1xf32>
    %169 = vector.broadcast %168 : vector<8x1xf32> to vector<8x8xf32>
    %170 = arith.subf %166, %169 : vector<8x8xf32>
    %171 = math.exp %170 : vector<8x8xf32>
    %cst_80 = arith.constant dense<0.000000e+00> : vector<8xf32>
    %172 = vector.multi_reduction <add>, %171, %cst_80 [1] : vector<8x8xf32> to vector<8xf32>
    %173 = vector.shape_cast %172 : vector<8xf32> to vector<8x1xf32>
    %174 = tpu.reciprocal %173 {approx = true} : vector<8x1xf32> -> vector<8x1xf32>
    %175 = vector.broadcast %174 : vector<8x1xf32> to vector<8x8xf32>
    %176 = arith.mulf %171, %175 : vector<8x8xf32>
    %177 = vector.extract_strided_slice %157 {offsets = [0, 0], sizes = [8, 8], strides = [1, 1]} : vector<8x32xf32> to vector<8x8xf32>
    %cst_81 = arith.constant dense<0.000000e+00> : vector<8x8xf32>
    %178 = tpu.matmul %176, %177, %cst_81 {dimension_numbers = #tpu.dot_dimension_numbers<[1], [0], [0], [1], [0, 0, 1, 1], [], []>} : vector<8x8xf32>, vector<8x8xf32>, vector<8x8xf32> -> vector<8x8xf32>
    %179 = vector.extract_strided_slice %146 {offsets = [0, 0], sizes = [8, 32], strides = [1, 1]} : vector<32x32xf32> to vector<8x32xf32>
    %cst_82 = arith.constant dense<0.000000e+00> : vector<8x32xf32>
    %180 = tpu.matmul %178, %179, %cst_82 {dimension_numbers = #tpu.dot_dimension_numbers<[1], [0], [0], [1], [0, 0, 1, 1], [], []>} : vector<8x8xf32>, vector<8x32xf32>, vector<8x32xf32> -> vector<8x32xf32>
    %181 = arith.addf %158, %180 : vector<8x32xf32>
    %182 = vector.extract_strided_slice %152 {offsets = [0, 8], sizes = [8, 8], strides = [1, 1]} : vector<8x32xf32> to vector<8x8xf32>
    %183 = vector.extract_strided_slice %156 {offsets = [0, 8], sizes = [8, 8], strides = [1, 1]} : vector<8x32xf32> to vector<8x8xf32>
    %184 = tpu.transpose %183, [1, 0] : vector<8x8xf32> -> vector<8x8xf32>
    %cst_83 = arith.constant dense<0.000000e+00> : vector<8x8xf32>
    %185 = tpu.matmul %182, %184, %cst_83 {dimension_numbers = #tpu.dot_dimension_numbers<[1], [0], [0], [1], [0, 0, 1, 1], [], []>} : vector<8x8xf32>, vector<8x8xf32>, vector<8x8xf32> -> vector<8x8xf32>
    %cst_84 = arith.constant 0.353553385 : f32
    %186 = vector.broadcast %cst_84 : f32 to vector<8x8xf32>
    %187 = arith.mulf %185, %186 : vector<8x8xf32>
    %188 = vector.broadcast %7 : vector<1x8xf32> to vector<8x8xf32>
    %189 = arith.addf %187, %188 : vector<8x8xf32>
    %cst_85 = arith.constant dense<0xFF800000> : vector<8xf32>
    %190 = vector.multi_reduction <maximumf>, %189, %cst_85 [1] : vector<8x8xf32> to vector<8xf32>
    %191 = vector.shape_cast %190 : vector<8xf32> to vector<8x1xf32>
    %192 = vector.broadcast %191 : vector<8x1xf32> to vector<8x8xf32>
    %193 = arith.subf %189, %192 : vector<8x8xf32>
    %194 = math.exp %193 : vector<8x8xf32>
    %cst_86 = arith.constant dense<0.000000e+00> : vector<8xf32>
    %195 = vector.multi_reduction <add>, %194, %cst_86 [1] : vector<8x8xf32> to vector<8xf32>
    %196 = vector.shape_cast %195 : vector<8xf32> to vector<8x1xf32>
    %197 = tpu.reciprocal %196 {approx = true} : vector<8x1xf32> -> vector<8x1xf32>
    %198 = vector.broadcast %197 : vector<8x1xf32> to vector<8x8xf32>
    %199 = arith.mulf %194, %198 : vector<8x8xf32>
    %200 = vector.extract_strided_slice %157 {offsets = [0, 8], sizes = [8, 8], strides = [1, 1]} : vector<8x32xf32> to vector<8x8xf32>
    %cst_87 = arith.constant dense<0.000000e+00> : vector<8x8xf32>
    %201 = tpu.matmul %199, %200, %cst_87 {dimension_numbers = #tpu.dot_dimension_numbers<[1], [0], [0], [1], [0, 0, 1, 1], [], []>} : vector<8x8xf32>, vector<8x8xf32>, vector<8x8xf32> -> vector<8x8xf32>
    %202 = vector.extract_strided_slice %146 {offsets = [8, 0], sizes = [8, 32], strides = [1, 1]} : vector<32x32xf32> to vector<8x32xf32>
    %cst_88 = arith.constant dense<0.000000e+00> : vector<8x32xf32>
    %203 = tpu.matmul %201, %202, %cst_88 {dimension_numbers = #tpu.dot_dimension_numbers<[1], [0], [0], [1], [0, 0, 1, 1], [], []>} : vector<8x8xf32>, vector<8x32xf32>, vector<8x32xf32> -> vector<8x32xf32>
    %204 = arith.addf %181, %203 : vector<8x32xf32>
    %205 = vector.extract_strided_slice %152 {offsets = [0, 16], sizes = [8, 8], strides = [1, 1]} : vector<8x32xf32> to vector<8x8xf32>
    %206 = vector.extract_strided_slice %156 {offsets = [0, 16], sizes = [8, 8], strides = [1, 1]} : vector<8x32xf32> to vector<8x8xf32>
    %207 = tpu.transpose %206, [1, 0] : vector<8x8xf32> -> vector<8x8xf32>
    %cst_89 = arith.constant dense<0.000000e+00> : vector<8x8xf32>
    %208 = tpu.matmul %205, %207, %cst_89 {dimension_numbers = #tpu.dot_dimension_numbers<[1], [0], [0], [1], [0, 0, 1, 1], [], []>} : vector<8x8xf32>, vector<8x8xf32>, vector<8x8xf32> -> vector<8x8xf32>
    %cst_90 = arith.constant 0.353553385 : f32
    %209 = vector.broadcast %cst_90 : f32 to vector<8x8xf32>
    %210 = arith.mulf %208, %209 : vector<8x8xf32>
    %211 = vector.broadcast %7 : vector<1x8xf32> to vector<8x8xf32>
    %212 = arith.addf %210, %211 : vector<8x8xf32>
    %cst_91 = arith.constant dense<0xFF800000> : vector<8xf32>
    %213 = vector.multi_reduction <maximumf>, %212, %cst_91 [1] : vector<8x8xf32> to vector<8xf32>
    %214 = vector.shape_cast %213 : vector<8xf32> to vector<8x1xf32>
    %215 = vector.broadcast %214 : vector<8x1xf32> to vector<8x8xf32>
    %216 = arith.subf %212, %215 : vector<8x8xf32>
    %217 = math.exp %216 : vector<8x8xf32>
    %cst_92 = arith.constant dense<0.000000e+00> : vector<8xf32>
    %218 = vector.multi_reduction <add>, %217, %cst_92 [1] : vector<8x8xf32> to vector<8xf32>
    %219 = vector.shape_cast %218 : vector<8xf32> to vector<8x1xf32>
    %220 = tpu.reciprocal %219 {approx = true} : vector<8x1xf32> -> vector<8x1xf32>
    %221 = vector.broadcast %220 : vector<8x1xf32> to vector<8x8xf32>
    %222 = arith.mulf %217, %221 : vector<8x8xf32>
    %223 = vector.extract_strided_slice %157 {offsets = [0, 16], sizes = [8, 8], strides = [1, 1]} : vector<8x32xf32> to vector<8x8xf32>
    %cst_93 = arith.constant dense<0.000000e+00> : vector<8x8xf32>
    %224 = tpu.matmul %222, %223, %cst_93 {dimension_numbers = #tpu.dot_dimension_numbers<[1], [0], [0], [1], [0, 0, 1, 1], [], []>} : vector<8x8xf32>, vector<8x8xf32>, vector<8x8xf32> -> vector<8x8xf32>
    %225 = vector.extract_strided_slice %146 {offsets = [16, 0], sizes = [8, 32], strides = [1, 1]} : vector<32x32xf32> to vector<8x32xf32>
    %cst_94 = arith.constant dense<0.000000e+00> : vector<8x32xf32>
    %226 = tpu.matmul %224, %225, %cst_94 {dimension_numbers = #tpu.dot_dimension_numbers<[1], [0], [0], [1], [0, 0, 1, 1], [], []>} : vector<8x8xf32>, vector<8x32xf32>, vector<8x32xf32> -> vector<8x32xf32>
    %227 = arith.addf %204, %226 : vector<8x32xf32>
    %228 = vector.extract_strided_slice %152 {offsets = [0, 24], sizes = [8, 8], strides = [1, 1]} : vector<8x32xf32> to vector<8x8xf32>
    %229 = vector.extract_strided_slice %156 {offsets = [0, 24], sizes = [8, 8], strides = [1, 1]} : vector<8x32xf32> to vector<8x8xf32>
    %230 = tpu.transpose %229, [1, 0] : vector<8x8xf32> -> vector<8x8xf32>
    %cst_95 = arith.constant dense<0.000000e+00> : vector<8x8xf32>
    %231 = tpu.matmul %228, %230, %cst_95 {dimension_numbers = #tpu.dot_dimension_numbers<[1], [0], [0], [1], [0, 0, 1, 1], [], []>} : vector<8x8xf32>, vector<8x8xf32>, vector<8x8xf32> -> vector<8x8xf32>
    %cst_96 = arith.constant 0.353553385 : f32
    %232 = vector.broadcast %cst_96 : f32 to vector<8x8xf32>
    %233 = arith.mulf %231, %232 : vector<8x8xf32>
    %234 = vector.broadcast %7 : vector<1x8xf32> to vector<8x8xf32>
    %235 = arith.addf %233, %234 : vector<8x8xf32>
    %cst_97 = arith.constant dense<0xFF800000> : vector<8xf32>
    %236 = vector.multi_reduction <maximumf>, %235, %cst_97 [1] : vector<8x8xf32> to vector<8xf32>
    %237 = vector.shape_cast %236 : vector<8xf32> to vector<8x1xf32>
    %238 = vector.broadcast %237 : vector<8x1xf32> to vector<8x8xf32>
    %239 = arith.subf %235, %238 : vector<8x8xf32>
    %240 = math.exp %239 : vector<8x8xf32>
    %cst_98 = arith.constant dense<0.000000e+00> : vector<8xf32>
    %241 = vector.multi_reduction <add>, %240, %cst_98 [1] : vector<8x8xf32> to vector<8xf32>
    %242 = vector.shape_cast %241 : vector<8xf32> to vector<8x1xf32>
    %243 = tpu.reciprocal %242 {approx = true} : vector<8x1xf32> -> vector<8x1xf32>
    %244 = vector.broadcast %243 : vector<8x1xf32> to vector<8x8xf32>
    %245 = arith.mulf %240, %244 : vector<8x8xf32>
    %246 = vector.extract_strided_slice %157 {offsets = [0, 24], sizes = [8, 8], strides = [1, 1]} : vector<8x32xf32> to vector<8x8xf32>
    %cst_99 = arith.constant dense<0.000000e+00> : vector<8x8xf32>
    %247 = tpu.matmul %245, %246, %cst_99 {dimension_numbers = #tpu.dot_dimension_numbers<[1], [0], [0], [1], [0, 0, 1, 1], [], []>} : vector<8x8xf32>, vector<8x8xf32>, vector<8x8xf32> -> vector<8x8xf32>
    %248 = vector.extract_strided_slice %146 {offsets = [24, 0], sizes = [8, 32], strides = [1, 1]} : vector<32x32xf32> to vector<8x32xf32>
    %cst_100 = arith.constant dense<0.000000e+00> : vector<8x32xf32>
    %249 = tpu.matmul %247, %248, %cst_100 {dimension_numbers = #tpu.dot_dimension_numbers<[1], [0], [0], [1], [0, 0, 1, 1], [], []>} : vector<8x8xf32>, vector<8x32xf32>, vector<8x32xf32> -> vector<8x32xf32>
    %250 = arith.addf %227, %249 : vector<8x32xf32>
    %251 = vector.broadcast %147 : vector<1x32xf32> to vector<8x32xf32>
    %252 = arith.addf %250, %251 : vector<8x32xf32>
    %253 = arith.addf %252, %141 : vector<8x32xf32>
    %cst_101 = arith.constant dense<0.000000e+00> : vector<8xf32>
    %254 = vector.multi_reduction <add>, %253, %cst_101 [1] : vector<8x32xf32> to vector<8xf32>
    %255 = vector.shape_cast %254 : vector<8xf32> to vector<8x1xf32>
    %cst_102 = arith.constant 3.200000e+01 : f32
    %256 = vector.broadcast %cst_102 : f32 to vector<8x1xf32>
    %257 = arith.divf %255, %256 : vector<8x1xf32>
    %258 = vector.broadcast %257 : vector<8x1xf32> to vector<8x32xf32>
    %259 = arith.subf %253, %258 : vector<8x32xf32>
    %260 = arith.mulf %259, %259 : vector<8x32xf32>
    %cst_103 = arith.constant dense<0.000000e+00> : vector<8xf32>
    %261 = vector.multi_reduction <add>, %260, %cst_103 [1] : vector<8x32xf32> to vector<8xf32>
    %262 = vector.shape_cast %261 : vector<8xf32> to vector<8x1xf32>
    %cst_104 = arith.constant 3.200000e+01 : f32
    %263 = vector.broadcast %cst_104 : f32 to vector<8x1xf32>
    %264 = arith.divf %262, %263 : vector<8x1xf32>
    %265 = vector.broadcast %257 : vector<8x1xf32> to vector<8x32xf32>
    %266 = arith.subf %253, %265 : vector<8x32xf32>
    %cst_105 = arith.constant 9.99999996E-13 : f32
    %267 = vector.broadcast %cst_105 : f32 to vector<8x1xf32>
    %268 = arith.addf %264, %267 : vector<8x1xf32>
    %269 = math.rsqrt %268 : vector<8x1xf32>
    %270 = vector.broadcast %269 : vector<8x1xf32> to vector<8x32xf32>
    %271 = arith.mulf %266, %270 : vector<8x32xf32>
    %272 = vector.broadcast %148 : vector<1x32xf32> to vector<8x32xf32>
    %273 = arith.mulf %271, %272 : vector<8x32xf32>
    %274 = vector.broadcast %149 : vector<1x32xf32> to vector<8x32xf32>
    %275 = arith.addf %273, %274 : vector<8x32xf32>
    %c0_106 = arith.constant 0 : index
    %c0_107 = arith.constant 0 : index
    %276 = vector.load %arg21[%c0_106, %c0_107] : memref<32x128xf32, #tpu.memory_space<vmem>>, vector<32x128xf32>
    %c0_108 = arith.constant 0 : index
    %c0_109 = arith.constant 0 : index
    %277 = vector.load %arg22[%c0_108, %c0_109] : memref<1x128xf32, #tpu.memory_space<vmem>>, vector<1x128xf32>
    %c0_110 = arith.constant 0 : index
    %c0_111 = arith.constant 0 : index
    %278 = vector.load %arg23[%c0_110, %c0_111] : memref<128x32xf32, #tpu.memory_space<vmem>>, vector<128x32xf32>
    %c0_112 = arith.constant 0 : index
    %c0_113 = arith.constant 0 : index
    %279 = vector.load %arg24[%c0_112, %c0_113] : memref<1x32xf32, #tpu.memory_space<vmem>>, vector<1x32xf32>
    %c0_114 = arith.constant 0 : index
    %c0_115 = arith.constant 0 : index
    %280 = vector.load %arg25[%c0_114, %c0_115] : memref<1x32xf32, #tpu.memory_space<vmem>>, vector<1x32xf32>
    %c0_116 = arith.constant 0 : index
    %c0_117 = arith.constant 0 : index
    %281 = vector.load %arg26[%c0_116, %c0_117] : memref<1x32xf32, #tpu.memory_space<vmem>>, vector<1x32xf32>
    %cst_118 = arith.constant dense<0.000000e+00> : vector<8x128xf32>
    %282 = tpu.matmul %275, %276, %cst_118 {dimension_numbers = #tpu.dot_dimension_numbers<[1], [0], [0], [1], [0, 0, 1, 1], [], []>} : vector<8x32xf32>, vector<32x128xf32>, vector<8x128xf32> -> vector<8x128xf32>
    %283 = vector.broadcast %277 : vector<1x128xf32> to vector<8x128xf32>
    %284 = arith.addf %282, %283 : vector<8x128xf32>
    %cst_119 = arith.constant 5.000000e-01 : f32
    %285 = vector.broadcast %cst_119 : f32 to vector<8x128xf32>
    %286 = arith.mulf %285, %284 : vector<8x128xf32>
    %cst_120 = arith.constant 4.471500e-02 : f32
    %287 = vector.broadcast %cst_120 : f32 to vector<8x128xf32>
    %288 = arith.mulf %287, %284 : vector<8x128xf32>
    %289 = arith.mulf %288, %284 : vector<8x128xf32>
    %290 = arith.mulf %289, %284 : vector<8x128xf32>
    %291 = arith.addf %284, %290 : vector<8x128xf32>
    %cst_121 = arith.constant 0.797884583 : f32
    %292 = vector.broadcast %cst_121 : f32 to vector<8x128xf32>
    %293 = arith.mulf %292, %291 : vector<8x128xf32>
    %294 = math.tanh %293 : vector<8x128xf32>
    %cst_122 = arith.constant 1.000000e+00 : f32
    %295 = vector.broadcast %cst_122 : f32 to vector<8x128xf32>
    %296 = arith.addf %295, %294 : vector<8x128xf32>
    %297 = arith.mulf %286, %296 : vector<8x128xf32>
    %cst_123 = arith.constant dense<0.000000e+00> : vector<8x32xf32>
    %298 = tpu.matmul %297, %278, %cst_123 {dimension_numbers = #tpu.dot_dimension_numbers<[1], [0], [0], [1], [0, 0, 1, 1], [], []>} : vector<8x128xf32>, vector<128x32xf32>, vector<8x32xf32> -> vector<8x32xf32>
    %299 = vector.broadcast %279 : vector<1x32xf32> to vector<8x32xf32>
    %300 = arith.addf %298, %299 : vector<8x32xf32>
    %301 = arith.addf %300, %275 : vector<8x32xf32>
    %cst_124 = arith.constant dense<0.000000e+00> : vector<8xf32>
    %302 = vector.multi_reduction <add>, %301, %cst_124 [1] : vector<8x32xf32> to vector<8xf32>
    %303 = vector.shape_cast %302 : vector<8xf32> to vector<8x1xf32>
    %cst_125 = arith.constant 3.200000e+01 : f32
    %304 = vector.broadcast %cst_125 : f32 to vector<8x1xf32>
    %305 = arith.divf %303, %304 : vector<8x1xf32>
    %306 = vector.broadcast %305 : vector<8x1xf32> to vector<8x32xf32>
    %307 = arith.subf %301, %306 : vector<8x32xf32>
    %308 = arith.mulf %307, %307 : vector<8x32xf32>
    %cst_126 = arith.constant dense<0.000000e+00> : vector<8xf32>
    %309 = vector.multi_reduction <add>, %308, %cst_126 [1] : vector<8x32xf32> to vector<8xf32>
    %310 = vector.shape_cast %309 : vector<8xf32> to vector<8x1xf32>
    %cst_127 = arith.constant 3.200000e+01 : f32
    %311 = vector.broadcast %cst_127 : f32 to vector<8x1xf32>
    %312 = arith.divf %310, %311 : vector<8x1xf32>
    %313 = vector.broadcast %305 : vector<8x1xf32> to vector<8x32xf32>
    %314 = arith.subf %301, %313 : vector<8x32xf32>
    %cst_128 = arith.constant 9.99999996E-13 : f32
    %315 = vector.broadcast %cst_128 : f32 to vector<8x1xf32>
    %316 = arith.addf %312, %315 : vector<8x1xf32>
    %317 = math.rsqrt %316 : vector<8x1xf32>
    %318 = vector.broadcast %317 : vector<8x1xf32> to vector<8x32xf32>
    %319 = arith.mulf %314, %318 : vector<8x32xf32>
    %320 = vector.broadcast %280 : vector<1x32xf32> to vector<8x32xf32>
    %321 = arith.mulf %319, %320 : vector<8x32xf32>
    %322 = vector.broadcast %281 : vector<1x32xf32> to vector<8x32xf32>
    %323 = arith.addf %321, %322 : vector<8x32xf32>
    %c0_129 = arith.constant 0 : index
    %c0_130 = arith.constant 0 : index
    %c0_131 = arith.constant 0 : index
    %324 = vector.load %arg27[%c0_129, %c0_130, %c0_131] : memref<1x8x32xf32, #tpu.memory_space<vmem>>, vector<1x8x32xf32>
    %325 = vector.shape_cast %324 : vector<1x8x32xf32> to vector<8x32xf32>
    %326 = vector.shape_cast %323 : vector<8x32xf32> to vector<1x8x32xf32>
    tpu.vector_store %arg27[%c0_129, %c0_130, %c0_131], %326 {strides = array<i32>} : memref<1x8x32xf32, #tpu.memory_space<vmem>>, vector<1x8x32xf32>,
    return
  }
  func.func @transform_0(%arg0: i32) -> (i32, i32, i32) {
    %c0_i32 = arith.constant 0 : i32
    %c0_i32_0 = arith.constant 0 : i32
    %c0_i32_1 = arith.constant 0 : i32
    return %arg0, %c0_i32, %c0_i32_0 : i32, i32, i32
  }
  func.func @transform_1(%arg0: i32) -> (i32, i32, i32) {
    %c0_i32 = arith.constant 0 : i32
    %c0_i32_0 = arith.constant 0 : i32
    %c0_i32_1 = arith.constant 0 : i32
    return %arg0, %c0_i32, %c0_i32_0 : i32, i32, i32
  }
  func.func @transform_2(%arg0: i32) -> (i32, i32, i32) {
    %c0_i32 = arith.constant 0 : i32
    %c0_i32_0 = arith.constant 0 : i32
    %c0_i32_1 = arith.constant 0 : i32
    return %arg0, %c0_i32, %c0_i32_0 : i32, i32, i32
  }
  func.func @transform_3(%arg0: i32) -> (i32, i32, i32) {
    %c0_i32 = arith.constant 0 : i32
    %c0_i32_0 = arith.constant 0 : i32
    %c0_i32_1 = arith.constant 0 : i32
    return %arg0, %c0_i32, %c0_i32_0 : i32, i32, i32
  }
  func.func @transform_4(%arg0: i32) -> (i32, i32) {
    %c0_i32 = arith.constant 0 : i32
    %c0_i32_0 = arith.constant 0 : i32
    %c0_i32_1 = arith.constant 0 : i32
    return %c0_i32, %c0_i32_0 : i32, i32
  }
  func.func @transform_5(%arg0: i32) -> (i32, i32) {
    %c0_i32 = arith.constant 0 : i32
    %c0_i32_0 = arith.constant 0 : i32
    %c0_i32_1 = arith.constant 0 : i32
    return %c0_i32, %c0_i32_0 : i32, i32
  }
  func.func @transform_6(%arg0: i32) -> (i32, i32) {
    %c0_i32 = arith.constant 0 : i32
    %c0_i32_0 = arith.constant 0 : i32
    %c0_i32_1 = arith.constant 0 : i32
    return %c0_i32, %c0_i32_0 : i32, i32
  }
  func.func @transform_7(%arg0: i32) -> (i32, i32) {
    %c0_i32 = arith.constant 0 : i32
    %c0_i32_0 = arith.constant 0 : i32
    %c0_i32_1 = arith.constant 0 : i32
    return %c0_i32, %c0_i32_0 : i32, i32
  }
  func.func @transform_8(%arg0: i32) -> (i32, i32) {
    %c0_i32 = arith.constant 0 : i32
    %c0_i32_0 = arith.constant 0 : i32
    %c0_i32_1 = arith.constant 0 : i32
    return %c0_i32, %c0_i32_0 : i32, i32
  }
  func.func @transform_9(%arg0: i32) -> (i32, i32) {
    %c0_i32 = arith.constant 0 : i32
    %c0_i32_0 = arith.constant 0 : i32
    %c0_i32_1 = arith.constant 0 : i32
    return %c0_i32, %c0_i32_0 : i32, i32
  }
  func.func @transform_10(%arg0: i32) -> (i32, i32) {
    %c0_i32 = arith.constant 0 : i32
    %c0_i32_0 = arith.constant 0 : i32
    %c0_i32_1 = arith.constant 0 : i32
    return %c0_i32, %c0_i32_0 : i32, i32
  }
  func.func @transform_11(%arg0: i32) -> (i32, i32) {
    %c0_i32 = arith.constant 0 : i32
    %c0_i32_0 = arith.constant 0 : i32
    %c0_i32_1 = arith.constant 0 : i32
    return %c0_i32, %c0_i32_0 : i32, i32
  }
  func.func @transform_12(%arg0: i32) -> (i32, i32) {
    %c0_i32 = arith.constant 0 : i32
    %c0_i32_0 = arith.constant 0 : i32
    %c0_i32_1 = arith.constant 0 : i32
    return %c0_i32, %c0_i32_0 : i32, i32
  }
  func.func @transform_13(%arg0: i32) -> (i32, i32) {
    %c0_i32 = arith.constant 0 : i32
    %c0_i32_0 = arith.constant 0 : i32
    %c0_i32_1 = arith.constant 0 : i32
    return %c0_i32, %c0_i32_0 : i32, i32
  }
  func.func @transform_14(%arg0: i32) -> (i32, i32) {
    %c0_i32 = arith.constant 0 : i32
    %c0_i32_0 = arith.constant 0 : i32
    %c0_i32_1 = arith.constant 0 : i32
    return %c0_i32, %c0_i32_0 : i32, i32
  }
  func.func @transform_15(%arg0: i32) -> (i32, i32) {
    %c0_i32 = arith.constant 0 : i32
    %c0_i32_0 = arith.constant 0 : i32
    %c0_i32_1 = arith.constant 0 : i32
    return %c0_i32, %c0_i32_0 : i32, i32
  }
  func.func @transform_16(%arg0: i32) -> (i32, i32) {
    %c0_i32 = arith.constant 0 : i32
    %c0_i32_0 = arith.constant 0 : i32
    %c0_i32_1 = arith.constant 0 : i32
    return %c0_i32, %c0_i32_0 : i32, i32
  }
  func.func @transform_17(%arg0: i32) -> (i32, i32) {
    %c0_i32 = arith.constant 0 : i32
    %c0_i32_0 = arith.constant 0 : i32
    %c0_i32_1 = arith.constant 0 : i32
    return %c0_i32, %c0_i32_0 : i32, i32
  }
  func.func @transform_18(%arg0: i32) -> (i32, i32) {
    %c0_i32 = arith.constant 0 : i32
    %c0_i32_0 = arith.constant 0 : i32
    %c0_i32_1 = arith.constant 0 : i32
    return %c0_i32, %c0_i32_0 : i32, i32
  }
  func.func @transform_19(%arg0: i32) -> (i32, i32) {
    %c0_i32 = arith.constant 0 : i32
    %c0_i32_0 = arith.constant 0 : i32
    %c0_i32_1 = arith.constant 0 : i32
    return %c0_i32, %c0_i32_0 : i32, i32
  }
  func.func @transform_20(%arg0: i32) -> (i32, i32) {
    %c0_i32 = arith.constant 0 : i32
    %c0_i32_0 = arith.constant 0 : i32
    %c0_i32_1 = arith.constant 0 : i32
    return %c0_i32, %c0_i32_0 : i32, i32
  }
  func.func @transform_21(%arg0: i32) -> (i32, i32) {
    %c0_i32 = arith.constant 0 : i32
    %c0_i32_0 = arith.constant 0 : i32
    %c0_i32_1 = arith.constant 0 : i32
    return %c0_i32, %c0_i32_0 : i32, i32
  }
  func.func @transform_22(%arg0: i32) -> (i32, i32) {
    %c0_i32 = arith.constant 0 : i32
    %c0_i32_0 = arith.constant 0 : i32
    %c0_i32_1 = arith.constant 0 : i32
    return %c0_i32, %c0_i32_0 : i32, i32
  }
  func.func @transform_23(%arg0: i32) -> (i32, i32) {
    %c0_i32 = arith.constant 0 : i32
    %c0_i32_0 = arith.constant 0 : i32
    %c0_i32_1 = arith.constant 0 : i32
    return %c0_i32, %c0_i32_0 : i32, i32
  }
  func.func @transform_24(%arg0: i32) -> (i32, i32) {
    %c0_i32 = arith.constant 0 : i32
    %c0_i32_0 = arith.constant 0 : i32
    %c0_i32_1 = arith.constant 0 : i32
    return %c0_i32, %c0_i32_0 : i32, i32
  }
  func.func @transform_25(%arg0: i32) -> (i32, i32) {
    %c0_i32 = arith.constant 0 : i32
    %c0_i32_0 = arith.constant 0 : i32
    %c0_i32_1 = arith.constant 0 : i32
    return %c0_i32, %c0_i32_0 : i32, i32
  }
  func.func @transform_26(%arg0: i32) -> (i32, i32, i32) {
    %c0_i32 = arith.constant 0 : i32
    %c0_i32_0 = arith.constant 0 : i32
    %c0_i32_1 = arith.constant 0 : i32
    return %arg0, %c0_i32, %c0_i32_0 : i32, i32, i32
  }
}

module attributes {stable_mosaic.version = 11 : i64} {
  func.func @_cross_layer_kernel(%arg0: i32, %arg1: memref<1x8x32xf32, #tpu.memory_space<vmem>>, %arg2: memref<1x8x32xf32, #tpu.memory_space<vmem>>, %arg3: memref<1x1x8xf32, #tpu.memory_space<vmem>>, %arg4: memref<1x1x8xf32, #tpu.memory_space<vmem>>, %arg5: memref<32x32xf32, #tpu.memory_space<vmem>>, %arg6: memref<1x32xf32, #tpu.memory_space<vmem>>, %arg7: memref<32x64xf32, #tpu.memory_space<vmem>>, %arg8: memref<1x64xf32, #tpu.memory_space<vmem>>, %arg9: memref<32x32xf32, #tpu.memory_space<vmem>>, %arg10: memref<1x32xf32, #tpu.memory_space<vmem>>, %arg11: memref<1x32xf32, #tpu.memory_space<vmem>>, %arg12: memref<1x32xf32, #tpu.memory_space<vmem>>, %arg13: memref<32x32xf32, #tpu.memory_space<vmem>>, %arg14: memref<1x32xf32, #tpu.memory_space<vmem>>, %arg15: memref<32x64xf32, #tpu.memory_space<vmem>>, %arg16: memref<1x64xf32, #tpu.memory_space<vmem>>, %arg17: memref<32x32xf32, #tpu.memory_space<vmem>>, %arg18: memref<1x32xf32, #tpu.memory_space<vmem>>, %arg19: memref<1x32xf32, #tpu.memory_space<vmem>>, %arg20: memref<1x32xf32, #tpu.memory_space<vmem>>, %arg21: memref<32x128xf32, #tpu.memory_space<vmem>>, %arg22: memref<1x128xf32, #tpu.memory_space<vmem>>, %arg23: memref<128x32xf32, #tpu.memory_space<vmem>>, %arg24: memref<1x32xf32, #tpu.memory_space<vmem>>, %arg25: memref<1x32xf32, #tpu.memory_space<vmem>>, %arg26: memref<1x32xf32, #tpu.memory_space<vmem>>, %arg27: memref<1x8x32xf32, #tpu.memory_space<vmem>>) attributes {dimension_semantics = [#tpu.dimension_semantics<parallel>], iteration_bounds = array<i64: 2>, scalar_prefetch = 0 : i64, scratch_operands = 0 : i64, tpu.core_type = #tpu.core_type<tc>, window_params = [{transform_indices = @transform_0, window_bounds = array<i64: 1, 8, 32>}, {transform_indices = @transform_1, window_bounds = array<i64: 1, 8, 32>}, {transform_indices = @transform_2, window_bounds = array<i64: 1, 1, 8>}, {transform_indices = @transform_3, window_bounds = array<i64: 1, 1, 8>}, {pipeline_mode = #tpu.pipeline_mode<synchronous>, transform_indices = @transform_4, window_bounds = array<i64: 32, 32>}, {pipeline_mode = #tpu.pipeline_mode<synchronous>, transform_indices = @transform_5, window_bounds = array<i64: 1, 32>}, {pipeline_mode = #tpu.pipeline_mode<synchronous>, transform_indices = @transform_6, window_bounds = array<i64: 32, 64>}, {pipeline_mode = #tpu.pipeline_mode<synchronous>, transform_indices = @transform_7, window_bounds = array<i64: 1, 64>}, {pipeline_mode = #tpu.pipeline_mode<synchronous>, transform_indices = @transform_8, window_bounds = array<i64: 32, 32>}, {pipeline_mode = #tpu.pipeline_mode<synchronous>, transform_indices = @transform_9, window_bounds = array<i64: 1, 32>}, {pipeline_mode = #tpu.pipeline_mode<synchronous>, transform_indices = @transform_10, window_bounds = array<i64: 1, 32>}, {pipeline_mode = #tpu.pipeline_mode<synchronous>, transform_indices = @transform_11, window_bounds = array<i64: 1, 32>}, {pipeline_mode = #tpu.pipeline_mode<synchronous>, transform_indices = @transform_12, window_bounds = array<i64: 32, 32>}, {pipeline_mode = #tpu.pipeline_mode<synchronous>, transform_indices = @transform_13, window_bounds = array<i64: 1, 32>}, {pipeline_mode = #tpu.pipeline_mode<synchronous>, transform_indices = @transform_14, window_bounds = array<i64: 32, 64>}, {pipeline_mode = #tpu.pipeline_mode<synchronous>, transform_indices = @transform_15, window_bounds = array<i64: 1, 64>}, {pipeline_mode = #tpu.pipeline_mode<synchronous>, transform_indices = @transform_16, window_bounds = array<i64: 32, 32>}, {pipeline_mode = #tpu.pipeline_mode<synchronous>, transform_indices = @transform_17, window_bounds = array<i64: 1, 32>}, {pipeline_mode = #tpu.pipeline_mode<synchronous>, transform_indices = @transform_18, window_bounds = array<i64: 1, 32>}, {pipeline_mode = #tpu.pipeline_mode<synchronous>, transform_indices = @transform_19, window_bounds = array<i64: 1, 32>}, {pipeline_mode = #tpu.pipeline_mode<synchronous>, transform_indices = @transform_20, window_bounds = array<i64: 32, 128>}, {pipeline_mode = #tpu.pipeline_mode<synchronous>, transform_indices = @transform_21, window_bounds = array<i64: 1, 128>}, {pipeline_mode = #tpu.pipeline_mode<synchronous>, transform_indices = @transform_22, window_bounds = array<i64: 128, 32>}, {pipeline_mode = #tpu.pipeline_mode<synchronous>, transform_indices = @transform_23, window_bounds = array<i64: 1, 32>}, {pipeline_mode = #tpu.pipeline_mode<synchronous>, transform_indices = @transform_24, window_bounds = array<i64: 1, 32>}, {pipeline_mode = #tpu.pipeline_mode<synchronous>, transform_indices = @transform_25, window_bounds = array<i64: 1, 32>}, {transform_indices = @transform_26, window_bounds = array<i64: 1, 8, 32>}]} {
    %c0 = arith.constant 0 : index
    %c0_0 = arith.constant 0 : index
    %c0_1 = arith.constant 0 : index
    %0 = vector.load %arg1[%c0, %c0_0, %c0_1] : memref<1x8x32xf32, #tpu.memory_space<vmem>>, vector<1x8x32xf32>
    %1 = vector.shape_cast %0 : vector<1x8x32xf32> to vector<8x32xf32>
    %c0_2 = arith.constant 0 : index
    %c0_3 = arith.constant 0 : index
    %c0_4 = arith.constant 0 : index
    %2 = vector.load %arg2[%c0_2, %c0_3, %c0_4] : memref<1x8x32xf32, #tpu.memory_space<vmem>>, vector<1x8x32xf32>
    %3 = vector.shape_cast %2 : vector<1x8x32xf32> to vector<8x32xf32>
    %c0_5 = arith.constant 0 : index
    %c0_6 = arith.constant 0 : index
    %c0_7 = arith.constant 0 : index
    %4 = vector.load %arg3[%c0_5, %c0_6, %c0_7] : memref<1x1x8xf32, #tpu.memory_space<vmem>>, vector<1x1x8xf32>
    %5 = vector.shape_cast %4 : vector<1x1x8xf32> to vector<1x8xf32>
    %c0_8 = arith.constant 0 : index
    %c0_9 = arith.constant 0 : index
    %c0_10 = arith.constant 0 : index
    %6 = vector.load %arg4[%c0_8, %c0_9, %c0_10] : memref<1x1x8xf32, #tpu.memory_space<vmem>>, vector<1x1x8xf32>
    %7 = vector.shape_cast %6 : vector<1x1x8xf32> to vector<1x8xf32>
    %c0_11 = arith.constant 0 : index
    %c0_12 = arith.constant 0 : index
    %8 = vector.load %arg5[%c0_11, %c0_12] : memref<32x32xf32, #tpu.memory_space<vmem>>, vector<32x32xf32>
    %c0_13 = arith.constant 0 : index
    %c0_14 = arith.constant 0 : index
    %9 = vector.load %arg6[%c0_13, %c0_14] : memref<1x32xf32, #tpu.memory_space<vmem>>, vector<1x32xf32>
    %c0_15 = arith.constant 0 : index
    %c0_16 = arith.constant 0 : index
    %10 = vector.load %arg7[%c0_15, %c0_16] : memref<32x64xf32, #tpu.memory_space<vmem>>, vector<32x64xf32>
    %c0_17 = arith.constant 0 : index
    %c0_18 = arith.constant 0 : index
    %11 = vector.load %arg8[%c0_17, %c0_18] : memref<1x64xf32, #tpu.memory_space<vmem>>, vector<1x64xf32>
    %c0_19 = arith.constant 0 : index
    %c0_20 = arith.constant 0 : index
    %12 = vector.load %arg9[%c0_19, %c0_20] : memref<32x32xf32, #tpu.memory_space<vmem>>, vector<32x32xf32>
    %c0_21 = arith.constant 0 : index
    %c0_22 = arith.constant 0 : index
    %13 = vector.load %arg10[%c0_21, %c0_22] : memref<1x32xf32, #tpu.memory_space<vmem>>, vector<1x32xf32>
    %c0_23 = arith.constant 0 : index
    %c0_24 = arith.constant 0 : index
    %14 = vector.load %arg11[%c0_23, %c0_24] : memref<1x32xf32, #tpu.memory_space<vmem>>, vector<1x32xf32>
    %c0_25 = arith.constant 0 : index
    %c0_26 = arith.constant 0 : index
    %15 = vector.load %arg12[%c0_25, %c0_26] : memref<1x32xf32, #tpu.memory_space<vmem>>, vector<1x32xf32>
    %cst = arith.constant dense<0.000000e+00> : vector<8x32xf32>
    %16 = tpu.matmul %1, %8, %cst {dimension_numbers = #tpu.dot_dimension_numbers<[1], [0], [0], [1], [0, 0, 1, 1], [], []>} : vector<8x32xf32>, vector<32x32xf32>, vector<8x32xf32> -> vector<8x32xf32>
    %17 = vector.broadcast %9 : vector<1x32xf32> to vector<8x32xf32>
    %18 = arith.addf %16, %17 : vector<8x32xf32>
    %cst_27 = arith.constant dense<0.000000e+00> : vector<8x64xf32>
    %19 = tpu.matmul %3, %10, %cst_27 {dimension_numbers = #tpu.dot_dimension_numbers<[1], [0], [0], [1], [0, 0, 1, 1], [], []>} : vector<8x32xf32>, vector<32x64xf32>, vector<8x64xf32> -> vector<8x64xf32>
    %20 = vector.broadcast %11 : vector<1x64xf32> to vector<8x64xf32>
    %21 = arith.addf %19, %20 : vector<8x64xf32>
    %22 = vector.extract_strided_slice %21 {offsets = [0, 0], sizes = [8, 32], strides = [1, 1]} : vector<8x64xf32> to vector<8x32xf32>
    %23 = vector.extract_strided_slice %21 {offsets = [0, 32], sizes = [8, 32], strides = [1, 1]} : vector<8x64xf32> to vector<8x32xf32>
    %cst_28 = arith.constant 0.000000e+00 : f32
    %24 = vector.broadcast %cst_28 : f32 to vector<8x32xf32>
    %25 = vector.extract_strided_slice %18 {offsets = [0, 0], sizes = [8, 8], strides = [1, 1]} : vector<8x32xf32> to vector<8x8xf32>
    %26 = vector.extract_strided_slice %22 {offsets = [0, 0], sizes = [8, 8], strides = [1, 1]} : vector<8x32xf32> to vector<8x8xf32>
    %27 = tpu.transpose %26, [1, 0] : vector<8x8xf32> -> vector<8x8xf32>
    %cst_29 = arith.constant dense<0.000000e+00> : vector<8x8xf32>
    %28 = tpu.matmul %25, %27, %cst_29 {dimension_numbers = #tpu.dot_dimension_numbers<[1], [0], [0], [1], [0, 0, 1, 1], [], []>} : vector<8x8xf32>, vector<8x8xf32>, vector<8x8xf32> -> vector<8x8xf32>
    %cst_30 = arith.constant 0.353553385 : f32
    %29 = vector.broadcast %cst_30 : f32 to vector<8x8xf32>
    %30 = arith.mulf %28, %29 : vector<8x8xf32>
    %31 = vector.broadcast %5 : vector<1x8xf32> to vector<8x8xf32>
    %32 = arith.addf %30, %31 : vector<8x8xf32>
    %cst_31 = arith.constant dense<0xFF800000> : vector<8xf32>
    %33 = vector.multi_reduction <maximumf>, %32, %cst_31 [1] : vector<8x8xf32> to vector<8xf32>
    %34 = vector.shape_cast %33 : vector<8xf32> to vector<8x1xf32>
    %35 = vector.broadcast %34 : vector<8x1xf32> to vector<8x8xf32>
    %36 = arith.subf %32, %35 : vector<8x8xf32>
    %37 = math.exp %36 : vector<8x8xf32>
    %cst_32 = arith.constant dense<0.000000e+00> : vector<8xf32>
    %38 = vector.multi_reduction <add>, %37, %cst_32 [1] : vector<8x8xf32> to vector<8xf32>
    %39 = vector.shape_cast %38 : vector<8xf32> to vector<8x1xf32>
    %40 = tpu.reciprocal %39 {approx = true} : vector<8x1xf32> -> vector<8x1xf32>
    %41 = vector.broadcast %40 : vector<8x1xf32> to vector<8x8xf32>
    %42 = arith.mulf %37, %41 : vector<8x8xf32>
    %43 = vector.extract_strided_slice %23 {offsets = [0, 0], sizes = [8, 8], strides = [1, 1]} : vector<8x32xf32> to vector<8x8xf32>
    %cst_33 = arith.constant dense<0.000000e+00> : vector<8x8xf32>
    %44 = tpu.matmul %42, %43, %cst_33 {dimension_numbers = #tpu.dot_dimension_numbers<[1], [0], [0], [1], [0, 0, 1, 1], [], []>} : vector<8x8xf32>, vector<8x8xf32>, vector<8x8xf32> -> vector<8x8xf32>
    %45 = vector.extract_strided_slice %12 {offsets = [0, 0], sizes = [8, 32], strides = [1, 1]} : vector<32x32xf32> to vector<8x32xf32>
    %cst_34 = arith.constant dense<0.000000e+00> : vector<8x32xf32>
    %46 = tpu.matmul %44, %45, %cst_34 {dimension_numbers = #tpu.dot_dimension_numbers<[1], [0], [0], [1], [0, 0, 1, 1], [], []>} : vector<8x8xf32>, vector<8x32xf32>, vector<8x32xf32> -> vector<8x32xf32>
    %47 = arith.addf %24, %46 : vector<8x32xf32>
    %48 = vector.extract_strided_slice %18 {offsets = [0, 8], sizes = [8, 8], strides = [1, 1]} : vector<8x32xf32> to vector<8x8xf32>
    %49 = vector.extract_strided_slice %22 {offsets = [0, 8], sizes = [8, 8], strides = [1, 1]} : vector<8x32xf32> to vector<8x8xf32>
    %50 = tpu.transpose %49, [1, 0] : vector<8x8xf32> -> vector<8x8xf32>
    %cst_35 = arith.constant dense<0.000000e+00> : vector<8x8xf32>
    %51 = tpu.matmul %48, %50, %cst_35 {dimension_numbers = #tpu.dot_dimension_numbers<[1], [0], [0], [1], [0, 0, 1, 1], [], []>} : vector<8x8xf32>, vector<8x8xf32>, vector<8x8xf32> -> vector<8x8xf32>
    %cst_36 = arith.constant 0.353553385 : f32
    %52 = vector.broadcast %cst_36 : f32 to vector<8x8xf32>
    %53 = arith.mulf %51, %52 : vector<8x8xf32>
    %54 = vector.broadcast %5 : vector<1x8xf32> to vector<8x8xf32>
    %55 = arith.addf %53, %54 : vector<8x8xf32>
    %cst_37 = arith.constant dense<0xFF800000> : vector<8xf32>
    %56 = vector.multi_reduction <maximumf>, %55, %cst_37 [1] : vector<8x8xf32> to vector<8xf32>
    %57 = vector.shape_cast %56 : vector<8xf32> to vector<8x1xf32>
    %58 = vector.broadcast %57 : vector<8x1xf32> to vector<8x8xf32>
    %59 = arith.subf %55, %58 : vector<8x8xf32>
    %60 = math.exp %59 : vector<8x8xf32>
    %cst_38 = arith.constant dense<0.000000e+00> : vector<8xf32>
    %61 = vector.multi_reduction <add>, %60, %cst_38 [1] : vector<8x8xf32> to vector<8xf32>
    %62 = vector.shape_cast %61 : vector<8xf32> to vector<8x1xf32>
    %63 = tpu.reciprocal %62 {approx = true} : vector<8x1xf32> -> vector<8x1xf32>
    %64 = vector.broadcast %63 : vector<8x1xf32> to vector<8x8xf32>
    %65 = arith.mulf %60, %64 : vector<8x8xf32>
    %66 = vector.extract_strided_slice %23 {offsets = [0, 8], sizes = [8, 8], strides = [1, 1]} : vector<8x32xf32> to vector<8x8xf32>
    %cst_39 = arith.constant dense<0.000000e+00> : vector<8x8xf32>
    %67 = tpu.matmul %65, %66, %cst_39 {dimension_numbers = #tpu.dot_dimension_numbers<[1], [0], [0], [1], [0, 0, 1, 1], [], []>} : vector<8x8xf32>, vector<8x8xf32>, vector<8x8xf32> -> vector<8x8xf32>
    %68 = vector.extract_strided_slice %12 {offsets = [8, 0], sizes = [8, 32], strides = [1, 1]} : vector<32x32xf32> to vector<8x32xf32>
    %cst_40 = arith.constant dense<0.000000e+00> : vector<8x32xf32>
    %69 = tpu.matmul %67, %68, %cst_40 {dimension_numbers = #tpu.dot_dimension_numbers<[1], [0], [0], [1], [0, 0, 1, 1], [], []>} : vector<8x8xf32>, vector<8x32xf32>, vector<8x32xf32> -> vector<8x32xf32>
    %70 = arith.addf %47, %69 : vector<8x32xf32>
    %71 = vector.extract_strided_slice %18 {offsets = [0, 16], sizes = [8, 8], strides = [1, 1]} : vector<8x32xf32> to vector<8x8xf32>
    %72 = vector.extract_strided_slice %22 {offsets = [0, 16], sizes = [8, 8], strides = [1, 1]} : vector<8x32xf32> to vector<8x8xf32>
    %73 = tpu.transpose %72, [1, 0] : vector<8x8xf32> -> vector<8x8xf32>
    %cst_41 = arith.constant dense<0.000000e+00> : vector<8x8xf32>
    %74 = tpu.matmul %71, %73, %cst_41 {dimension_numbers = #tpu.dot_dimension_numbers<[1], [0], [0], [1], [0, 0, 1, 1], [], []>} : vector<8x8xf32>, vector<8x8xf32>, vector<8x8xf32> -> vector<8x8xf32>
    %cst_42 = arith.constant 0.353553385 : f32
    %75 = vector.broadcast %cst_42 : f32 to vector<8x8xf32>
    %76 = arith.mulf %74, %75 : vector<8x8xf32>
    %77 = vector.broadcast %5 : vector<1x8xf32> to vector<8x8xf32>
    %78 = arith.addf %76, %77 : vector<8x8xf32>
    %cst_43 = arith.constant dense<0xFF800000> : vector<8xf32>
    %79 = vector.multi_reduction <maximumf>, %78, %cst_43 [1] : vector<8x8xf32> to vector<8xf32>
    %80 = vector.shape_cast %79 : vector<8xf32> to vector<8x1xf32>
    %81 = vector.broadcast %80 : vector<8x1xf32> to vector<8x8xf32>
    %82 = arith.subf %78, %81 : vector<8x8xf32>
    %83 = math.exp %82 : vector<8x8xf32>
    %cst_44 = arith.constant dense<0.000000e+00> : vector<8xf32>
    %84 = vector.multi_reduction <add>, %83, %cst_44 [1] : vector<8x8xf32> to vector<8xf32>
    %85 = vector.shape_cast %84 : vector<8xf32> to vector<8x1xf32>
    %86 = tpu.reciprocal %85 {approx = true} : vector<8x1xf32> -> vector<8x1xf32>
    %87 = vector.broadcast %86 : vector<8x1xf32> to vector<8x8xf32>
    %88 = arith.mulf %83, %87 : vector<8x8xf32>
    %89 = vector.extract_strided_slice %23 {offsets = [0, 16], sizes = [8, 8], strides = [1, 1]} : vector<8x32xf32> to vector<8x8xf32>
    %cst_45 = arith.constant dense<0.000000e+00> : vector<8x8xf32>
    %90 = tpu.matmul %88, %89, %cst_45 {dimension_numbers = #tpu.dot_dimension_numbers<[1], [0], [0], [1], [0, 0, 1, 1], [], []>} : vector<8x8xf32>, vector<8x8xf32>, vector<8x8xf32> -> vector<8x8xf32>
    %91 = vector.extract_strided_slice %12 {offsets = [16, 0], sizes = [8, 32], strides = [1, 1]} : vector<32x32xf32> to vector<8x32xf32>
    %cst_46 = arith.constant dense<0.000000e+00> : vector<8x32xf32>
    %92 = tpu.matmul %90, %91, %cst_46 {dimension_numbers = #tpu.dot_dimension_numbers<[1], [0], [0], [1], [0, 0, 1, 1], [], []>} : vector<8x8xf32>, vector<8x32xf32>, vector<8x32xf32> -> vector<8x32xf32>
    %93 = arith.addf %70, %92 : vector<8x32xf32>
    %94 = vector.extract_strided_slice %18 {offsets = [0, 24], sizes = [8, 8], strides = [1, 1]} : vector<8x32xf32> to vector<8x8xf32>
    %95 = vector.extract_strided_slice %22 {offsets = [0, 24], sizes = [8, 8], strides = [1, 1]} : vector<8x32xf32> to vector<8x8xf32>
    %96 = tpu.transpose %95, [1, 0] : vector<8x8xf32> -> vector<8x8xf32>
    %cst_47 = arith.constant dense<0.000000e+00> : vector<8x8xf32>
    %97 = tpu.matmul %94, %96, %cst_47 {dimension_numbers = #tpu.dot_dimension_numbers<[1], [0], [0], [1], [0, 0, 1, 1], [], []>} : vector<8x8xf32>, vector<8x8xf32>, vector<8x8xf32> -> vector<8x8xf32>
    %cst_48 = arith.constant 0.353553385 : f32
    %98 = vector.broadcast %cst_48 : f32 to vector<8x8xf32>
    %99 = arith.mulf %97, %98 : vector<8x8xf32>
    %100 = vector.broadcast %5 : vector<1x8xf32> to vector<8x8xf32>
    %101 = arith.addf %99, %100 : vector<8x8xf32>
    %cst_49 = arith.constant dense<0xFF800000> : vector<8xf32>
    %102 = vector.multi_reduction <maximumf>, %101, %cst_49 [1] : vector<8x8xf32> to vector<8xf32>
    %103 = vector.shape_cast %102 : vector<8xf32> to vector<8x1xf32>
    %104 = vector.broadcast %103 : vector<8x1xf32> to vector<8x8xf32>
    %105 = arith.subf %101, %104 : vector<8x8xf32>
    %106 = math.exp %105 : vector<8x8xf32>
    %cst_50 = arith.constant dense<0.000000e+00> : vector<8xf32>
    %107 = vector.multi_reduction <add>, %106, %cst_50 [1] : vector<8x8xf32> to vector<8xf32>
    %108 = vector.shape_cast %107 : vector<8xf32> to vector<8x1xf32>
    %109 = tpu.reciprocal %108 {approx = true} : vector<8x1xf32> -> vector<8x1xf32>
    %110 = vector.broadcast %109 : vector<8x1xf32> to vector<8x8xf32>
    %111 = arith.mulf %106, %110 : vector<8x8xf32>
    %112 = vector.extract_strided_slice %23 {offsets = [0, 24], sizes = [8, 8], strides = [1, 1]} : vector<8x32xf32> to vector<8x8xf32>
    %cst_51 = arith.constant dense<0.000000e+00> : vector<8x8xf32>
    %113 = tpu.matmul %111, %112, %cst_51 {dimension_numbers = #tpu.dot_dimension_numbers<[1], [0], [0], [1], [0, 0, 1, 1], [], []>} : vector<8x8xf32>, vector<8x8xf32>, vector<8x8xf32> -> vector<8x8xf32>
    %114 = vector.extract_strided_slice %12 {offsets = [24, 0], sizes = [8, 32], strides = [1, 1]} : vector<32x32xf32> to vector<8x32xf32>
    %cst_52 = arith.constant dense<0.000000e+00> : vector<8x32xf32>
    %115 = tpu.matmul %113, %114, %cst_52 {dimension_numbers = #tpu.dot_dimension_numbers<[1], [0], [0], [1], [0, 0, 1, 1], [], []>} : vector<8x8xf32>, vector<8x32xf32>, vector<8x32xf32> -> vector<8x32xf32>
    %116 = arith.addf %93, %115 : vector<8x32xf32>
    %117 = vector.broadcast %13 : vector<1x32xf32> to vector<8x32xf32>
    %118 = arith.addf %116, %117 : vector<8x32xf32>
    %119 = arith.addf %118, %1 : vector<8x32xf32>
    %cst_53 = arith.constant dense<0.000000e+00> : vector<8xf32>
    %120 = vector.multi_reduction <add>, %119, %cst_53 [1] : vector<8x32xf32> to vector<8xf32>
    %121 = vector.shape_cast %120 : vector<8xf32> to vector<8x1xf32>
    %cst_54 = arith.constant 3.200000e+01 : f32
    %122 = vector.broadcast %cst_54 : f32 to vector<8x1xf32>
    %123 = arith.divf %121, %122 : vector<8x1xf32>
    %124 = vector.broadcast %123 : vector<8x1xf32> to vector<8x32xf32>
    %125 = arith.subf %119, %124 : vector<8x32xf32>
    %126 = arith.mulf %125, %125 : vector<8x32xf32>
    %cst_55 = arith.constant dense<0.000000e+00> : vector<8xf32>
    %127 = vector.multi_reduction <add>, %126, %cst_55 [1] : vector<8x32xf32> to vector<8xf32>
    %128 = vector.shape_cast %127 : vector<8xf32> to vector<8x1xf32>
    %cst_56 = arith.constant 3.200000e+01 : f32
    %129 = vector.broadcast %cst_56 : f32 to vector<8x1xf32>
    %130 = arith.divf %128, %129 : vector<8x1xf32>
    %131 = vector.broadcast %123 : vector<8x1xf32> to vector<8x32xf32>
    %132 = arith.subf %119, %131 : vector<8x32xf32>
    %cst_57 = arith.constant 9.99999996E-13 : f32
    %133 = vector.broadcast %cst_57 : f32 to vector<8x1xf32>
    %134 = arith.addf %130, %133 : vector<8x1xf32>
    %135 = math.rsqrt %134 : vector<8x1xf32>
    %136 = vector.broadcast %135 : vector<8x1xf32> to vector<8x32xf32>
    %137 = arith.mulf %132, %136 : vector<8x32xf32>
    %138 = vector.broadcast %14 : vector<1x32xf32> to vector<8x32xf32>
    %139 = arith.mulf %137, %138 : vector<8x32xf32>
    %140 = vector.broadcast %15 : vector<1x32xf32> to vector<8x32xf32>
    %141 = arith.addf %139, %140 : vector<8x32xf32>
    %c0_58 = arith.constant 0 : index
    %c0_59 = arith.constant 0 : index
    %142 = vector.load %arg13[%c0_58, %c0_59] : memref<32x32xf32, #tpu.memory_space<vmem>>, vector<32x32xf32>
    %c0_60 = arith.constant 0 : index
    %c0_61 = arith.constant 0 : index
    %143 = vector.load %arg14[%c0_60, %c0_61] : memref<1x32xf32, #tpu.memory_space<vmem>>, vector<1x32xf32>
    %c0_62 = arith.constant 0 : index
    %c0_63 = arith.constant 0 : index
    %144 = vector.load %arg15[%c0_62, %c0_63] : memref<32x64xf32, #tpu.memory_space<vmem>>, vector<32x64xf32>
    %c0_64 = arith.constant 0 : index
    %c0_65 = arith.constant 0 : index
    %145 = vector.load %arg16[%c0_64, %c0_65] : memref<1x64xf32, #tpu.memory_space<vmem>>, vector<1x64xf32>
    %c0_66 = arith.constant 0 : index
    %c0_67 = arith.constant 0 : index
    %146 = vector.load %arg17[%c0_66, %c0_67] : memref<32x32xf32, #tpu.memory_space<vmem>>, vector<32x32xf32>
    %c0_68 = arith.constant 0 : index
    %c0_69 = arith.constant 0 : index
    %147 = vector.load %arg18[%c0_68, %c0_69] : memref<1x32xf32, #tpu.memory_space<vmem>>, vector<1x32xf32>
    %c0_70 = arith.constant 0 : index
    %c0_71 = arith.constant 0 : index
    %148 = vector.load %arg19[%c0_70, %c0_71] : memref<1x32xf32, #tpu.memory_space<vmem>>, vector<1x32xf32>
    %c0_72 = arith.constant 0 : index
    %c0_73 = arith.constant 0 : index
    %149 = vector.load %arg20[%c0_72, %c0_73] : memref<1x32xf32, #tpu.memory_space<vmem>>, vector<1x32xf32>
    %cst_74 = arith.constant dense<0.000000e+00> : vector<8x32xf32>
    %150 = tpu.matmul %141, %142, %cst_74 {dimension_numbers = #tpu.dot_dimension_numbers<[1], [0], [0], [1], [0, 0, 1, 1], [], []>} : vector<8x32xf32>, vector<32x32xf32>, vector<8x32xf32> -> vector<8x32xf32>
    %151 = vector.broadcast %143 : vector<1x32xf32> to vector<8x32xf32>
    %152 = arith.addf %150, %151 : vector<8x32xf32>
    %cst_75 = arith.constant dense<0.000000e+00> : vector<8x64xf32>
    %153 = tpu.matmul %141, %144, %cst_75 {dimension_numbers = #tpu.dot_dimension_numbers<[1], [0], [0], [1], [0, 0, 1, 1], [], []>} : vector<8x32xf32>, vector<32x64xf32>, vector<8x64xf32> -> vector<8x64xf32>
    %154 = vector.broadcast %145 : vector<1x64xf32> to vector<8x64xf32>
    %155 = arith.addf %153, %154 : vector<8x64xf32>
    %156 = vector.extract_strided_slice %155 {offsets = [0, 0], sizes = [8, 32], strides = [1, 1]} : vector<8x64xf32> to vector<8x32xf32>
    %157 = vector.extract_strided_slice %155 {offsets = [0, 32], sizes = [8, 32], strides = [1, 1]} : vector<8x64xf32> to vector<8x32xf32>
    %cst_76 = arith.constant 0.000000e+00 : f32
    %158 = vector.broadcast %cst_76 : f32 to vector<8x32xf32>
    %159 = vector.extract_strided_slice %152 {offsets = [0, 0], sizes = [8, 8], strides = [1, 1]} : vector<8x32xf32> to vector<8x8xf32>
    %160 = vector.extract_strided_slice %156 {offsets = [0, 0], sizes = [8, 8], strides = [1, 1]} : vector<8x32xf32> to vector<8x8xf32>
    %161 = tpu.transpose %160, [1, 0] : vector<8x8xf32> -> vector<8x8xf32>
    %cst_77 = arith.constant dense<0.000000e+00> : vector<8x8xf32>
    %162 = tpu.matmul %159, %161, %cst_77 {dimension_numbers = #tpu.dot_dimension_numbers<[1], [0], [0], [1], [0, 0, 1, 1], [], []>} : vector<8x8xf32>, vector<8x8xf32>, vector<8x8xf32> -> vector<8x8xf32>
    %cst_78 = arith.constant 0.353553385 : f32
    %163 = vector.broadcast %cst_78 : f32 to vector<8x8xf32>
    %164 = arith.mulf %162, %163 : vector<8x8xf32>
    %165 = vector.broadcast %7 : vector<1x8xf32> to vector<8x8xf32>
    %166 = arith.addf %164, %165 : vector<8x8xf32>
    %cst_79 = arith.constant dense<0xFF800000> : vector<8xf32>
    %167 = vector.multi_reduction <maximumf>, %166, %cst_79 [1] : vector<8x8xf32> to vector<8xf32>
    %168 = vector.shape_cast %167 : vector<8xf32> to vector<8x1xf32>
    %169 = vector.broadcast %168 : vector<8x1xf32> to vector<8x8xf32>
    %170 = arith.subf %166, %169 : vector<8x8xf32>
    %171 = math.exp %170 : vector<8x8xf32>
    %cst_80 = arith.constant dense<0.000000e+00> : vector<8xf32>
    %172 = vector.multi_reduction <add>, %171, %cst_80 [1] : vector<8x8xf32> to vector<8xf32>
    %173 = vector.shape_cast %172 : vector<8xf32> to vector<8x1xf32>
    %174 = tpu.reciprocal %173 {approx = true} : vector<8x1xf32> -> vector<8x1xf32>
    %175 = vector.broadcast %174 : vector<8x1xf32> to vector<8x8xf32>
    %176 = arith.mulf %171, %175 : vector<8x8xf32>
    %177 = vector.extract_strided_slice %157 {offsets = [0, 0], sizes = [8, 8], strides = [1, 1]} : vector<8x32xf32> to vector<8x8xf32>
    %cst_81 = arith.constant dense<0.000000e+00> : vector<8x8xf32>
    %178 = tpu.matmul %176, %177, %cst_81 {dimension_numbers = #tpu.dot_dimension_numbers<[1], [0], [0], [1], [0, 0, 1, 1], [], []>} : vector<8x8xf32>, vector<8x8xf32>, vector<8x8xf32> -> vector<8x8xf32>
    %179 = vector.extract_strided_slice %146 {offsets = [0, 0], sizes = [8, 32], strides = [1, 1]} : vector<32x32xf32> to vector<8x32xf32>
    %cst_82 = arith.constant dense<0.000000e+00> : vector<8x32xf32>
    %180 = tpu.matmul %178, %179, %cst_82 {dimension_numbers = #tpu.dot_dimension_numbers<[1], [0], [0], [1], [0, 0, 1, 1], [], []>} : vector<8x8xf32>, vector<8x32xf32>, vector<8x32xf32> -> vector<8x32xf32>
    %181 = arith.addf %158, %180 : vector<8x32xf32>
    %182 = vector.extract_strided_slice %152 {offsets = [0, 8], sizes = [8, 8], strides = [1, 1]} : vector<8x32xf32> to vector<8x8xf32>
    %183 = vector.extract_strided_slice %156 {offsets = [0, 8], sizes = [8, 8], strides = [1, 1]} : vector<8x32xf32> to vector<8x8xf32>
    %184 = tpu.transpose %183, [1, 0] : vector<8x8xf32> -> vector<8x8xf32>
    %cst_83 = arith.constant dense<0.000000e+00> : vector<8x8xf32>
    %185 = tpu.matmul %182, %184, %cst_83 {dimension_numbers = #tpu.dot_dimension_numbers<[1], [0], [0], [1], [0, 0, 1, 1], [], []>} : vector<8x8xf32>, vector<8x8xf32>, vector<8x8xf32> -> vector<8x8xf32>
    %cst_84 = arith.constant 0.353553385 : f32
    %186 = vector.broadcast %cst_84 : f32 to vector<8x8xf32>
    %187 = arith.mulf %185, %186 : vector<8x8xf32>
    %188 = vector.broadcast %7 : vector<1x8xf32> to vector<8x8xf32>
    %189 = arith.addf %187, %188 : vector<8x8xf32>
    %cst_85 = arith.constant dense<0xFF800000> : vector<8xf32>
    %190 = vector.multi_reduction <maximumf>, %189, %cst_85 [1] : vector<8x8xf32> to vector<8xf32>
    %191 = vector.shape_cast %190 : vector<8xf32> to vector<8x1xf32>
    %192 = vector.broadcast %191 : vector<8x1xf32> to vector<8x8xf32>
    %193 = arith.subf %189, %192 : vector<8x8xf32>
    %194 = math.exp %193 : vector<8x8xf32>
    %cst_86 = arith.constant dense<0.000000e+00> : vector<8xf32>
    %195 = vector.multi_reduction <add>, %194, %cst_86 [1] : vector<8x8xf32> to vector<8xf32>
    %196 = vector.shape_cast %195 : vector<8xf32> to vector<8x1xf32>
    %197 = tpu.reciprocal %196 {approx = true} : vector<8x1xf32> -> vector<8x1xf32>
    %198 = vector.broadcast %197 : vector<8x1xf32> to vector<8x8xf32>
    %199 = arith.mulf %194, %198 : vector<8x8xf32>
    %200 = vector.extract_strided_slice %157 {offsets = [0, 8], sizes = [8, 8], strides = [1, 1]} : vector<8x32xf32> to vector<8x8xf32>
    %cst_87 = arith.constant dense<0.000000e+00> : vector<8x8xf32>
    %201 = tpu.matmul %199, %200, %cst_87 {dimension_numbers = #tpu.dot_dimension_numbers<[1], [0], [0], [1], [0, 0, 1, 1], [], []>} : vector<8x8xf32>, vector<8x8xf32>, vector<8x8xf32> -> vector<8x8xf32>
    %202 = vector.extract_strided_slice %146 {offsets = [8, 0], sizes = [8, 32], strides = [1, 1]} : vector<32x32xf32> to vector<8x32xf32>
    %cst_88 = arith.constant dense<0.000000e+00> : vector<8x32xf32>
    %203 = tpu.matmul %201, %202, %cst_88 {dimension_numbers = #tpu.dot_dimension_numbers<[1], [0], [0], [1], [0, 0, 1, 1], [], []>} : vector<8x8xf32>, vector<8x32xf32>, vector<8x32xf32> -> vector<8x32xf32>
    %204 = arith.addf %181, %203 : vector<8x32xf32>
    %205 = vector.extract_strided_slice %152 {offsets = [0, 16], sizes = [8, 8], strides = [1, 1]} : vector<8x32xf32> to vector<8x8xf32>
    %206 = vector.extract_strided_slice %156 {offsets = [0, 16], sizes = [8, 8], strides = [1, 1]} : vector<8x32xf32> to vector<8x8xf32>
    %207 = tpu.transpose %206, [1, 0] : vector<8x8xf32> -> vector<8x8xf32>
    %cst_89 = arith.constant dense<0.000000e+00> : vector<8x8xf32>
    %208 = tpu.matmul %205, %207, %cst_89 {dimension_numbers = #tpu.dot_dimension_numbers<[1], [0], [0], [1], [0, 0, 1, 1], [], []>} : vector<8x8xf32>, vector<8x8xf32>, vector<8x8xf32> -> vector<8x8xf32>
    %cst_90 = arith.constant 0.353553385 : f32
    %209 = vector.broadcast %cst_90 : f32 to vector<8x8xf32>
    %210 = arith.mulf %208, %209 : vector<8x8xf32>
    %211 = vector.broadcast %7 : vector<1x8xf32> to vector<8x8xf32>
    %212 = arith.addf %210, %211 : vector<8x8xf32>
    %cst_91 = arith.constant dense<0xFF800000> : vector<8xf32>
    %213 = vector.multi_reduction <maximumf>, %212, %cst_91 [1] : vector<8x8xf32> to vector<8xf32>
    %214 = vector.shape_cast %213 : vector<8xf32> to vector<8x1xf32>
    %215 = vector.broadcast %214 : vector<8x1xf32> to vector<8x8xf32>
    %216 = arith.subf %212, %215 : vector<8x8xf32>
    %217 = math.exp %216 : vector<8x8xf32>
    %cst_92 = arith.constant dense<0.000000e+00> : vector<8xf32>
    %218 = vector.multi_reduction <add>, %217, %cst_92 [1] : vector<8x8xf32> to vector<8xf32>
    %219 = vector.shape_cast %218 : vector<8xf32> to vector<8x1xf32>
    %220 = tpu.reciprocal %219 {approx = true} : vector<8x1xf32> -> vector<8x1xf32>
    %221 = vector.broadcast %220 : vector<8x1xf32> to vector<8x8xf32>
    %222 = arith.mulf %217, %221 : vector<8x8xf32>
    %223 = vector.extract_strided_slice %157 {offsets = [0, 16], sizes = [8, 8], strides = [1, 1]} : vector<8x32xf32> to vector<8x8xf32>
    %cst_93 = arith.constant dense<0.000000e+00> : vector<8x8xf32>
    %224 = tpu.matmul %222, %223, %cst_93 {dimension_numbers = #tpu.dot_dimension_numbers<[1], [0], [0], [1], [0, 0, 1, 1], [], []>} : vector<8x8xf32>, vector<8x8xf32>, vector<8x8xf32> -> vector<8x8xf32>
    %225 = vector.extract_strided_slice %146 {offsets = [16, 0], sizes = [8, 32], strides = [1, 1]} : vector<32x32xf32> to vector<8x32xf32>
    %cst_94 = arith.constant dense<0.000000e+00> : vector<8x32xf32>
    %226 = tpu.matmul %224, %225, %cst_94 {dimension_numbers = #tpu.dot_dimension_numbers<[1], [0], [0], [1], [0, 0, 1, 1], [], []>} : vector<8x8xf32>, vector<8x32xf32>, vector<8x32xf32> -> vector<8x32xf32>
    %227 = arith.addf %204, %226 : vector<8x32xf32>
    %228 = vector.extract_strided_slice %152 {offsets = [0, 24], sizes = [8, 8], strides = [1, 1]} : vector<8x32xf32> to vector<8x8xf32>
    %229 = vector.extract_strided_slice %156 {offsets = [0, 24], sizes = [8, 8], strides = [1, 1]} : vector<8x32xf32> to vector<8x8xf32>
    %230 = tpu.transpose %229, [1, 0] : vector<8x8xf32> -> vector<8x8xf32>
    %cst_95 = arith.constant dense<0.000000e+00> : vector<8x8xf32>
    %231 = tpu.matmul %228, %230, %cst_95 {dimension_numbers = #tpu.dot_dimension_numbers<[1], [0], [0], [1], [0, 0, 1, 1], [], []>} : vector<8x8xf32>, vector<8x8xf32>, vector<8x8xf32> -> vector<8x8xf32>
    %cst_96 = arith.constant 0.353553385 : f32
    %232 = vector.broadcast %cst_96 : f32 to vector<8x8xf32>
    %233 = arith.mulf %231, %232 : vector<8x8xf32>
    %234 = vector.broadcast %7 : vector<1x8xf32> to vector<8x8xf32>
    %235 = arith.addf %233, %234 : vector<8x8xf32>
    %cst_97 = arith.constant dense<0xFF800000> : vector<8xf32>
    %236 = vector.multi_reduction <maximumf>, %235, %cst_97 [1] : vector<8x8xf32> to vector<8xf32>
    %237 = vector.shape_cast %236 : vector<8xf32> to vector<8x1xf32>
    %238 = vector.broadcast %237 : vector<8x1xf32> to vector<8x8xf32>
    %239 = arith.subf %235, %238 : vector<8x8xf32>
    %240 = math.exp %239 : vector<8x8xf32>
    %cst_98 = arith.constant dense<0.000000e+00> : vector<8xf32>
    %241 = vector.multi_reduction <add>, %240, %cst_98 [1] : vector<8x8xf32> to vector<8xf32>
    %242 = vector.shape_cast %241 : vector<8xf32> to vector<8x1xf32>
    %243 = tpu.reciprocal %242 {approx = true} : vector<8x1xf32> -> vector<8x1xf32>
    %244 = vector.broadcast %243 : vector<8x1xf32> to vector<8x8xf32>
    %245 = arith.mulf %240, %244 : vector<8x8xf32>
    %246 = vector.extract_strided_slice %157 {offsets = [0, 24], sizes = [8, 8], strides = [1, 1]} : vector<8x32xf32> to vector<8x8xf32>
    %cst_99 = arith.constant dense<0.000000e+00> : vector<8x8xf32>
    %247 = tpu.matmul %245, %246, %cst_99 {dimension_numbers = #tpu.dot_dimension_numbers<[1], [0], [0], [1], [0, 0, 1, 1], [], []>} : vector<8x8xf32>, vector<8x8xf32>, vector<8x8xf32> -> vector<8x8xf32>
    %248 = vector.extract_strided_slice %146 {offsets = [24, 0], sizes = [8, 32], strides = [1, 1]} : vector<32x32xf32> to vector<8x32xf32>
    %cst_100 = arith.constant dense<0.000000e+00> : vector<8x32xf32>
    %249 = tpu.matmul %247, %248, %cst_100 {dimension_numbers = #tpu.dot_dimension_numbers<[1], [0], [0], [1], [0, 0, 1, 1], [], []>} : vector<8x8xf32>, vector<8x32xf32>, vector<8x32xf32> -> vector<8x32xf32>
    %250 = arith.addf %227, %249 : vector<8x32xf32>
    %251 = vector.broadcast %147 : vector<1x32xf32> to vector<8x32xf32>
    %252 = arith.addf %250, %251 : vector<8x32xf32>
    %253 = arith.addf %252, %141 : vector<8x32xf32>
    %cst_101 = arith.constant dense<0.000000e+00> : vector<8xf32>
    %254 = vector.multi_reduction <add>, %253, %cst_101 [1] : vector<8x32xf32> to vector<8xf32>
    %255 = vector.shape_cast %254 : vector<8xf32> to vector<8x1xf32>
    %cst_102 = arith.constant 3.200000e+01 : f32
    %256 = vector.broadcast %cst_102 : f32 to vector<8x1xf32>
    %257 = arith.divf %255, %256 : vector<8x1xf32>
    %258 = vector.broadcast %257 : vector<8x1xf32> to vector<8x32xf32>
    %259 = arith.subf %253, %258 : vector<8x32xf32>
    %260 = arith.mulf %259, %259 : vector<8x32xf32>
    %cst_103 = arith.constant dense<0.000000e+00> : vector<8xf32>
    %261 = vector.multi_reduction <add>, %260, %cst_103 [1] : vector<8x32xf32> to vector<8xf32>
    %262 = vector.shape_cast %261 : vector<8xf32> to vector<8x1xf32>
    %cst_104 = arith.constant 3.200000e+01 : f32
    %263 = vector.broadcast %cst_104 : f32 to vector<8x1xf32>
    %264 = arith.divf %262, %263 : vector<8x1xf32>
    %265 = vector.broadcast %257 : vector<8x1xf32> to vector<8x32xf32>
    %266 = arith.subf %253, %265 : vector<8x32xf32>
    %cst_105 = arith.constant 9.99999996E-13 : f32
    %267 = vector.broadcast %cst_105 : f32 to vector<8x1xf32>
    %268 = arith.addf %264, %267 : vector<8x1xf32>
    %269 = math.rsqrt %268 : vector<8x1xf32>
    %270 = vector.broadcast %269 : vector<8x1xf32> to vector<8x32xf32>
    %271 = arith.mulf %266, %270 : vector<8x32xf32>
    %272 = vector.broadcast %148 : vector<1x32xf32> to vector<8x32xf32>
    %273 = arith.mulf %271, %272 : vector<8x32xf32>
    %274 = vector.broadcast %149 : vector<1x32xf32> to vector<8x32xf32>
    %275 = arith.addf %273, %274 : vector<8x32xf32>
    %c0_106 = arith.constant 0 : index
    %c0_107 = arith.constant 0 : index
    %276 = vector.load %arg21[%c0_106, %c0_107] : memref<32x128xf32, #tpu.memory_space<vmem>>, vector<32x128xf32>
    %c0_108 = arith.constant 0 : index
    %c0_109 = arith.constant 0 : index
    %277 = vector.load %arg22[%c0_108, %c0_109] : memref<1x128xf32, #tpu.memory_space<vmem>>, vector<1x128xf32>
    %c0_110 = arith.constant 0 : index
    %c0_111 = arith.constant 0 : index
    %278 = vector.load %arg23[%c0_110, %c0_111] : memref<128x32xf32, #tpu.memory_space<vmem>>, vector<128x32xf32>
    %c0_112 = arith.constant 0 : index
    %c0_113 = arith.constant 0 : index
    %279 = vector.load %arg24[%c0_112, %c0_113] : memref<1x32xf32, #tpu.memory_space<vmem>>, vector<1x32xf32>
    %c0_114 = arith.constant 0 : index
    %c0_115 = arith.constant 0 : index
    %280 = vector.load %arg25[%c0_114, %c0_115] : memref<1x32xf32, #tpu.memory_space<vmem>>, vector<1x32xf32>
    %c0_116 = arith.constant 0 : index
    %c0_117 = arith.constant 0 : index
    %281 = vector.load %arg26[%c0_116, %c0_117] : memref<1x32xf32, #tpu.memory_space<vmem>>, vector<1x32xf32>
    %cst_118 = arith.constant dense<0.000000e+00> : vector<8x128xf32>
    %282 = tpu.matmul %275, %276, %cst_118 {dimension_numbers = #tpu.dot_dimension_numbers<[1], [0], [0], [1], [0, 0, 1, 1], [], []>} : vector<8x32xf32>, vector<32x128xf32>, vector<8x128xf32> -> vector<8x128xf32>
    %283 = vector.broadcast %277 : vector<1x128xf32> to vector<8x128xf32>
    %284 = arith.addf %282, %283 : vector<8x128xf32>
    %cst_119 = arith.constant 5.000000e-01 : f32
    %285 = vector.broadcast %cst_119 : f32 to vector<8x128xf32>
    %286 = arith.mulf %285, %284 : vector<8x128xf32>
    %cst_120 = arith.constant 4.471500e-02 : f32
    %287 = vector.broadcast %cst_120 : f32 to vector<8x128xf32>
    %288 = arith.mulf %287, %284 : vector<8x128xf32>
    %289 = arith.mulf %288, %284 : vector<8x128xf32>
    %290 = arith.mulf %289, %284 : vector<8x128xf32>
    %291 = arith.addf %284, %290 : vector<8x128xf32>
    %cst_121 = arith.constant 0.797884583 : f32
    %292 = vector.broadcast %cst_121 : f32 to vector<8x128xf32>
    %293 = arith.mulf %292, %291 : vector<8x128xf32>
    %294 = math.tanh %293 : vector<8x128xf32>
    %cst_122 = arith.constant 1.000000e+00 : f32
    %295 = vector.broadcast %cst_122 : f32 to vector<8x128xf32>
    %296 = arith.addf %295, %294 : vector<8x128xf32>
    %297 = arith.mulf %286, %296 : vector<8x128xf32>
    %cst_123 = arith.constant dense<0.000000e+00> : vector<8x32xf32>
    %298 = tpu.matmul %297, %278, %cst_123 {dimension_numbers = #tpu.dot_dimension_numbers<[1], [0], [0], [1], [0, 0, 1, 1], [], []>} : vector<8x128xf32>, vector<128x32xf32>, vector<8x32xf32> -> vector<8x32xf32>
    %299 = vector.broadcast %279 : vector<1x32xf32> to vector<8x32xf32>
    %300 = arith.addf %298, %299 : vector<8x32xf32>
    %301 = arith.addf %300, %275 : vector<8x32xf32>
    %cst_124 = arith.constant dense<0.000000e+00> : vector<8xf32>
    %302 = vector.multi_reduction <add>, %301, %cst_124 [1] : vector<8x32xf32> to vector<8xf32>
    %303 = vector.shape_cast %302 : vector<8xf32> to vector<8x1xf32>
    %cst_125 = arith.constant 3.200000e+01 : f32
    %304 = vector.broadcast %cst_125 : f32 to vector<8x1xf32>
    %305 = arith.divf %303, %304 : vector<8x1xf32>
    %306 = vector.broadcast %305 : vector<8x1xf32> to vector<8x32xf32>
    %307 = arith.subf %301, %306 : vector<8x32xf32>
    %308 = arith.mulf %307, %307 : vector<8x32xf32>
    %cst_126 = arith.constant dense<0.000000e+00> : vector<8xf32>
    %309 = vector.multi_reduction <add>, %308, %cst_126 [1] : vector<8x32xf32> to vector<8xf32>
    %310 = vector.shape_cast %309 : vector<8xf32> to vector<8x1xf32>
    %cst_127 = arith.constant 3.200000e+01 : f32
    %311 = vector.broadcast %cst_127 : f32 to vector<8x1xf32>
    %312 = arith.divf %310, %311 : vector<8x1xf32>
    %313 = vector.broadcast %305 : vector<8x1xf32> to vector<8x32xf32>
    %314 = arith.subf %301, %313 : vector<8x32xf32>
    %cst_128 = arith.constant 9.99999996E-13 : f32
    %315 = vector.broadcast %cst_128 : f32 to vector<8x1xf32>
    %316 = arith.addf %312, %315 : vector<8x1xf32>
    %317 = math.rsqrt %316 : vector<8x1xf32>
    %318 = vector.broadcast %317 : vector<8x1xf32> to vector<8x32xf32>
    %319 = arith.mulf %314, %318 : vector<8x32xf32>
    %320 = vector.broadcast %280 : vector<1x32xf32> to vector<8x32xf32>
    %321 = arith.mulf %319, %320 : vector<8x32xf32>
    %322 = vector.broadcast %281 : vector<1x32xf32> to vector<8x32xf32>
    %323 = arith.addf %321, %322 : vector<8x32xf32>
    %c0_129 = arith.constant 0 : index
    %c0_130 = arith.constant 0 : index
    %c0_131 = arith.constant 0 : index
    %324 = vector.load %arg27[%c0_129, %c0_130, %c0_131] : memref<1x8x32xf32, #tpu.memory_space<vmem>>, vector<1x8x32xf32>
    %325 = vector.shape_cast %324 : vector<1x8x32xf32> to vector<8x32xf32>
    %326 = vector.shape_cast %323 : vector<8x32xf32> to vector<1x8x32xf32>
    tpu.vector_store %arg27[%c0_129, %c0_130, %c0_131], %326 {strides = array<i32>} : memref<1x8x32xf32, #tpu.memory_space<vmem>>, vector<1x8x32xf32>,
    return
  }
  func.func @transform_0(%arg0: i32) -> (i32, i32, i32) {
    %c0_i32 = arith.constant 0 : i32
    %c0_i32_0 = arith.constant 0 : i32
    %c0_i32_1 = arith.constant 0 : i32
    return %arg0, %c0_i32, %c0_i32_0 : i32, i32, i32
  }
  func.func @transform_1(%arg0: i32) -> (i32, i32, i32) {
    %c0_i32 = arith.constant 0 : i32
    %c0_i32_0 = arith.constant 0 : i32
    %c0_i32_1 = arith.constant 0 : i32
    return %arg0, %c0_i32, %c0_i32_0 : i32, i32, i32
  }
  func.func @transform_2(%arg0: i32) -> (i32, i32, i32) {
    %c0_i32 = arith.constant 0 : i32
    %c0_i32_0 = arith.constant 0 : i32
    %c0_i32_1 = arith.constant 0 : i32
    return %arg0, %c0_i32, %c0_i32_0 : i32, i32, i32
  }
  func.func @transform_3(%arg0: i32) -> (i32, i32, i32) {
    %c0_i32 = arith.constant 0 : i32
    %c0_i32_0 = arith.constant 0 : i32
    %c0_i32_1 = arith.constant 0 : i32
    return %arg0, %c0_i32, %c0_i32_0 : i32, i32, i32
  }
  func.func @transform_4(%arg0: i32) -> (i32, i32) {
    %c0_i32 = arith.constant 0 : i32
    %c0_i32_0 = arith.constant 0 : i32
    %c0_i32_1 = arith.constant 0 : i32
    return %c0_i32, %c0_i32_0 : i32, i32
  }
  func.func @transform_5(%arg0: i32) -> (i32, i32) {
    %c0_i32 = arith.constant 0 : i32
    %c0_i32_0 = arith.constant 0 : i32
    %c0_i32_1 = arith.constant 0 : i32
    return %c0_i32, %c0_i32_0 : i32, i32
  }
  func.func @transform_6(%arg0: i32) -> (i32, i32) {
    %c0_i32 = arith.constant 0 : i32
    %c0_i32_0 = arith.constant 0 : i32
    %c0_i32_1 = arith.constant 0 : i32
    return %c0_i32, %c0_i32_0 : i32, i32
  }
  func.func @transform_7(%arg0: i32) -> (i32, i32) {
    %c0_i32 = arith.constant 0 : i32
    %c0_i32_0 = arith.constant 0 : i32
    %c0_i32_1 = arith.constant 0 : i32
    return %c0_i32, %c0_i32_0 : i32, i32
  }
  func.func @transform_8(%arg0: i32) -> (i32, i32) {
    %c0_i32 = arith.constant 0 : i32
    %c0_i32_0 = arith.constant 0 : i32
    %c0_i32_1 = arith.constant 0 : i32
    return %c0_i32, %c0_i32_0 : i32, i32
  }
  func.func @transform_9(%arg0: i32) -> (i32, i32) {
    %c0_i32 = arith.constant 0 : i32
    %c0_i32_0 = arith.constant 0 : i32
    %c0_i32_1 = arith.constant 0 : i32
    return %c0_i32, %c0_i32_0 : i32, i32
  }
  func.func @transform_10(%arg0: i32) -> (i32, i32) {
    %c0_i32 = arith.constant 0 : i32
    %c0_i32_0 = arith.constant 0 : i32
    %c0_i32_1 = arith.constant 0 : i32
    return %c0_i32, %c0_i32_0 : i32, i32
  }
  func.func @transform_11(%arg0: i32) -> (i32, i32) {
    %c0_i32 = arith.constant 0 : i32
    %c0_i32_0 = arith.constant 0 : i32
    %c0_i32_1 = arith.constant 0 : i32
    return %c0_i32, %c0_i32_0 : i32, i32
  }
  func.func @transform_12(%arg0: i32) -> (i32, i32) {
    %c0_i32 = arith.constant 0 : i32
    %c0_i32_0 = arith.constant 0 : i32
    %c0_i32_1 = arith.constant 0 : i32
    return %c0_i32, %c0_i32_0 : i32, i32
  }
  func.func @transform_13(%arg0: i32) -> (i32, i32) {
    %c0_i32 = arith.constant 0 : i32
    %c0_i32_0 = arith.constant 0 : i32
    %c0_i32_1 = arith.constant 0 : i32
    return %c0_i32, %c0_i32_0 : i32, i32
  }
  func.func @transform_14(%arg0: i32) -> (i32, i32) {
    %c0_i32 = arith.constant 0 : i32
    %c0_i32_0 = arith.constant 0 : i32
    %c0_i32_1 = arith.constant 0 : i32
    return %c0_i32, %c0_i32_0 : i32, i32
  }
  func.func @transform_15(%arg0: i32) -> (i32, i32) {
    %c0_i32 = arith.constant 0 : i32
    %c0_i32_0 = arith.constant 0 : i32
    %c0_i32_1 = arith.constant 0 : i32
    return %c0_i32, %c0_i32_0 : i32, i32
  }
  func.func @transform_16(%arg0: i32) -> (i32, i32) {
    %c0_i32 = arith.constant 0 : i32
    %c0_i32_0 = arith.constant 0 : i32
    %c0_i32_1 = arith.constant 0 : i32
    return %c0_i32, %c0_i32_0 : i32, i32
  }
  func.func @transform_17(%arg0: i32) -> (i32, i32) {
    %c0_i32 = arith.constant 0 : i32
    %c0_i32_0 = arith.constant 0 : i32
    %c0_i32_1 = arith.constant 0 : i32
    return %c0_i32, %c0_i32_0 : i32, i32
  }
  func.func @transform_18(%arg0: i32) -> (i32, i32) {
    %c0_i32 = arith.constant 0 : i32
    %c0_i32_0 = arith.constant 0 : i32
    %c0_i32_1 = arith.constant 0 : i32
    return %c0_i32, %c0_i32_0 : i32, i32
  }
  func.func @transform_19(%arg0: i32) -> (i32, i32) {
    %c0_i32 = arith.constant 0 : i32
    %c0_i32_0 = arith.constant 0 : i32
    %c0_i32_1 = arith.constant 0 : i32
    return %c0_i32, %c0_i32_0 : i32, i32
  }
  func.func @transform_20(%arg0: i32) -> (i32, i32) {
    %c0_i32 = arith.constant 0 : i32
    %c0_i32_0 = arith.constant 0 : i32
    %c0_i32_1 = arith.constant 0 : i32
    return %c0_i32, %c0_i32_0 : i32, i32
  }
  func.func @transform_21(%arg0: i32) -> (i32, i32) {
    %c0_i32 = arith.constant 0 : i32
    %c0_i32_0 = arith.constant 0 : i32
    %c0_i32_1 = arith.constant 0 : i32
    return %c0_i32, %c0_i32_0 : i32, i32
  }
  func.func @transform_22(%arg0: i32) -> (i32, i32) {
    %c0_i32 = arith.constant 0 : i32
    %c0_i32_0 = arith.constant 0 : i32
    %c0_i32_1 = arith.constant 0 : i32
    return %c0_i32, %c0_i32_0 : i32, i32
  }
  func.func @transform_23(%arg0: i32) -> (i32, i32) {
    %c0_i32 = arith.constant 0 : i32
    %c0_i32_0 = arith.constant 0 : i32
    %c0_i32_1 = arith.constant 0 : i32
    return %c0_i32, %c0_i32_0 : i32, i32
  }
  func.func @transform_24(%arg0: i32) -> (i32, i32) {
    %c0_i32 = arith.constant 0 : i32
    %c0_i32_0 = arith.constant 0 : i32
    %c0_i32_1 = arith.constant 0 : i32
    return %c0_i32, %c0_i32_0 : i32, i32
  }
  func.func @transform_25(%arg0: i32) -> (i32, i32) {
    %c0_i32 = arith.constant 0 : i32
    %c0_i32_0 = arith.constant 0 : i32
    %c0_i32_1 = arith.constant 0 : i32
    return %c0_i32, %c0_i32_0 : i32, i32
  }
  func.func @transform_26(%arg0: i32) -> (i32, i32, i32) {
    %c0_i32 = arith.constant 0 : i32
    %c0_i32_0 = arith.constant 0 : i32
    %c0_i32_1 = arith.constant 0 : i32
    return %arg0, %c0_i32, %c0_i32_0 : i32, i32, i32
  }
}

</mosaic_0001>

<bundles_post_ra>
// kernel: gqa_model_gcn_forward.7
= control target key start
LH: loop header
LB: loop body
LE: loop exit
PB: predicated region body
PF: predicated region fallthrough
CT: control target
= control target key end

     0   :  { %vm18_vm0 = vcmask 261120   ;;  %s118_s0 = inlined_call_operand.vmem [shape: f32[16,32], index: 0, kind: input, shape index: {}]   ;;  %s119_s1 = inlined_call_operand.vmem [shape: f32[1,32], index: 1, kind: input, shape index: {}]   ;;  %s120_s2 = inlined_call_operand.vmem [shape: f32[1,32], index: 2, kind: input, shape index: {}]   ;;  %s121_s3 = inlined_call_operand.vmem [shape: f32[16,32], index: 3, kind: output, shape index: {}]  }
   0x1   :  { %v14_v0 = vld [vmem:[%s118_s0] sm:$0xff]  ;;  %v15_v1 = vld [vmem:[%s118_s0 + $0x8] sm:$0xff] }
   0x2   :  { %v19_v2 = vsel %vm18_vm0, %v14_v0, 0.0  ;;  %v22_v3 = vsel %vm18_vm0, %v15_v1, 0.0  ;;  %v68_v21 = vld [vmem:[%s119_s1] ss:$0 sm:$0xff] }
   0x3   :  { %20 = vadd.xlane.f32.xlu0 %v19_v2  ;;  %v69_v23 = vld [vmem:[%s120_s2] ss:$0 sm:$0xff] }
   0x7   :  { %23 = vadd.xlane.f32.xlu0 %v22_v3 }
  0x8c   :  { %v21_v4 = vpop.xlane.xlu0 %20 }
  0x8d   :  { %v26_v5 = vmul.f32 0.03125, %v21_v4 }
  0x8f   :  { %v28_v6 = vsub.f32 %v14_v0, %v26_v5 }
  0x90   :  { %v24_v7 = vpop.xlane.xlu0 %23 }
  0x91   :  { %v27_v8 = vmul.f32 0.03125, %v24_v7  ;;  %v30_v9 = vmul.f32 %v28_v6, %v28_v6 }
  0x93   :  { %v29_v10 = vsub.f32 %v15_v1, %v27_v8  ;;  %v32_v11 = vsel %vm18_vm0, %v30_v9, 0.0 }
  0x94   :  { %33 = vadd.xlane.f32.xlu1 %v32_v11 }
  0x95   :  { %v31_v12 = vmul.f32 %v29_v10, %v29_v10 }
  0x97   :  { %v35_v13 = vsel %vm18_vm0, %v31_v12, 0.0 }
  0x98   :  { %36 = vadd.xlane.f32.xlu1 %v35_v13 }
 0x11d   :  { %v34_v14 = vpop.xlane.xlu1 %33 }
 0x11e   :  { %v38_v15 = vmul.f32 0.03125, %v34_v14 }
 0x120   :  { %v40_v16 = vadd.f32 1e-12, %v38_v15 }
 0x121   :  { %v37_v17 = vpop.xlane.xlu1 %36 }
 0x122   :  { %70 = vrsqrt.f32 %v40_v16  ;;  %v39_v18 = vmul.f32 0.03125, %v37_v17 }
 0x124   :  { %v41_v19 = vadd.f32 1e-12, %v39_v18 }
 0x126   :  { %72 = vrsqrt.f32 %v41_v19 }
 0x12f   :  { %v71_v20 = vpop.eup %70 }
 0x130   :  { %v44_v22 = vmul.f32 %v71_v20, %v28_v6 }
 0x132   :  { %v52_v24 = vmul.f32 %v68_v21, %v44_v22 }
 0x133   :  { %v73_v25 = vpop.eup %72 }
 0x134   :  { %v60_v26 = vadd.f32 %v69_v23, %v52_v24  ;;  %v45_v27 = vmul.f32 %v73_v25, %v29_v10 }
 0x136   :  { %62 = vst.msk [vmem:[%s121_s3] sm:$0xff] %vm18_vm0, %v60_v26  ;;  %v53_v28 = vmul.f32 %v68_v21, %v45_v27 }
 0x138   :  { %v61_v29 = vadd.f32 %v69_v23, %v53_v28 }
 0x13a   :  { %63 = vst.msk [vmem:[%s121_s3 + $0x8] sm:$0xff] %vm18_vm0, %v61_v29 }

// kernel: gqa_model_gcn_forward.8
= control target key start
LH: loop header
LB: loop body
LE: loop exit
PB: predicated region body
PF: predicated region fallthrough
CT: control target
= control target key end

     0   :  { %vm197_vm0 = vcmask 1043456   ;;  %vm190_vm1 = vcmask 31744   ;;  %vm54_vm2 = vcmask 523264   ;;  %vm138_vm3 = vcmask 261120   ;;  %s516_s2 = inlined_call_operand.vmem [shape: f32[64,32], index: 2, kind: input, shape index: {}]   ;;  %s517_s6 = inlined_call_operand.vmem [shape: f32[4,32], index: 6, kind: input, shape index: {}]   ;;  %s518_s1 = inlined_call_operand.vmem [shape: f32[16,4], index: 1, kind: input, shape index: {}]   ;;  %s519_s0 = inlined_call_operand.vmem [shape: f32[16,64], index: 0, kind: input, shape index: {}]   ;;  %s520_s7 = inlined_call_operand.vmem [shape: f32[1,32], index: 7, kind: input, shape index: {}]   ;;  %s521_s3 = inlined_call_operand.vmem [shape: f32[1,32], index: 3, kind: input, shape index: {}]   ;;  %s522_s4 = inlined_call_operand.vmem [shape: f32[1,32], index: 4, kind: input, shape index: {}]   ;;  %s523_s8 = inlined_call_operand.vmem [shape: f32[1,32], index: 8, kind: input, shape index: {}]   ;;  %s524_s5 = inlined_call_operand.vmem [shape: f32[1,32], index: 5, kind: input, shape index: {}]   ;;  %s525_s9 = inlined_call_operand.vmem [shape: f32[1,32], index: 9, kind: input, shape index: {}]   ;;  %s526_s10 = inlined_call_operand.vmem [shape: f32[16,32], index: 10, kind: output, shape index: {}]  }
   0x1   :  { %v46_v0 = vld [vmem:[%s516_s2 + $0x38] sm:$0xff]  ;;  %v182_v1 = vld [vmem:[%s517_s6] sm:$0xf]  ;;  %v38_v3 = vld [vmem:[%s518_s1 + $0x8] sm:$0xff] }
   0x2   :  { %v37_v2 = vld [vmem:[%s518_s1] sm:$0xff]  ;;  %354 = vmatprep.subr.mxu0 %v46_v0  ;;  %373 = vmatprep.subr.msk.mxu1 %vm197_vm0, %v182_v1  ;;  %v45_v4 = vld [vmem:[%s516_s2 + $0x30] sm:$0xff]  ;;  %v44_v5 = vld [vmem:[%s516_s2 + $0x28] sm:$0xff] }
   0x3   :  { %355 = vmatpush3.msra.mxu0 %v46_v0  ;;  %374 = vmatpush3.msk.msra.mxu1 %vm197_vm0, %v182_v1  ;;  %v35_v6 = vld [vmem:[%s519_s0] sm:$0xff]  ;;  %v42_v8 = vld [vmem:[%s516_s2 + $0x18] sm:$0xff]  ;;  %v41_v9 = vld [vmem:[%s516_s2 + $0x10] sm:$0xff] }
   0x4   :  { %375 = vmatprep.mubr.msk.f32.mxu1 %vm190_vm1, %v37_v2  ;;  %356 = vmatprep.subr.mxu0 %v45_v4  ;;  %v43_v7 = vld [vmem:[%s516_s2 + $0x20] sm:$0xff]  ;;  %v40_v10 = vld [vmem:[%s516_s2 + $0x8] sm:$0xff] }
   0x5   :  { %376 = vmatmul.mubr.msk.f32.vlgmr.msra.gmra.mxu1 %vm190_vm1, %v38_v3  ;;  %357 = vmatpush3.msra.mxu0 %v45_v4  ;;  %v39_v11 = vld [vmem:[%s516_s2] sm:$0xff]  ;;  %v36_v12 = vld [vmem:[%s519_s0 + $0x8] sm:$0xff] }
   0x6   :  { %358 = vmatprep.subr.mxu0 %v44_v5  ;;  %370 = vmatprep.mubr.msk.f32.mxu0 %vm54_vm2, %v35_v6  ;;  %v335_v14 = vld [vmem:[%s520_s7] ss:$0 sm:$0xff] }
   0x7   :  { %359 = vmatpush3.msra.mxu0 %v44_v5  ;;  %v330_v21 = vld [vmem:[%s521_s3] ss:$0 sm:$0xff] }
   0x8   :  { %360 = vmatprep.subr.mxu0 %v43_v7  ;;  %v333_v61 = vld [vmem:[%s522_s4] ss:$0 sm:$0xff] }
   0x9   :  { %361 = vmatpush3.msra.mxu0 %v43_v7  ;;  %v339_v1 = vld [vmem:[%s523_s8] ss:$0 sm:$0xff] }
   0xa   :  { %362 = vmatprep.subr.mxu0 %v42_v8  ;;  %v334_v4 = vld [vmem:[%s524_s5] ss:$0 sm:$0xff] }
   0xb   :  { %363 = vmatpush3.msra.mxu0 %v42_v8  ;;  %v340_v5 = vld [vmem:[%s525_s9] ss:$0 sm:$0xff] }
   0xc   :  { %364 = vmatprep.subr.mxu0 %v41_v9 }
   0xd   :  { %365 = vmatpush3.msra.mxu0 %v41_v9 }
   0xe   :  { %366 = vmatprep.subr.mxu0 %v40_v10 }
   0xf   :  { %367 = vmatpush3.msra.mxu0 %v40_v10 }
  0x10   :  { %368 = vmatprep.subr.mxu0 %v39_v11 }
  0x11   :  { %369 = vmatpush3.msra.mxu0 %v39_v11 }
  0x12   :  { %371 = vmatmul.mubr.msk.f32.vlgmr.msra.gmra.mxu0 %vm54_vm2, %v36_v12 }
  0xc5   :  { %v377_v13 = vpop.f32.mrf.mxu1 }
  0xc6   :  { %v273_v16 = vadd.f32 %v377_v13, %v335_v14 }
  0xc7   :  { %v267_v15 = vpop.f32.mrf.mxu1 }
  0xc8   :  { %v268_v17 = vadd.f32 %v335_v14, %v267_v15  ;;  %v281_v19 = vsel %vm138_vm3, %v273_v16, 0.0 }
  0xca   :  { %v278_v18 = vsel %vm138_vm3, %v268_v17, 0.0 }
  0xcb   :  { %279 = vadd.xlane.f32.xlu1 %v278_v18 }
  0xcf   :  { %282 = vadd.xlane.f32.xlu1 %v281_v19 }
  0xd2   :  { %v372_v20 = vpop.f32.mrf.mxu0 }
  0xd3   :  { %v133_v24 = vadd.f32 %v372_v20, %v330_v21 }
  0xd4   :  { %v127_v22 = vpop.f32.mrf.mxu0 }
  0xd5   :  { %v128_v23 = vadd.f32 %v330_v21, %v127_v22  ;;  %v142_v26 = vsel %vm138_vm3, %v133_v24, 0.0 }
  0xd7   :  { %v139_v25 = vsel %vm138_vm3, %v128_v23, 0.0 }
  0xd8   :  { %140 = vadd.xlane.f32.xlu0 %v139_v25 }
  0xdc   :  { %143 = vadd.xlane.f32.xlu0 %v142_v26 }
 0x154   :  { %v280_v27 = vpop.xlane.xlu1 %279 }
 0x155   :  { %v284_v28 = vmul.f32 0.03125, %v280_v27 }
 0x157   :  { %v286_v32 = vsub.f32 %v268_v17, %v284_v28 }
 0x158   :  { %v283_v29 = vpop.xlane.xlu1 %282 }
 0x159   :  { %v285_v33 = vmul.f32 0.03125, %v283_v29  ;;  %v288_v41 = vmul.f32 %v286_v32, %v286_v32 }
 0x15b   :  { %v287_v38 = vsub.f32 %v273_v16, %v285_v33  ;;  %v290_v43 = vsel %vm138_vm3, %v288_v41, 0.0 }
 0x15d   :  { %v289_v45 = vmul.f32 %v287_v38, %v287_v38 }
 0x15f   :  { %v293_v46 = vsel %vm138_vm3, %v289_v45, 0.0 }
 0x161   :  { %v141_v30 = vpop.xlane.xlu0 %140 }
 0x162   :  { %v146_v31 = vmul.f32 0.03125, %v141_v30 }
 0x164   :  { %v148_v34 = vsub.f32 %v128_v23, %v146_v31 }
 0x165   :  { %v144_v35 = vpop.xlane.xlu0 %143 }
 0x166   :  { %v147_v36 = vmul.f32 0.03125, %v144_v35  ;;  %v150_v37 = vmul.f32 %v148_v34, %v148_v34 }
 0x168   :  { %v149_v39 = vsub.f32 %v133_v24, %v147_v36  ;;  %v152_v40 = vsel %vm138_vm3, %v150_v37, 0.0 }
 0x169   :  { %153 = vadd.xlane.f32.xlu0 %v152_v40 }
 0x16a   :  { %v151_v42 = vmul.f32 %v149_v39, %v149_v39 }
 0x16c   :  { %v155_v44 = vsel %vm138_vm3, %v151_v42, 0.0 }
 0x16d   :  { %291 = vadd.xlane.f32.xlu0 %v290_v43  ;;  %156 = vadd.xlane.f32.xlu1 %v155_v44 }
 0x171   :  { %294 = vadd.xlane.f32.xlu1 %v293_v46 }
 0x1f2   :  { %v154_v47 = vpop.xlane.xlu0 %153 }
 0x1f3   :  { %v158_v48 = vmul.f32 0.03125, %v154_v47 }
 0x1f5   :  { %v160_v49 = vadd.f32 1e-12, %v158_v48 }
 0x1f6   :  { %v157_v50 = vpop.xlane.xlu1 %156  ;;  %v292_v51 = vpop.xlane.xlu0 %291 }
 0x1f7   :  { %378 = vrsqrt.f32 %v160_v49  ;;  %v159_v52 = vmul.f32 0.03125, %v157_v50  ;;  %v296_v53 = vmul.f32 0.03125, %v292_v51 }
 0x1f9   :  { %v161_v54 = vadd.f32 1e-12, %v159_v52  ;;  %v298_v55 = vadd.f32 1e-12, %v296_v53 }
 0x1fa   :  { %v295_v56 = vpop.xlane.xlu1 %294 }
 0x1fb   :  { %380 = vrsqrt.f32 %v161_v54  ;;  %v297_v57 = vmul.f32 0.03125, %v295_v56 }
 0x1fc   :  { %382 = vrsqrt.f32 %v298_v55 }
 0x1fd   :  { %v299_v58 = vadd.f32 1e-12, %v297_v57 }
 0x1ff   :  { %384 = vrsqrt.f32 %v299_v58 }
 0x204   :  { %v379_v59 = vpop.eup %378 }
 0x205   :  { %v164_v60 = vmul.f32 %v379_v59, %v148_v34 }
 0x207   :  { %v172_v2 = vmul.f32 %v333_v61, %v164_v60 }
 0x208   :  { %v381_v62 = vpop.eup %380 }
 0x209   :  { %v383_v63 = vpop.eup %382  ;;  %v165_v0 = vmul.f32 %v381_v62, %v149_v39  ;;  %v180_v10 = vadd.f32 %v334_v4, %v172_v2 }
 0x20a   :  { %v302_v3 = vmul.f32 %v383_v63, %v286_v32 }
 0x20b   :  { %v173_v8 = vmul.f32 %v333_v61, %v165_v0 }
 0x20c   :  { %v385_v6 = vpop.eup %384  ;;  %v310_v7 = vmul.f32 %v339_v1, %v302_v3 }
 0x20d   :  { %v303_v9 = vmul.f32 %v385_v6, %v287_v38  ;;  %v181_v14 = vadd.f32 %v334_v4, %v173_v8 }
 0x20e   :  { %v318_v11 = vadd.f32 %v340_v5, %v310_v7 }
 0x20f   :  { %v311_v12 = vmul.f32 %v339_v1, %v303_v9 }
 0x210   :  { %v320_v13 = vadd.f32 %v318_v11, %v180_v10 }
 0x211   :  { %v319_v15 = vadd.f32 %v340_v5, %v311_v12 }
 0x212   :  { %v322_v16 = vmul.f32 0.5, %v320_v13 }
 0x213   :  { %v321_v17 = vadd.f32 %v319_v15, %v181_v14 }
 0x214   :  { %324 = vst.msk [vmem:[%s526_s10] sm:$0xff] %vm138_vm3, %v322_v16 }
 0x215   :  { %v323_v18 = vmul.f32 0.5, %v321_v17 }
 0x217   :  { %325 = vst.msk [vmem:[%s526_s10 + $0x8] sm:$0xff] %vm138_vm3, %v323_v18 }

// kernel: gqa_model_gcn_forward.9
= control target key start
LH: loop header
LB: loop body
LE: loop exit
PB: predicated region body
PF: predicated region fallthrough
CT: control target
= control target key end

     0   :  { %s2351_s21 = smov 0   ;;  %s2640_s0 = inlined_call_operand.vmem [shape: f32[2,8,32], index: 0, kind: input, shape index: {}]   ;;  %s2641_s1 = inlined_call_operand.vmem [shape: f32[2,1,8], index: 1, kind: input, shape index: {}]   ;;  %s2642_s2 = inlined_call_operand.vmem [shape: f32[32,32], index: 2, kind: input, shape index: {}]   ;;  %s2643_s3 = inlined_call_operand.vmem [shape: f32[1,32], index: 3, kind: input, shape index: {}]   ;;  %s2644_s4 = inlined_call_operand.vmem [shape: f32[32,64], index: 4, kind: input, shape index: {}]   ;;  %s2645_s5 = inlined_call_operand.vmem [shape: f32[1,64], index: 5, kind: input, shape index: {}]   ;;  %s2646_s6 = inlined_call_operand.vmem [shape: f32[32,32], index: 6, kind: input, shape index: {}]   ;;  %s2647_s7 = inlined_call_operand.vmem [shape: f32[1,32], index: 7, kind: input, shape index: {}]   ;;  %s2648_s8 = inlined_call_operand.vmem [shape: f32[1,32], index: 8, kind: input, shape index: {}]   ;;  %s2649_s9 = inlined_call_operand.vmem [shape: f32[1,32], index: 9, kind: input, shape index: {}]   ;;  %s2650_s10 = inlined_call_operand.vmem [shape: f32[32,128], index: 10, kind: input, shape index: {}]   ;;  %s2651_s11 = inlined_call_operand.vmem [shape: f32[1,128], index: 11, kind: input, shape index: {}]   ;;  %s2652_s12 = inlined_call_operand.vmem [shape: f32[128,32], index: 12, kind: input, shape index: {}]   ;;  %s2653_s13 = inlined_call_operand.vmem [shape: f32[1,32], index: 13, kind: input, shape index: {}]   ;;  %s2654_s14 = inlined_call_operand.vmem [shape: f32[1,32], index: 14, kind: input, shape index: {}]   ;;  %s2655_s15 = inlined_call_operand.vmem [shape: f32[1,32], index: 15, kind: input, shape index: {}]   ;;  %s2656_s16 = inlined_call_operand.vmem [shape: f32[2,8,32], index: 16, kind: output, shape index: {}]  }
   0x1   :  { %2657 = sst [smem:[#allocation2_spill]] %s2640_s0 }
   0x2 LB: > { %s1988_s22 = sadd.s32 4294967295, %s2255_s21   ;;  %p1992_p0 = scmp.ge.s32.totalorder %s2255_s21, 1  ;;  %s2255_s21 = sphi %s2351_s21, %s26_s21  }
   0x3   : > { %p469_p1 = scmp.lt.s32.totalorder %s2255_s21, 3 }
   0x5   : > { %p470_p2 = pnand %p1992_p0, %p469_p1 }
   0x6   : > { %p520_p3 = scmp.lt.s32.totalorder (!%p470_p2), %s1988_s22, 1  ;;  %s2658_s19 = sld [smem:[#allocation2_spill]] (!%p470_p2) }
   0x7   : > { %473 = sbr.rel (%p470_p2) target bundleno = 3897 (0xf39), region = 84  ;;  %s2259_s23 = smov (!%p470_p2), 96  }
   0x8   : > { %s2260_s24 = smov (!%p470_p2), 120   ;;  %s2261_s28 = smov (!%p470_p2), 88  }
   0x9   : > { %s2262_s30 = smov (!%p470_p2), 112   ;;  %s2265_s26 = smov (!%p470_p2), 72  }
   0xc   : > { %v536_v0 = vld [vmem:[%s2642_s2 + $0x18] sm:$0xff]  ;;  %v2257_v1 = vmov 0.0   ;;  %v535_v2 = vld [vmem:[%s2642_s2 + $0x10] sm:$0xff]  ;;  %vm2258_vm0 = vmmov 0   ;;  %s2660_s22 = smov (!%p520_p3, %s1988_s22), 1  ;;  %v534_v3 = vld [vmem:[%s2642_s2 + $0x8] sm:$0xff] }
   0xd   : > { %2082 = vmatprep.subr.mxu0 %v2257_v1  ;;  %2090 = vmatprep.mubr.msk.f32.mxu0 %vm2258_vm0, %v2257_v1  ;;  %s1993_s29 = sshll.u32 %s2660_s22, 3  ;;  %v533_v4 = vld [vmem:[%s2642_s2] sm:$0xff]  ;;  %vm556_vm1 = vcmask 261120   ;;  %v541_v6 = vld [vmem:[%s2644_s4 + $0x18] sm:$0xff]  ;;  %v540_v7 = vld [vmem:[%s2644_s4 + $0x10] sm:$0xff]  ;;  %vm706_vm2 = vcmask 64512   ;;  %s526_s27 = scalar_lea.vmem %s2641_s1, %s2660_s22 }
   0xe   : > { %2083 = vmatpush3.msra.mxu0 %v536_v0  ;;  %2119 = vmatprep.subr.mxu1 %v2257_v1  ;;  %s523_s20 = scalar_lea.vmem %s2658_s19, %s1993_s29  ;;  %v539_v8 = vld [vmem:[%s2644_s4 + $0x8] sm:$0xff]  ;;  %v538_v9 = vld [vmem:[%s2644_s4] sm:$0xff]  ;;  %s530_s25 = scalar_lea.vmem %s2656_s16, %s1993_s29 }
   0xf   : > { %2084 = vmatprep.subr.mxu0 %v2257_v1  ;;  %2121 = vmatprep.mubr.msk.f32.mxu1 %vm2258_vm0, %v2257_v1  ;;  %v2387_v5 = vld [vmem:[%s523_s20] sm:$0xff]  ;;  %v544_v48 = vld [vmem:[%s2646_s6 + $0x8] sm:$0xff]  ;;  %s2263_s20 = smov 80  }
  0x10   : > { %2085 = vmatpush3.msra.mxu0 %v535_v2  ;;  %v1997_v12 = vld [vmem:[%s2645_s5] ss:$0 sm:$0xff] }
  0x11   : > { %2086 = vmatprep.subr.mxu0 %v2257_v1  ;;  %v1995_v14 = vld [vmem:[%s2643_s3] ss:$0 sm:$0xff] }
  0x12   : > { %2087 = vmatpush3.msra.mxu0 %v534_v3  ;;  %v2439_v20 = vld [vmem:[%s526_s27] ss:$0 sm:$0xff] }
  0x13   : > { %2088 = vmatprep.subr.mxu0 %v2257_v1  ;;  %v543_v52 = vld [vmem:[%s2646_s6] sm:$0xff] }
  0x14   : > { %2089 = vmatpush3.msra.mxu0 %v533_v4 }
  0x15   : > { %2091 = vmatmul.mubr.msk.f32.vlgmr.msra.gmra.mxu0 %vm556_vm1, %v2387_v5  ;;  %2093 = vmatprep.subr.mxu0 %v2257_v1 }
  0x16   : > { %2094 = vmatpush3.msra.mxu0 %v541_v6  ;;  %2101 = vmatprep.mubr.msk.f32.mxu0 %vm2258_vm0, %v2257_v1 }
  0x17   : > { %2095 = vmatprep.subr.mxu0 %v2257_v1 }
  0x18   : > { %2096 = vmatpush3.msra.mxu0 %v540_v7 }
  0x19   : > { %2097 = vmatprep.subr.mxu0 %v2257_v1 }
  0x1a   : > { %2098 = vmatpush3.msra.mxu0 %v539_v8 }
  0x1b   : > { %2099 = vmatprep.subr.mxu0 %v2257_v1 }
  0x1c   : > { %2100 = vmatpush3.msra.mxu0 %v538_v9 }
  0x1d   : > { %2102 = vmatmul.mubr.msk.f32.vlgmr.msra.gmra.mxu0 %vm556_vm1, %v2387_v5  ;;  %2104 = vmatprep.subr.mxu0 %v2257_v1 }
  0x1e   : > { %2106 = vmatprep.mubr.msk.f32.mxu0 %vm2258_vm0, %v2257_v1 }
  0xd5   : > { %v626_v10 = vpop.f32.mrf.mxu0 }
  0xd6   : > { %v2426_v17 = vadd.f32 %v1995_v14, %v626_v10 }
  0xd7   : > { %v2092_v11 = vpop.f32.mrf.mxu0 }
  0xdd   : > { %v702_v13 = vpop.f32.mrf.mxu0 }
  0xde   : > { %v2421_v15 = vadd.f32 %v1997_v12, %v702_v13 }
  0xdf   : > { %v2103_v16 = vpop.f32.mrf.mxu0 }
  0xe0   : > { %802 = vrot.lane.b32.xlu1 %v2421_v15, %s2259_s23  ;;  %2105 = vmatpush3.xpose.msk.msra.mxu0 %vm706_vm2, %v2421_v15  ;;  %s2264_s23 = smov 104   ;;  %v545_v16 = vld [vmem:[%s2646_s6 + $0x10] sm:$0xff] }
  0xe1   : > { %2109 = vmatprep.subr.mxu0 %v2257_v1 }
  0xe3   : > { %2107 = vmatmul.mubr.msk.f32.vlgmr.msra.gmra.mxu0 %vm706_vm2, %v2426_v17 }
  0xe4   : > { %880 = vrot.lane.b32.xlu1 %v2421_v15, %s2260_s24  ;;  %2111 = vmatprep.mubr.msk.f32.mxu0 %vm2258_vm0, %v2257_v1 }
 0x152   : > { %v803_v18 = vpop.permute.xlu1 %802 }
 0x153   : > { %2110 = vmatpush3.msra.mxu0 %v803_v18 }
 0x154   : > { %2114 = vmatprep.subr.mxu0 %v2257_v1 }
 0x156   : > { %v881_v33 = vpop.permute.xlu1 %880 }
 0x1a3   : > { %v779_v19 = vpop.f32.mrf.mxu0 }
 0x1a4   : > { %v783_v21 = vmul.f32 0.35355338, %v779_v19 }
 0x1a5   : > { %v2108_v22 = vpop.f32.mrf.mxu0 }
 0x1a6   : > { %v790_v23 = vadd.f32 %v2439_v20, %v783_v21 }
 0x1a8   : > { %v791_v24 = vsel %vm706_vm2, %v790_v23, -inf }
 0x1a9   : > { %792 = vmax.xlane.f32.xlu0 %v791_v24 }
 0x232   : > { %v793_v25 = vpop.xlane.xlu0 %792 }
 0x233   : > { %v794_v26 = vsub.f32 %v790_v23, %v793_v25 }
 0x235   : > { %v795_v27 = vmul.f32 1.442695, %v794_v26 }
 0x237   : > { %2227 = vpow2.f32 %v795_v27 }
 0x244   : > { %v2228_v28 = vpop.eup %2227 }
 0x245   : > { %v797_v29 = vsel %vm706_vm2, %v2228_v28, 0.0 }
 0x246   : > { %798 = vadd.xlane.f32.xlu0 %v797_v29 }
 0x25c   : > { %878 = vrot.lane.b32.xlu0 %v2426_v17, %s2260_s24 }
 0x2cf   : > { %v799_v30 = vpop.xlane.xlu0 %798 }
 0x2d0   : > { %2229 = vrcp.f32 %v799_v30 }
 0x2d3   : > { %v879_v34 = vpop.permute.xlu0 %878 }
 0x2dd   : > { %v2230_v31 = vpop.eup %2229 }
 0x2de   : > { %v801_v32 = vmul.f32 %v2230_v31, %v2228_v28 }
 0x2e0   : > { %2112 = vmatmul.mubr.msk.f32.vlgmr.msra.gmra.mxu0 %vm706_vm2, %v801_v32  ;;  %v546_v32 = vld [vmem:[%s2646_s6 + $0x18] sm:$0xff] }
 0x2e1   : > { %2115 = vmatpush3.xpose.msk.msra.mxu0 %vm706_vm2, %v881_v33  ;;  %2116 = vmatprep.mubr.msk.f32.mxu0 %vm2258_vm0, %v2257_v1 }
 0x2e2   : > { %2124 = vmatprep.subr.mxu0 %v2257_v1 }
 0x2e4   : > { %2117 = vmatmul.mubr.msk.f32.vlgmr.msra.gmra.mxu0 %vm706_vm2, %v879_v34 }
 0x2e5   : > { %2126 = vmatprep.mubr.msk.f32.mxu0 %vm2258_vm0, %v2257_v1  ;;  %2125 = vmatpush3.msra.mxu0 %v544_v48 }
 0x2e6   : > { %2134 = vmatprep.subr.mxu0 %v2257_v1 }
 0x3a0   : > { %v874_v35 = vpop.f32.mrf.mxu0 }
 0x3a2   : > { %v2113_v36 = vpop.f32.mrf.mxu0 }
 0x3a4   : > { %v952_v37 = vpop.f32.mrf.mxu0 }
 0x3a5   : > { %v956_v38 = vmul.f32 0.35355338, %v952_v37 }
 0x3a6   : > { %v2118_v39 = vpop.f32.mrf.mxu0 }
 0x3a7   : > { %v957_v40 = vadd.f32 %v2439_v20, %v956_v38  ;;  %v2016_v39 = vld [vmem:[%s2647_s7] ss:$0 sm:$0xff] }
 0x3a9   : > { %v958_v41 = vsel %vm706_vm2, %v957_v40, -inf }
 0x3aa   : > { %959 = vmax.xlane.f32.xlu1 %v958_v41 }
 0x3bb   : > { %969 = vrot.lane.b32.xlu1 %v2421_v15, %s2261_s28 }
 0x3bf   : > { %1191 = vrot.lane.b32.xlu1 %v2426_v17, %s2262_s30 }
 0x433   : > { %v960_v42 = vpop.xlane.xlu1 %959 }
 0x434   : > { %v961_v43 = vsub.f32 %v957_v40, %v960_v42 }
 0x436   : > { %v962_v44 = vmul.f32 1.442695, %v961_v43 }
 0x437   : > { %v970_v45 = vpop.permute.xlu1 %969 }
 0x438   : > { %2231 = vpow2.f32 %v962_v44  ;;  %2120 = vmatpush3.msra.mxu1 %v970_v45 }
 0x439   : > { %2129 = vmatprep.subr.mxu1 %v2257_v1 }
 0x43b   : > { %v1192_v56 = vpop.permute.xlu1 %1191 }
 0x445   : > { %v2232_v46 = vpop.eup %2231 }
 0x446   : > { %v964_v47 = vsel %vm706_vm2, %v2232_v46, 0.0 }
 0x447   : > { %965 = vadd.xlane.f32.xlu0 %v964_v47 }
 0x45d   : > { %1193 = vrot.lane.b32.xlu0 %v2421_v15, %s2262_s30 }
 0x4d0   : > { %v966_v49 = vpop.xlane.xlu0 %965 }
 0x4d1   : > { %2233 = vrcp.f32 %v966_v49 }
 0x4d4   : > { %v1194_v54 = vpop.permute.xlu0 %1193 }
 0x4de   : > { %v2234_v50 = vpop.eup %2233 }
 0x4df   : > { %v968_v51 = vmul.f32 %v2234_v50, %v2232_v46 }
 0x4e1   : > { %2122 = vmatmul.mubr.msk.f32.vlgmr.msra.gmra.mxu1 %vm706_vm2, %v968_v51  ;;  %v1712_v51 = vld [vmem:[%s2650_s10 + $0x18] sm:$0xff] }
 0x4e2   : > { %2130 = vmatpush3.msra.mxu1 %v543_v52  ;;  %2131 = vmatprep.mubr.msk.f32.mxu1 %vm2258_vm0, %v2257_v1  ;;  %v1711_v52 = vld [vmem:[%s2650_s10 + $0x10] sm:$0xff] }
 0x4e3   : > { %2139 = vmatprep.subr.mxu1 %v2257_v1 }
 0x4e5   : > { %2132 = vmatmul.mubr.msk.f32.vlgmr.msra.gmra.mxu1 %vm706_vm2, %v874_v35 }
 0x4e6   : > { %2141 = vmatprep.mubr.msk.f32.mxu1 %vm2258_vm0, %v2257_v1 }
 0x5a1   : > { %v1041_v53 = vpop.f32.mrf.mxu1 }
 0x5a2   : > { %2127 = vmatmul.mubr.msk.f32.vlgmr.msra.gmra.mxu0 %vm706_vm2, %v1041_v53  ;;  %v1709_v53 = vld [vmem:[%s2650_s10] sm:$0xff] }
 0x5a3   : > { %2135 = vmatpush3.xpose.msk.msra.mxu0 %vm706_vm2, %v1194_v54  ;;  %v2123_v55 = vpop.f32.mrf.mxu1  ;;  %2136 = vmatprep.mubr.msk.f32.mxu0 %vm2258_vm0, %v2257_v1 }
 0x5a4   : > { %2144 = vmatprep.subr.mxu0 %v2257_v1 }
 0x5a5   : > { %v2479_v57 = vpop.f32.mrf.mxu1 }
 0x5a6   : > { %2137 = vmatmul.mubr.msk.f32.vlgmr.msra.gmra.mxu0 %vm706_vm2, %v1192_v56 }
 0x5a7   : > { %v2133_v58 = vpop.f32.mrf.mxu1  ;;  %2146 = vmatprep.mubr.msk.f32.mxu0 %vm2258_vm0, %v2257_v1  ;;  %2145 = vmatpush3.msra.mxu0 %v545_v16  ;;  %v1715_v16 = vld [vmem:[%s2652_s12 + $0x8] sm:$0xff] }
 0x5a8   : > { %2154 = vmatprep.subr.mxu0 %v2257_v1  ;;  %v2017_v58 = vld [vmem:[%s2648_s8] ss:$0 sm:$0xff] }
 0x662   : > { %v1114_v59 = vpop.f32.mrf.mxu0 }
 0x664   : > { %v2128_v60 = vpop.f32.mrf.mxu0 }
 0x665   : > { %v2018_v60 = vld [vmem:[%s2649_s9] ss:$0 sm:$0xff] }
 0x666   : > { %v1265_v61 = vpop.f32.mrf.mxu0 }
 0x667   : > { %v1269_v62 = vmul.f32 0.35355338, %v1265_v61 }
 0x668   : > { %v2138_v63 = vpop.f32.mrf.mxu0 }
 0x669   : > { %v1270_v0 = vadd.f32 %v2439_v20, %v1269_v62  ;;  %v1729_v63 = vld [vmem:[%s2652_s12 + $0x78] sm:$0xff] }
 0x66b   : > { %v1271_v2 = vsel %vm706_vm2, %v1270_v0, -inf }
 0x66c   : > { %1272 = vmax.xlane.f32.xlu1 %v1271_v2  ;;  %v1727_v2 = vld [vmem:[%s2652_s12 + $0x68] sm:$0xff] }
 0x67d   : > { %1282 = vrot.lane.b32.xlu1 %v2421_v15, %s2263_s20 }
 0x681   : > { %1432 = vrot.lane.b32.xlu1 %v2426_v17, %s2264_s23 }
 0x6f5   : > { %v1273_v3 = vpop.xlane.xlu1 %1272 }
 0x6f6   : > { %v1274_v4 = vsub.f32 %v1270_v0, %v1273_v3  ;;  %v1728_v0 = vld [vmem:[%s2652_s12 + $0x70] sm:$0xff]  ;;  %v1726_v3 = vld [vmem:[%s2652_s12 + $0x60] sm:$0xff] }
 0x6f8   : > { %v1275_v6 = vmul.f32 1.442695, %v1274_v4  ;;  %v1725_v4 = vld [vmem:[%s2652_s12 + $0x58] sm:$0xff] }
 0x6f9   : > { %v1283_v7 = vpop.permute.xlu1 %1282 }
 0x6fa   : > { %2235 = vpow2.f32 %v1275_v6  ;;  %2140 = vmatpush3.msra.mxu1 %v1283_v7  ;;  %v1724_v6 = vld [vmem:[%s2652_s12 + $0x50] sm:$0xff]  ;;  %v1723_v7 = vld [vmem:[%s2652_s12 + $0x48] sm:$0xff] }
 0x6fb   : > { %2149 = vmatprep.subr.mxu1 %v2257_v1 }
 0x6fd   : > { %v1433_v14 = vpop.permute.xlu1 %1432 }
 0x707   : > { %v2236_v8 = vpop.eup %2235 }
 0x708   : > { %v1277_v9 = vsel %vm706_vm2, %v2236_v8, 0.0 }
 0x709   : > { %1278 = vadd.xlane.f32.xlu0 %v1277_v9  ;;  %v1721_v9 = vld [vmem:[%s2652_s12 + $0x38] sm:$0xff] }
 0x71f   : > { %1434 = vrot.lane.b32.xlu0 %v2421_v15, %s2264_s23 }
 0x792   : > { %v1279_v10 = vpop.xlane.xlu0 %1278 }
 0x793   : > { %2237 = vrcp.f32 %v1279_v10  ;;  %v1720_v10 = vld [vmem:[%s2652_s12 + $0x30] sm:$0xff] }
 0x796   : > { %v1435_v13 = vpop.permute.xlu0 %1434 }
 0x7a0   : > { %v2238_v11 = vpop.eup %2237 }
 0x7a1   : > { %v1281_v12 = vmul.f32 %v2238_v11, %v2236_v8  ;;  %v1722_v8 = vld [vmem:[%s2652_s12 + $0x40] sm:$0xff]  ;;  %v1719_v11 = vld [vmem:[%s2652_s12 + $0x28] sm:$0xff] }
 0x7a3   : > { %2142 = vmatmul.mubr.msk.f32.vlgmr.msra.gmra.mxu1 %vm706_vm2, %v1281_v12  ;;  %v1718_v12 = vld [vmem:[%s2652_s12 + $0x20] sm:$0xff] }
 0x7a4   : > { %2150 = vmatpush3.xpose.msk.msra.mxu1 %vm706_vm2, %v1435_v13  ;;  %2151 = vmatprep.mubr.msk.f32.mxu1 %vm2258_vm0, %v2257_v1  ;;  %v1717_v13 = vld [vmem:[%s2652_s12 + $0x18] sm:$0xff] }
 0x7a5   : > { %2159 = vmatprep.subr.mxu1 %v2257_v1 }
 0x7a7   : > { %2152 = vmatmul.mubr.msk.f32.vlgmr.msra.gmra.mxu1 %vm706_vm2, %v1433_v14  ;;  %v1716_v14 = vld [vmem:[%s2652_s12 + $0x10] sm:$0xff] }
 0x7a8   : > { %2161 = vmatprep.mubr.msk.f32.mxu1 %vm2258_vm0, %v2257_v1  ;;  %2160 = vmatpush3.msra.mxu1 %v546_v32 }
 0x7a9   : > { %2175 = vmatprep.subr.mxu1 %v2257_v1 }
 0x863   : > { %v1354_v17 = vpop.f32.mrf.mxu1 }
 0x864   : > { %2147 = vmatmul.mubr.msk.f32.vlgmr.msra.gmra.mxu0 %vm706_vm2, %v1354_v17  ;;  %v1714_v17 = vld [vmem:[%s2652_s12] sm:$0xff] }
 0x865   : > { %v2143_v18 = vpop.f32.mrf.mxu1  ;;  %2156 = vmatprep.mubr.msk.f32.mxu0 %vm2258_vm0, %v2257_v1 }
 0x866   : > { %v2019_v18 = vld [vmem:[%s2651_s11] ss:$0 sm:$0xff] }
 0x867   : > { %v1506_v19 = vpop.f32.mrf.mxu1 }
 0x868   : > { %v1510_v21 = vmul.f32 0.35355338, %v1506_v19 }
 0x869   : > { %v2153_v22 = vpop.f32.mrf.mxu1 }
 0x86a   : > { %v1511_v23 = vadd.f32 %v2439_v20, %v1510_v21  ;;  %v1188_v20 = vadd.f32 %v2479_v57, %v1114_v59 }
 0x86c   : > { %v1512_v24 = vsel %vm706_vm2, %v1511_v23, -inf }
 0x86d   : > { %1513 = vmax.xlane.f32.xlu1 %v1512_v24 }
 0x87e   : > { %1523 = vrot.lane.b32.xlu1 %v2421_v15, %s2265_s26 }
 0x8f6   : > { %v1514_v25 = vpop.xlane.xlu1 %1513 }
 0x8f7   : > { %v1515_v26 = vsub.f32 %v1511_v23, %v1514_v25 }
 0x8f9   : > { %v1516_v27 = vmul.f32 1.442695, %v1515_v26 }
 0x8fa   : > { %v1524_v28 = vpop.permute.xlu1 %1523 }
 0x8fb   : > { %2239 = vpow2.f32 %v1516_v27  ;;  %2155 = vmatpush3.msra.mxu0 %v1524_v28 }
 0x8fc   : > { %2164 = vmatprep.subr.mxu0 %v2257_v1 }
 0x908   : > { %v2240_v29 = vpop.eup %2239 }
 0x909   : > { %v1518_v30 = vsel %vm706_vm2, %v2240_v29, 0.0 }
 0x90a   : > { %1519 = vadd.xlane.f32.xlu0 %v1518_v30 }
 0x924   : > { %v1427_v31 = vpop.f32.mrf.mxu0 }
 0x925   : > { %v1431_v15 = vadd.f32 %v1427_v31, %v1188_v20 }
 0x926   : > { %v2148_v33 = vpop.f32.mrf.mxu0 }
 0x993   : > { %v1520_v34 = vpop.xlane.xlu0 %1519 }
 0x994   : > { %2241 = vrcp.f32 %v1520_v34 }
 0x9a1   : > { %v2242_v35 = vpop.eup %2241 }
 0x9a2   : > { %v1522_v36 = vmul.f32 %v2242_v35, %v2240_v29 }
 0x9a4   : > { %2157 = vmatmul.mubr.msk.f32.vlgmr.msra.gmra.mxu0 %vm706_vm2, %v1522_v36 }
 0x9a5   : > { %2172 = vmatprep.mubr.msk.f32.mxu0 %vm2258_vm0, %v2257_v1  ;;  %2165 = vmatpush3.msra.mxu0 %v1712_v51 }
 0x9a6   : > { %2166 = vmatprep.subr.mxu0 %v2257_v1 }
 0x9a7   : > { %2167 = vmatpush3.msra.mxu0 %v1711_v52 }
 0x9a8   : > { %2168 = vmatprep.subr.mxu0 %v2257_v1 }
 0xa64   : > { %v1595_v37 = vpop.f32.mrf.mxu0 }
 0xa65   : > { %2162 = vmatmul.mubr.msk.f32.vlgmr.msra.gmra.mxu1 %vm706_vm2, %v1595_v37 }
 0xa66   : > { %v2158_v38 = vpop.f32.mrf.mxu0  ;;  %2207 = vmatprep.mubr.msk.f32.mxu1 %vm2258_vm0, %v2257_v1  ;;  %2176 = vmatpush3.msra.mxu1 %v1729_v63 }
 0xa67   : > { %2177 = vmatprep.subr.mxu1 %v2257_v1 }
 0xa68   : > { %2178 = vmatpush3.msra.mxu1 %v1728_v0 }
 0xa69   : > { %2179 = vmatprep.subr.mxu1 %v2257_v1 }
 0xa6a   : > { %2180 = vmatpush3.msra.mxu1 %v1727_v2 }
 0xa6b   : > { %2181 = vmatprep.subr.mxu1 %v2257_v1 }
 0xa6c   : > { %2182 = vmatpush3.msra.mxu1 %v1726_v3 }
 0xa6d   : > { %2183 = vmatprep.subr.mxu1 %v2257_v1 }
 0xa6e   : > { %2184 = vmatpush3.msra.mxu1 %v1725_v4 }
 0xa6f   : > { %2185 = vmatprep.subr.mxu1 %v2257_v1 }
 0xa70   : > { %2186 = vmatpush3.msra.mxu1 %v1724_v6 }
 0xa71   : > { %2187 = vmatprep.subr.mxu1 %v2257_v1 }
 0xa72   : > { %2188 = vmatpush3.msra.mxu1 %v1723_v7 }
 0xa73   : > { %2189 = vmatprep.subr.mxu1 %v2257_v1 }
 0xa74   : > { %2190 = vmatpush3.msra.mxu1 %v1722_v8 }
 0xa75   : > { %2191 = vmatprep.subr.mxu1 %v2257_v1 }
 0xa76   : > { %2192 = vmatpush3.msra.mxu1 %v1721_v9 }
 0xa77   : > { %2193 = vmatprep.subr.mxu1 %v2257_v1 }
 0xa78   : > { %2194 = vmatpush3.msra.mxu1 %v1720_v10 }
 0xa79   : > { %2195 = vmatprep.subr.mxu1 %v2257_v1 }
 0xa7a   : > { %2196 = vmatpush3.msra.mxu1 %v1719_v11 }
 0xa7b   : > { %2197 = vmatprep.subr.mxu1 %v2257_v1 }
 0xa7c   : > { %2198 = vmatpush3.msra.mxu1 %v1718_v12 }
 0xa7d   : > { %2199 = vmatprep.subr.mxu1 %v2257_v1 }
 0xa7e   : > { %2200 = vmatpush3.msra.mxu1 %v1717_v13 }
 0xa7f   : > { %2201 = vmatprep.subr.mxu1 %v2257_v1 }
 0xa80   : > { %2202 = vmatpush3.msra.mxu1 %v1716_v14 }
 0xa81   : > { %2203 = vmatprep.subr.mxu1 %v2257_v1 }
 0xa82   : > { %2204 = vmatpush3.msra.mxu1 %v1715_v16 }
 0xa83   : > { %2205 = vmatprep.subr.mxu1 %v2257_v1 }
 0xa84   : > { %2206 = vmatpush3.msra.mxu1 %v1714_v17 }
 0xb25   : > { %v1668_v40 = vpop.f32.mrf.mxu1 }
 0xb26   : > { %v1672_v41 = vadd.f32 %v1668_v40, %v1431_v15 }
 0xb27   : > { %v2163_v42 = vpop.f32.mrf.mxu1 }
 0xb28   : > { %v1679_v43 = vadd.f32 %v2016_v39, %v1672_v41 }
 0xb2a   : > { %v1680_v44 = vadd.f32 %v1679_v43, %v2387_v5  ;;  %v1710_v5 = vld [vmem:[%s2650_s10 + $0x8] sm:$0xff] }
 0xb2b   : > { %2169 = vmatpush3.msra.mxu0 %v1710_v5 }
 0xb2c   : > { %v1681_v45 = vsel %vm556_vm1, %v1680_v44, 0.0  ;;  %2170 = vmatprep.subr.mxu0 %v2257_v1  ;;  %v2021_v1 = vld [vmem:[%s2653_s13] ss:$0 sm:$0xff] }
 0xb2d   : > { %1682 = vadd.xlane.f32.xlu0 %v1681_v45  ;;  %2171 = vmatpush3.msra.mxu0 %v1709_v53 }
 0xbb6   : > { %v1683_v46 = vpop.xlane.xlu0 %1682 }
 0xbb7   : > { %v1685_v47 = vmul.f32 0.03125, %v1683_v46  ;;  %v2023_v46 = vld [vmem:[%s2655_s15] ss:$0 sm:$0xff] }
 0xbb9   : > { %v1686_v48 = vsub.f32 %v1680_v44, %v1685_v47  ;;  %v2022_v44 = vld [vmem:[%s2654_s14] ss:$0 sm:$0xff] }
 0xbbb   : > { %v1687_v49 = vmul.f32 %v1686_v48, %v1686_v48 }
 0xbbd   : > { %v1688_v50 = vsel %vm556_vm1, %v1687_v49, 0.0 }
 0xbbe   : > { %1689 = vadd.xlane.f32.xlu0 %v1688_v50 }
 0xc47   : > { %v1690_v54 = vpop.xlane.xlu0 %1689 }
 0xc48   : > { %v1691_v55 = vmul.f32 0.03125, %v1690_v54 }
 0xc4a   : > { %v1692_v56 = vadd.f32 1e-12, %v1691_v55 }
 0xc4c   : > { %2243 = vrsqrt.f32 %v1692_v56 }
 0xc59   : > { %v2244_v57 = vpop.eup %2243 }
 0xc5a   : > { %v1694_v59 = vmul.f32 %v2244_v57, %v1686_v48 }
 0xc5c   : > { %v1701_v61 = vmul.f32 %v2017_v58, %v1694_v59 }
 0xc5e   : > { %v2549_v62 = vadd.f32 %v2018_v60, %v1701_v61 }
 0xc60   : > { %2173 = vmatmul.mubr.msk.f32.vlgmr.msra.gmra.mxu0 %vm556_vm1, %v2549_v62 }
 0xd20   : > { %v1808_v19 = vpop.f32.mrf.mxu0 }
 0xd21   : > { %v1809_v21 = vadd.f32 %v2019_v18, %v1808_v19 }
 0xd22   : > { %v2174_v22 = vpop.f32.mrf.mxu0 }
 0xd23   : > { %v1813_v23 = vmul.f32 0.044715, %v1809_v21  ;;  %v1812_v29 = vmul.f32 0.5, %v1809_v21 }
 0xd25   : > { %v1814_v24 = vmul.f32 %v1813_v23, %v1809_v21 }
 0xd27   : > { %v1815_v25 = vmul.f32 %v1814_v24, %v1809_v21 }
 0xd29   : > { %v1816_v26 = vadd.f32 %v1815_v25, %v1809_v21 }
 0xd2b   : > { %v1817_v27 = vmul.f32 0.7978846, %v1816_v26 }
 0xd2d   : > { %2245 = vtanh.f32 %v1817_v27 }
 0xd3a   : > { %v2246_v28 = vpop.eup %2245 }
 0xd3b   : > { %v1819_v30 = vadd.f32 1.0, %v2246_v28 }
 0xd3d   : > { %v1820_v20 = vmul.f32 %v1819_v30, %v1812_v29 }
 0xd3f   : > { %2208 = vmatmul.mubr.f32.vlgmr.msra.gmra.mxu1 %v1820_v20 }
 0xdff   : > { %v1893_v31 = vpop.f32.mrf.mxu1 }
 0xe00   : > { %v1894_v32 = vadd.f32 %v2021_v1, %v1893_v31 }
 0xe01   : > { %v2209_v15 = vpop.f32.mrf.mxu1 }
 0xe02   : > { %v1897_v33 = vadd.f32 %v1894_v32, %v2549_v62 }
 0xe04   : > { %v1898_v34 = vsel %vm556_vm1, %v1897_v33, 0.0 }
 0xe05   : > { %1899 = vadd.xlane.f32.xlu0 %v1898_v34 }
 0xe8e   : > { %v1900_v35 = vpop.xlane.xlu0 %1899 }
 0xe8f   : > { %v1901_v36 = vmul.f32 0.03125, %v1900_v35 }
 0xe91   : > { %v1902_v37 = vsub.f32 %v1897_v33, %v1901_v36 }
 0xe93   : > { %v1903_v38 = vmul.f32 %v1902_v37, %v1902_v37 }
 0xe95   : > { %v1904_v39 = vsel %vm556_vm1, %v1903_v38, 0.0 }
 0xe96   : > { %1905 = vadd.xlane.f32.xlu1 %v1904_v39 }
 0xf1f   : > { %v1906_v40 = vpop.xlane.xlu1 %1905 }
 0xf20   : > { %v1907_v41 = vmul.f32 0.03125, %v1906_v40 }
 0xf22   : > { %v1908_v42 = vadd.f32 1e-12, %v1907_v41 }
 0xf24   : > { %2247 = vrsqrt.f32 %v1908_v42 }
 0xf31   : > { %v2248_v43 = vpop.eup %2247 }
 0xf32   : > { %v1910_v45 = vmul.f32 %v2248_v43, %v1902_v37 }
 0xf34   : > { %v1917_v47 = vmul.f32 %v2022_v44, %v1910_v45 }
 0xf36   : > { %v1924_v48 = vadd.f32 %v2023_v46, %v1917_v47 }
 0xf38   : > { %1925 = vst.msk [vmem:[%s530_s25] sm:$0xff] %vm556_vm1, %v1924_v48 }
 0xf39 PF: > { %s26_s21 = sadd.s32 1, %s2255_s21  }
 0xf3a   : > { %p23_p4 = scmp.ge.s32.totalorder %s26_s21, 4  }
 0xf3c   :  { %25 = sbr.rel (!%p23_p4) target bundleno = 2 (0x2), region = 117 }

// kernel: gqa_model_gcn_forward.12
= control target key start
LH: loop header
LB: loop body
LE: loop exit
PB: predicated region body
PF: predicated region fallthrough
CT: control target
= control target key end

     0   :  { %s4060_s27 = smov 0   ;;  %s4530_s0 = inlined_call_operand.vmem [shape: f32[2,8,32], index: 0, kind: input, shape index: {}]   ;;  %s4531_s1 = inlined_call_operand.vmem [shape: f32[2,8,32], index: 1, kind: input, shape index: {}]   ;;  %s4532_s2 = inlined_call_operand.vmem [shape: f32[2,1,8], index: 2, kind: input, shape index: {}]   ;;  %s4533_s3 = inlined_call_operand.vmem [shape: f32[2,1,8], index: 3, kind: input, shape index: {}]   ;;  %s4534_s4 = inlined_call_operand.vmem [shape: f32[32,32], index: 4, kind: input, shape index: {}]   ;;  %s4535_s5 = inlined_call_operand.vmem [shape: f32[1,32], index: 5, kind: input, shape index: {}]   ;;  %s4536_s6 = inlined_call_operand.vmem [shape: f32[32,64], index: 6, kind: input, shape index: {}]   ;;  %s4537_s7 = inlined_call_operand.vmem [shape: f32[1,64], index: 7, kind: input, shape index: {}]   ;;  %s4538_s8 = inlined_call_operand.vmem [shape: f32[32,32], index: 8, kind: input, shape index: {}]   ;;  %s4539_s9 = inlined_call_operand.vmem [shape: f32[1,32], index: 9, kind: input, shape index: {}]   ;;  %s4540_s10 = inlined_call_operand.vmem [shape: f32[1,32], index: 10, kind: input, shape index: {}]   ;;  %s4541_s11 = inlined_call_operand.vmem [shape: f32[1,32], index: 11, kind: input, shape index: {}]   ;;  %s4542_s12 = inlined_call_operand.vmem [shape: f32[32,32], index: 12, kind: input, shape index: {}]   ;;  %s4543_s13 = inlined_call_operand.vmem [shape: f32[1,32], index: 13, kind: input, shape index: {}]   ;;  %s4544_s14 = inlined_call_operand.vmem [shape: f32[32,64], index: 14, kind: input, shape index: {}]   ;;  %s4545_s15 = inlined_call_operand.vmem [shape: f32[1,64], index: 15, kind: input, shape index: {}]   ;;  %s4546_s16 = inlined_call_operand.vmem [shape: f32[32,32], index: 16, kind: input, shape index: {}]   ;;  %s4547_s17 = inlined_call_operand.vmem [shape: f32[1,32], index: 17, kind: input, shape index: {}]   ;;  %s4548_s18 = inlined_call_operand.vmem [shape: f32[1,32], index: 18, kind: input, shape index: {}]   ;;  %s4549_s19 = inlined_call_operand.vmem [shape: f32[1,32], index: 19, kind: input, shape index: {}]   ;;  %s4550_s20 = inlined_call_operand.vmem [shape: f32[32,128], index: 20, kind: input, shape index: {}]   ;;  %s4551_s21 = inlined_call_operand.vmem [shape: f32[1,128], index: 21, kind: input, shape index: {}]   ;;  %s4552_s22 = inlined_call_operand.vmem [shape: f32[128,32], index: 22, kind: input, shape index: {}]   ;;  %s4553_s23 = inlined_call_operand.vmem [shape: f32[1,32], index: 23, kind: input, shape index: {}]   ;;  %s4554_s24 = inlined_call_operand.vmem [shape: f32[1,32], index: 24, kind: input, shape index: {}]   ;;  %s4555_s25 = inlined_call_operand.vmem [shape: f32[1,32], index: 25, kind: input, shape index: {}]   ;;  %s4556_s26 = inlined_call_operand.vmem [shape: f32[2,8,32], index: 26, kind: output, shape index: {}]  }
   0x1   :  { %4568 = sst [smem:[#allocation2_spill]] %s4530_s0 }
   0x2   :  { %4569 = sst [smem:[#allocation3_spill]] %s4531_s1 }
   0x3   :  { %4570 = sst [smem:[#allocation4_spill]] %s4532_s2 }
   0x4   :  { %4571 = sst [smem:[#allocation5_spill]] %s4533_s3 }
   0x5   :  { %4572 = sst [smem:[#allocation6_spill]] %s4534_s4 }
   0x6   :  { %4573 = sst [smem:[#allocation7_spill]] %s4535_s5 }
   0x7   :  { %4574 = sst [smem:[#allocation8_spill]] %s4536_s6 }
   0x8   :  { %4575 = sst [smem:[#allocation9_spill]] %s4537_s7 }
   0x9   :  { %4576 = sst [smem:[#allocation10_spill]] %s4538_s8 }
   0xa   :  { %4577 = sst [smem:[#allocation11_spill]] %s4539_s9 }
   0xb   :  { %4578 = sst [smem:[#allocation12_spill]] %s4540_s10 }
   0xc LB: > { %s3488_s3 = sadd.s32 4294967295, %s3914_s27   ;;  %p3492_p0 = scmp.ge.s32.totalorder %s3914_s27, 1  ;;  %s3914_s27 = sphi %s4060_s27, %s36_s27  }
   0xd   : > { %p736_p1 = scmp.lt.s32.totalorder %s3914_s27, 3 }
   0xf   : > { %p737_p2 = pnand %p3492_p0, %p736_p1 }
  0x10   : > { %s4579_s8 = sld [smem:[#allocation6_spill]] (!%p737_p2)  ;;  %p814_p3 = scmp.lt.s32.totalorder (!%p737_p2), %s3488_s3, 1 }
  0x11   : > { %740 = sbr.rel (%p737_p2) target bundleno = 6648 (0x19f8), region = 124  ;;  %s4580_s1 = sld [smem:[#allocation2_spill]] (!%p737_p2) }
  0x12   : > { %s4581_s29 = sld [smem:[#allocation8_spill]] (!%p737_p2)  ;;  %s4564_s5 = smov (!%p737_p2), 112  }
  0x13   : > { %s4583_s2 = sld [smem:[#allocation9_spill]] (!%p737_p2)  ;;  %s4562_s10 = smov (!%p737_p2), 104  }
  0x14   : > { %s4584_s6 = sld [smem:[#allocation7_spill]] (!%p737_p2) }
  0x15   : > { %s4585_s0 = sld [smem:[#allocation4_spill]] (!%p737_p2) }
  0x16   : > { %v839_v0 = vld [vmem:[%s4579_s8 + $0x18] sm:$0xff]  ;;  %v3916_v1 = vmov 0.0   ;;  %v838_v2 = vld [vmem:[%s4579_s8 + $0x10] sm:$0xff]  ;;  %vm3917_vm0 = vmmov 0   ;;  %s4597_s3 = smov (!%p814_p3, %s3488_s3), 1  ;;  %v837_v3 = vld [vmem:[%s4579_s8 + $0x8] sm:$0xff] }
  0x17   : > { %3641 = vmatprep.subr.mxu0 %v3916_v1  ;;  %3649 = vmatprep.mubr.msk.f32.mxu0 %vm3917_vm0, %v3916_v1  ;;  %s4087_s30 = sshll.u32 %s4597_s3, 3  ;;  %v836_v4 = vld [vmem:[%s4579_s8] sm:$0xff]  ;;  %vm859_vm1 = vcmask 261120   ;;  %vm1012_vm2 = vcmask 64512   ;;  %s4586_s28 = sld [smem:[#allocation10_spill]] }
  0x18   : > { %3642 = vmatpush3.msra.mxu0 %v839_v0  ;;  %3678 = vmatprep.subr.mxu1 %v3916_v1  ;;  %s817_s7 = scalar_lea.vmem %s4580_s1, %s4087_s30  ;;  %v844_v6 = vld [vmem:[%s4581_s29 + $0x18] sm:$0xff]  ;;  %v843_v7 = vld [vmem:[%s4581_s29 + $0x10] sm:$0xff]  ;;  %v842_v8 = vld [vmem:[%s4581_s29 + $0x8] sm:$0xff]  ;;  %s4582_s1 = sld [smem:[#allocation3_spill]] }
  0x19   : > { %3643 = vmatprep.subr.mxu0 %v3916_v1  ;;  %3680 = vmatprep.mubr.msk.f32.mxu1 %vm3917_vm0, %v3916_v1  ;;  %v4097_v5 = vld [vmem:[%s817_s7] sm:$0xff] }
  0x1a   : > { %3644 = vmatpush3.msra.mxu0 %v838_v2  ;;  %v841_v9 = vld [vmem:[%s4581_s29] sm:$0xff] }
  0x1b   : > { %3645 = vmatprep.subr.mxu0 %v3916_v1  ;;  %v3498_v13 = vld [vmem:[%s4583_s2] ss:$0 sm:$0xff]  ;;  %s824_s9 = scalar_lea.vmem %s4585_s0, %s4597_s3  ;;  %s4567_s2 = smov 88  }
  0x1c   : > { %3646 = vmatpush3.msra.mxu0 %v837_v3  ;;  %v3496_v15 = vld [vmem:[%s4584_s6] ss:$0 sm:$0xff]  ;;  %s4560_s0 = smov 72  }
  0x1d   : > { %3647 = vmatprep.subr.mxu0 %v3916_v1  ;;  %v4154_v21 = vld [vmem:[%s824_s9] ss:$0 sm:$0xff]  ;;  %v847_v49 = vld [vmem:[%s4586_s28 + $0x8] sm:$0xff]  ;;  %s4561_s9 = smov 80  }
  0x1e   : > { %3648 = vmatpush3.msra.mxu0 %v836_v4  ;;  %s821_s7 = scalar_lea.vmem %s4582_s1, %s4087_s30  ;;  %s4566_s1 = smov 96   ;;  %v846_v53 = vld [vmem:[%s4586_s28] sm:$0xff] }
  0x1f   : > { %3650 = vmatmul.mubr.msk.f32.vlgmr.msra.gmra.mxu0 %vm859_vm1, %v4097_v5  ;;  %3652 = vmatprep.subr.mxu0 %v3916_v1  ;;  %v833_v10 = vld [vmem:[%s821_s7] sm:$0xff]  ;;  %s3919_s7 = smov 120  }
  0x20   : > { %3653 = vmatpush3.msra.mxu0 %v844_v6  ;;  %3660 = vmatprep.mubr.msk.f32.mxu0 %vm3917_vm0, %v3916_v1 }
  0x21   : > { %3654 = vmatprep.subr.mxu0 %v3916_v1 }
  0x22   : > { %3655 = vmatpush3.msra.mxu0 %v843_v7 }
  0x23   : > { %3656 = vmatprep.subr.mxu0 %v3916_v1 }
  0x24   : > { %3657 = vmatpush3.msra.mxu0 %v842_v8 }
  0x25   : > { %3658 = vmatprep.subr.mxu0 %v3916_v1 }
  0x26   : > { %3659 = vmatpush3.msra.mxu0 %v841_v9 }
  0x27   : > { %3661 = vmatmul.mubr.msk.f32.vlgmr.msra.gmra.mxu0 %vm859_vm1, %v833_v10  ;;  %3663 = vmatprep.subr.mxu0 %v3916_v1 }
  0x28   : > { %3665 = vmatprep.mubr.msk.f32.mxu0 %vm3917_vm0, %v3916_v1 }
  0xdf   : > { %v929_v11 = vpop.f32.mrf.mxu0 }
  0xe0   : > { %v4140_v18 = vadd.f32 %v3496_v15, %v929_v11 }
  0xe1   : > { %v3651_v12 = vpop.f32.mrf.mxu0 }
  0xe7   : > { %v1008_v14 = vpop.f32.mrf.mxu0 }
  0xe8   : > { %v4134_v16 = vadd.f32 %v3498_v13, %v1008_v14 }
  0xe9   : > { %v3662_v17 = vpop.f32.mrf.mxu0 }
  0xea   : > { %1108 = vrot.lane.b32.xlu1 %v4134_v16, %s4566_s1  ;;  %3664 = vmatpush3.xpose.msk.msra.mxu0 %vm1012_vm2, %v4134_v16  ;;  %v848_v17 = vld [vmem:[%s4586_s28 + $0x10] sm:$0xff]  ;;  %s4591_s1 = smov 96  }
  0xeb   : > { %3668 = vmatprep.subr.mxu0 %v3916_v1 }
  0xed   : > { %3666 = vmatmul.mubr.msk.f32.vlgmr.msra.gmra.mxu0 %vm1012_vm2, %v4140_v18 }
  0xee   : > { %1186 = vrot.lane.b32.xlu1 %v4134_v16, %s3919_s7  ;;  %3670 = vmatprep.mubr.msk.f32.mxu0 %vm3917_vm0, %v3916_v1 }
 0x15c   : > { %v1109_v19 = vpop.permute.xlu1 %1108 }
 0x15d   : > { %3669 = vmatpush3.msra.mxu0 %v1109_v19 }
 0x15e   : > { %3673 = vmatprep.subr.mxu0 %v3916_v1 }
 0x160   : > { %v1187_v34 = vpop.permute.xlu1 %1186 }
 0x1ad   : > { %v1085_v20 = vpop.f32.mrf.mxu0 }
 0x1ae   : > { %v1089_v22 = vmul.f32 0.35355338, %v1085_v20 }
 0x1af   : > { %v3667_v23 = vpop.f32.mrf.mxu0 }
 0x1b0   : > { %v1096_v24 = vadd.f32 %v4154_v21, %v1089_v22 }
 0x1b2   : > { %v1097_v25 = vsel %vm1012_vm2, %v1096_v24, -inf }
 0x1b3   : > { %1098 = vmax.xlane.f32.xlu0 %v1097_v25 }
 0x23c   : > { %v1099_v26 = vpop.xlane.xlu0 %1098 }
 0x23d   : > { %v1100_v27 = vsub.f32 %v1096_v24, %v1099_v26 }
 0x23f   : > { %v1101_v28 = vmul.f32 1.442695, %v1100_v27 }
 0x241   : > { %3868 = vpow2.f32 %v1101_v28 }
 0x24e   : > { %v3869_v29 = vpop.eup %3868 }
 0x24f   : > { %v1103_v30 = vsel %vm1012_vm2, %v3869_v29, 0.0 }
 0x250   : > { %1104 = vadd.xlane.f32.xlu0 %v1103_v30 }
 0x266   : > { %1184 = vrot.lane.b32.xlu0 %v4140_v18, %s3919_s7 }
 0x2d9   : > { %v1105_v31 = vpop.xlane.xlu0 %1104 }
 0x2da   : > { %3870 = vrcp.f32 %v1105_v31 }
 0x2dd   : > { %v1185_v35 = vpop.permute.xlu0 %1184 }
 0x2e7   : > { %v3871_v32 = vpop.eup %3870 }
 0x2e8   : > { %v1107_v33 = vmul.f32 %v3871_v32, %v3869_v29 }
 0x2ea   : > { %3671 = vmatmul.mubr.msk.f32.vlgmr.msra.gmra.mxu0 %vm1012_vm2, %v1107_v33  ;;  %v849_v33 = vld [vmem:[%s4586_s28 + $0x18] sm:$0xff] }
 0x2eb   : > { %3674 = vmatpush3.xpose.msk.msra.mxu0 %vm1012_vm2, %v1187_v34  ;;  %3675 = vmatprep.mubr.msk.f32.mxu0 %vm3917_vm0, %v3916_v1 }
 0x2ec   : > { %3683 = vmatprep.subr.mxu0 %v3916_v1 }
 0x2ee   : > { %3676 = vmatmul.mubr.msk.f32.vlgmr.msra.gmra.mxu0 %vm1012_vm2, %v1185_v35 }
 0x2ef   : > { %3685 = vmatprep.mubr.msk.f32.mxu0 %vm3917_vm0, %v3916_v1  ;;  %3684 = vmatpush3.msra.mxu0 %v847_v49 }
 0x2f0   : > { %3693 = vmatprep.subr.mxu0 %v3916_v1 }
 0x3aa   : > { %v1180_v36 = vpop.f32.mrf.mxu0 }
 0x3ac   : > { %v3672_v37 = vpop.f32.mrf.mxu0 }
 0x3ae   : > { %v1258_v38 = vpop.f32.mrf.mxu0 }
 0x3af   : > { %v1262_v39 = vmul.f32 0.35355338, %v1258_v38 }
 0x3b0   : > { %v3677_v40 = vpop.f32.mrf.mxu0 }
 0x3b1   : > { %v1263_v41 = vadd.f32 %v4154_v21, %v1262_v39 }
 0x3b3   : > { %v1264_v42 = vsel %vm1012_vm2, %v1263_v41, -inf }
 0x3b4   : > { %1265 = vmax.xlane.f32.xlu1 %v1264_v42 }
 0x3c5   : > { %1275 = vrot.lane.b32.xlu1 %v4134_v16, %s4567_s2  ;;  %s4592_s2 = smov 112  }
 0x3c9   : > { %1497 = vrot.lane.b32.xlu1 %v4140_v18, %s4564_s5 }
 0x43d   : > { %v1266_v43 = vpop.xlane.xlu1 %1265 }
 0x43e   : > { %v1267_v44 = vsub.f32 %v1263_v41, %v1266_v43 }
 0x440   : > { %v1268_v45 = vmul.f32 1.442695, %v1267_v44 }
 0x441   : > { %v1276_v46 = vpop.permute.xlu1 %1275 }
 0x442   : > { %3872 = vpow2.f32 %v1268_v45  ;;  %3679 = vmatpush3.msra.mxu1 %v1276_v46 }
 0x443   : > { %3688 = vmatprep.subr.mxu1 %v3916_v1 }
 0x445   : > { %v1498_v57 = vpop.permute.xlu1 %1497 }
 0x44f   : > { %v3873_v47 = vpop.eup %3872 }
 0x450   : > { %v1270_v48 = vsel %vm1012_vm2, %v3873_v47, 0.0 }
 0x451   : > { %1271 = vadd.xlane.f32.xlu0 %v1270_v48 }
 0x467   : > { %1499 = vrot.lane.b32.xlu0 %v4134_v16, %s4564_s5 }
 0x4da   : > { %v1272_v50 = vpop.xlane.xlu0 %1271 }
 0x4db   : > { %3874 = vrcp.f32 %v1272_v50 }
 0x4de   : > { %v1500_v55 = vpop.permute.xlu0 %1499 }
 0x4e8   : > { %v3875_v51 = vpop.eup %3874 }
 0x4e9   : > { %v1274_v52 = vmul.f32 %v3875_v51, %v3873_v47 }
 0x4eb   : > { %3681 = vmatmul.mubr.msk.f32.vlgmr.msra.gmra.mxu1 %vm1012_vm2, %v1274_v52  ;;  %v2018_v52 = vld [vmem:[%s4542_s12 + $0x18] sm:$0xff] }
 0x4ec   : > { %3689 = vmatpush3.msra.mxu1 %v846_v53  ;;  %3690 = vmatprep.mubr.msk.f32.mxu1 %vm3917_vm0, %v3916_v1  ;;  %v2023_v53 = vld [vmem:[%s4544_s14 + $0x18] sm:$0xff] }
 0x4ed   : > { %3698 = vmatprep.subr.mxu1 %v3916_v1 }
 0x4ef   : > { %3691 = vmatmul.mubr.msk.f32.vlgmr.msra.gmra.mxu1 %vm1012_vm2, %v1180_v36 }
 0x4f0   : > { %3700 = vmatprep.mubr.msk.f32.mxu1 %vm3917_vm0, %v3916_v1 }
 0x5ab   : > { %v1347_v54 = vpop.f32.mrf.mxu1 }
 0x5ac   : > { %3686 = vmatmul.mubr.msk.f32.vlgmr.msra.gmra.mxu0 %vm1012_vm2, %v1347_v54  ;;  %v2022_v54 = vld [vmem:[%s4544_s14 + $0x10] sm:$0xff] }
 0x5ad   : > { %3694 = vmatpush3.xpose.msk.msra.mxu0 %vm1012_vm2, %v1500_v55  ;;  %v3682_v56 = vpop.f32.mrf.mxu1  ;;  %3695 = vmatprep.mubr.msk.f32.mxu0 %vm3917_vm0, %v3916_v1  ;;  %v2016_v55 = vld [vmem:[%s4542_s12 + $0x8] sm:$0xff] }
 0x5ae   : > { %3703 = vmatprep.subr.mxu0 %v3916_v1  ;;  %v2021_v56 = vld [vmem:[%s4544_s14 + $0x8] sm:$0xff] }
 0x5af   : > { %v4198_v58 = vpop.f32.mrf.mxu1 }
 0x5b0   : > { %3696 = vmatmul.mubr.msk.f32.vlgmr.msra.gmra.mxu0 %vm1012_vm2, %v1498_v57  ;;  %v2015_v57 = vld [vmem:[%s4542_s12] sm:$0xff] }
 0x5b1   : > { %v3692_v59 = vpop.f32.mrf.mxu1  ;;  %3705 = vmatprep.mubr.msk.f32.mxu0 %vm3917_vm0, %v3916_v1  ;;  %3704 = vmatpush3.msra.mxu0 %v848_v17 }
 0x5b2   : > { %3713 = vmatprep.subr.mxu0 %v3916_v1 }
 0x66c   : > { %v1420_v60 = vpop.f32.mrf.mxu0 }
 0x66e   : > { %v3687_v61 = vpop.f32.mrf.mxu0 }
 0x670   : > { %v1571_v62 = vpop.f32.mrf.mxu0 }
 0x671   : > { %v1575_v63 = vmul.f32 0.35355338, %v1571_v62 }
 0x672   : > { %v3697_v0 = vpop.f32.mrf.mxu0 }
 0x673   : > { %v1576_v2 = vadd.f32 %v4154_v21, %v1575_v63 }
 0x675   : > { %v1577_v3 = vsel %vm1012_vm2, %v1576_v2, -inf }
 0x676   : > { %1578 = vmax.xlane.f32.xlu1 %v1577_v3 }
 0x687   : > { %1588 = vrot.lane.b32.xlu1 %v4134_v16, %s4561_s9 }
 0x68b   : > { %1738 = vrot.lane.b32.xlu1 %v4140_v18, %s4562_s10 }
 0x6ff   : > { %v1579_v4 = vpop.xlane.xlu1 %1578 }
 0x700   : > { %v1580_v6 = vsub.f32 %v1576_v2, %v1579_v4  ;;  %v3519_v2 = vld [vmem:[%s4541_s11] ss:$0 sm:$0xff] }
 0x702   : > { %v1581_v7 = vmul.f32 1.442695, %v1580_v6  ;;  %v3520_v6 = vld [vmem:[%s4543_s13] ss:$0 sm:$0xff] }
 0x703   : > { %v1589_v8 = vpop.permute.xlu1 %1588 }
 0x704   : > { %3876 = vpow2.f32 %v1581_v7  ;;  %3699 = vmatpush3.msra.mxu1 %v1589_v8  ;;  %v3522_v7 = vld [vmem:[%s4545_s15] ss:$0 sm:$0xff] }
 0x705   : > { %3708 = vmatprep.subr.mxu1 %v3916_v1 }
 0x707   : > { %v1739_v15 = vpop.permute.xlu1 %1738 }
 0x711   : > { %v3877_v9 = vpop.eup %3876 }
 0x712   : > { %v1583_v10 = vsel %vm1012_vm2, %v3877_v9, 0.0 }
 0x713   : > { %1584 = vadd.xlane.f32.xlu0 %v1583_v10 }
 0x729   : > { %1740 = vrot.lane.b32.xlu0 %v4134_v16, %s4562_s10  ;;  %s4593_s10 = smov 104  }
 0x79c   : > { %v1585_v11 = vpop.xlane.xlu0 %1584 }
 0x79d   : > { %3878 = vrcp.f32 %v1585_v11 }
 0x7a0   : > { %v1741_v14 = vpop.permute.xlu0 %1740 }
 0x7aa   : > { %v3879_v12 = vpop.eup %3878 }
 0x7ab   : > { %v1587_v13 = vmul.f32 %v3879_v12, %v3877_v9 }
 0x7ad   : > { %3701 = vmatmul.mubr.msk.f32.vlgmr.msra.gmra.mxu1 %vm1012_vm2, %v1587_v13 }
 0x7ae   : > { %3709 = vmatpush3.xpose.msk.msra.mxu1 %vm1012_vm2, %v1741_v14  ;;  %3710 = vmatprep.mubr.msk.f32.mxu1 %vm3917_vm0, %v3916_v1 }
 0x7af   : > { %3718 = vmatprep.subr.mxu1 %v3916_v1 }
 0x7b1   : > { %3711 = vmatmul.mubr.msk.f32.vlgmr.msra.gmra.mxu1 %vm1012_vm2, %v1739_v15 }
 0x7b2   : > { %3720 = vmatprep.mubr.msk.f32.mxu1 %vm3917_vm0, %v3916_v1  ;;  %3719 = vmatpush3.msra.mxu1 %v849_v33 }
 0x7b3   : > { %3734 = vmatprep.subr.mxu1 %v3916_v1 }
 0x86d   : > { %v1660_v18 = vpop.f32.mrf.mxu1 }
 0x86e   : > { %3706 = vmatmul.mubr.msk.f32.vlgmr.msra.gmra.mxu0 %vm1012_vm2, %v1660_v18 }
 0x86f   : > { %v3702_v19 = vpop.f32.mrf.mxu1  ;;  %3715 = vmatprep.mubr.msk.f32.mxu0 %vm3917_vm0, %v3916_v1 }
 0x871   : > { %v1812_v20 = vpop.f32.mrf.mxu1 }
 0x872   : > { %v1816_v22 = vmul.f32 0.35355338, %v1812_v20 }
 0x873   : > { %v3712_v23 = vpop.f32.mrf.mxu1 }
 0x874   : > { %v1817_v24 = vadd.f32 %v4154_v21, %v1816_v22  ;;  %v1494_v21 = vadd.f32 %v4198_v58, %v1420_v60  ;;  %v2020_v58 = vld [vmem:[%s4544_s14] sm:$0xff] }
 0x876   : > { %v1818_v25 = vsel %vm1012_vm2, %v1817_v24, -inf }
 0x877   : > { %1819 = vmax.xlane.f32.xlu1 %v1818_v25 }
 0x888   : > { %1829 = vrot.lane.b32.xlu1 %v4134_v16, %s4560_s0  ;;  %s4587_s0 = sld [smem:[#allocation11_spill]] }
 0x88e   : > { %v3517_v40 = vld [vmem:[%s4587_s0] ss:$0 sm:$0xff]  ;;  %s4588_s0 = sld [smem:[#allocation12_spill]] }
 0x894   : > { %v3518_v63 = vld [vmem:[%s4588_s0] ss:$0 sm:$0xff]  ;;  %s4589_s0 = sld [smem:[#allocation5_spill]] }
 0x89a   : > { %s827_s6 = scalar_lea.vmem %s4589_s0, %s4597_s3  ;;  %s4590_s3 = smov 88  }
 0x89b   : > { %v4329_v18 = vld [vmem:[%s827_s6] ss:$0 sm:$0xff]  ;;  %s4594_s0 = smov 80  }
 0x900   : > { %v1820_v26 = vpop.xlane.xlu1 %1819 }
 0x901   : > { %v1821_v27 = vsub.f32 %v1817_v24, %v1820_v26 }
 0x903   : > { %v1822_v28 = vmul.f32 1.442695, %v1821_v27 }
 0x904   : > { %v1830_v29 = vpop.permute.xlu1 %1829 }
 0x905   : > { %3880 = vpow2.f32 %v1822_v28  ;;  %3714 = vmatpush3.msra.mxu0 %v1830_v29 }
 0x906   : > { %3723 = vmatprep.subr.mxu0 %v3916_v1 }
 0x912   : > { %v3881_v30 = vpop.eup %3880 }
 0x913   : > { %v1824_v31 = vsel %vm1012_vm2, %v3881_v30, 0.0 }
 0x914   : > { %1825 = vadd.xlane.f32.xlu0 %v1824_v31 }
 0x92e   : > { %v1733_v32 = vpop.f32.mrf.mxu0 }
 0x92f   : > { %v1737_v16 = vadd.f32 %v1733_v32, %v1494_v21 }
 0x930   : > { %v3707_v34 = vpop.f32.mrf.mxu0 }
 0x99d   : > { %v1826_v35 = vpop.xlane.xlu0 %1825 }
 0x99e   : > { %3882 = vrcp.f32 %v1826_v35 }
 0x9ab   : > { %v3883_v36 = vpop.eup %3882 }
 0x9ac   : > { %v1828_v37 = vmul.f32 %v3883_v36, %v3881_v30 }
 0x9ae   : > { %3716 = vmatmul.mubr.msk.f32.vlgmr.msra.gmra.mxu0 %vm1012_vm2, %v1828_v37 }
 0x9af   : > { %3731 = vmatprep.mubr.msk.f32.mxu0 %vm3917_vm0, %v3916_v1  ;;  %3724 = vmatpush3.msra.mxu0 %v2018_v52 }
 0x9b0   : > { %3725 = vmatprep.subr.mxu0 %v3916_v1 }
 0xa6e   : > { %v1901_v38 = vpop.f32.mrf.mxu0 }
 0xa6f   : > { %3721 = vmatmul.mubr.msk.f32.vlgmr.msra.gmra.mxu1 %vm1012_vm2, %v1901_v38 }
 0xa70   : > { %v3717_v39 = vpop.f32.mrf.mxu0  ;;  %3742 = vmatprep.mubr.msk.f32.mxu1 %vm3917_vm0, %v3916_v1  ;;  %3735 = vmatpush3.msra.mxu1 %v2023_v53 }
 0xa71   : > { %3736 = vmatprep.subr.mxu1 %v3916_v1 }
 0xa72   : > { %3737 = vmatpush3.msra.mxu1 %v2022_v54 }
 0xa73   : > { %3738 = vmatprep.subr.mxu1 %v3916_v1 }
 0xa74   : > { %3739 = vmatpush3.msra.mxu1 %v2021_v56 }
 0xa75   : > { %3740 = vmatprep.subr.mxu1 %v3916_v1 }
 0xa76   : > { %3741 = vmatpush3.msra.mxu1 %v2020_v58 }
 0xa77   : > { %3750 = vmatprep.subr.mxu1 %v3916_v1 }
 0xb2f   : > { %v1974_v41 = vpop.f32.mrf.mxu1 }
 0xb30   : > { %v1978_v42 = vadd.f32 %v1974_v41, %v1737_v16 }
 0xb31   : > { %v3722_v43 = vpop.f32.mrf.mxu1 }
 0xb32   : > { %v1985_v44 = vadd.f32 %v3517_v40, %v1978_v42 }
 0xb34   : > { %v1986_v45 = vadd.f32 %v1985_v44, %v4097_v5  ;;  %v2017_v5 = vld [vmem:[%s4542_s12 + $0x10] sm:$0xff] }
 0xb35   : > { %3726 = vmatpush3.msra.mxu0 %v2017_v5 }
 0xb36   : > { %v1987_v46 = vsel %vm859_vm1, %v1986_v45, 0.0  ;;  %3727 = vmatprep.subr.mxu0 %v3916_v1 }
 0xb37   : > { %1988 = vadd.xlane.f32.xlu0 %v1987_v46  ;;  %3728 = vmatpush3.msra.mxu0 %v2016_v55  ;;  %v2026_v46 = vld [vmem:[%s4546_s16 + $0x8] sm:$0xff] }
 0xb38   : > { %3729 = vmatprep.subr.mxu0 %v3916_v1 }
 0xb39   : > { %3730 = vmatpush3.msra.mxu0 %v2015_v57 }
 0xb3a   : > { %3745 = vmatprep.subr.mxu0 %v3916_v1 }
 0xbc0   : > { %v1989_v47 = vpop.xlane.xlu0 %1988 }
 0xbc1   : > { %v1991_v48 = vmul.f32 0.03125, %v1989_v47 }
 0xbc3   : > { %v1992_v49 = vsub.f32 %v1986_v45, %v1991_v48  ;;  %v2025_v45 = vld [vmem:[%s4546_s16] sm:$0xff] }
 0xbc5   : > { %v1993_v50 = vmul.f32 %v1992_v49, %v1992_v49 }
 0xbc7   : > { %v1994_v51 = vsel %vm859_vm1, %v1993_v50, 0.0 }
 0xbc8   : > { %1995 = vadd.xlane.f32.xlu0 %v1994_v51 }
 0xc51   : > { %v1996_v59 = vpop.xlane.xlu0 %1995 }
 0xc52   : > { %v1997_v60 = vmul.f32 0.03125, %v1996_v59 }
 0xc54   : > { %v1998_v61 = vadd.f32 1e-12, %v1997_v60 }
 0xc56   : > { %3884 = vrsqrt.f32 %v1998_v61 }
 0xc63   : > { %v3885_v62 = vpop.eup %3884 }
 0xc64   : > { %v2000_v0 = vmul.f32 %v3885_v62, %v1992_v49 }
 0xc66   : > { %v2007_v3 = vmul.f32 %v3518_v63, %v2000_v0 }
 0xc68   : > { %v4289_v4 = vadd.f32 %v3519_v2, %v2007_v3 }
 0xc6a   : > { %3732 = vmatmul.mubr.msk.f32.vlgmr.msra.gmra.mxu0 %vm859_vm1, %v4289_v4  ;;  %3743 = vmatmul.mubr.msk.f32.vlgmr.msra.gmra.mxu1 %vm859_vm1, %v4289_v4 }
 0xc6b   : > { %3747 = vmatprep.mubr.msk.f32.mxu0 %vm3917_vm0, %v3916_v1  ;;  %3752 = vmatprep.mubr.msk.f32.mxu1 %vm3917_vm0, %v3916_v1 }
 0xd2a   : > { %v2107_v8 = vpop.f32.mrf.mxu0  ;;  %v2183_v9 = vpop.f32.mrf.mxu1 }
 0xd2b   : > { %v4305_v10 = vadd.f32 %v3520_v6, %v2107_v8  ;;  %v4307_v11 = vadd.f32 %v3522_v7, %v2183_v9 }
 0xd2c   : > { %v3733_v12 = vpop.f32.mrf.mxu0  ;;  %v3744_v13 = vpop.f32.mrf.mxu1 }
 0xd2d   : > { %2360 = vrot.lane.b32.xlu0 %v4307_v11, %s3919_s7  ;;  %3746 = vmatpush3.xpose.msk.msra.mxu0 %vm1012_vm2, %v4307_v11  ;;  %v2027_v13 = vld [vmem:[%s4546_s16 + $0x10] sm:$0xff] }
 0xd2e   : > { %2358 = vrot.lane.b32.xlu1 %v4305_v10, %s3919_s7  ;;  %3755 = vmatprep.subr.mxu0 %v3916_v1 }
 0xd30   : > { %3748 = vmatmul.mubr.msk.f32.vlgmr.msra.gmra.mxu0 %vm1012_vm2, %v4305_v10 }
 0xd31   : > { %3757 = vmatprep.mubr.msk.f32.mxu0 %vm3917_vm0, %v3916_v1 }
 0xd9f   : > { %v2361_v14 = vpop.permute.xlu0 %2360 }
 0xda0   : > { %3756 = vmatpush3.xpose.msk.msra.mxu0 %vm1012_vm2, %v2361_v14  ;;  %v2359_v15 = vpop.permute.xlu1 %2358 }
 0xda1   : > { %3765 = vmatprep.subr.mxu0 %v3916_v1 }
 0xda3   : > { %3758 = vmatmul.mubr.msk.f32.vlgmr.msra.gmra.mxu0 %vm1012_vm2, %v2359_v15 }
 0xda4   : > { %3767 = vmatprep.mubr.msk.f32.mxu0 %vm3917_vm0, %v3916_v1  ;;  %3766 = vmatpush3.msra.mxu0 %v2026_v46 }
 0xda5   : > { %3775 = vmatprep.subr.mxu0 %v3916_v1 }
 0xdf0   : > { %v2259_v17 = vpop.f32.mrf.mxu0 }
 0xdf1   : > { %v2263_v19 = vmul.f32 0.35355338, %v2259_v17 }
 0xdf2   : > { %v3749_v20 = vpop.f32.mrf.mxu0 }
 0xdf3   : > { %v2270_v22 = vadd.f32 %v4329_v18, %v2263_v19 }
 0xdf5   : > { %v2271_v23 = vsel %vm1012_vm2, %v2270_v22, -inf }
 0xdf6   : > { %2272 = vmax.xlane.f32.xlu1 %v2271_v23 }
 0xe63   : > { %v2432_v24 = vpop.f32.mrf.mxu0 }
 0xe64   : > { %v2436_v25 = vmul.f32 0.35355338, %v2432_v24 }
 0xe65   : > { %v3759_v26 = vpop.f32.mrf.mxu0 }
 0xe66   : > { %v2437_v27 = vadd.f32 %v4329_v18, %v2436_v25 }
 0xe68   : > { %v2438_v28 = vsel %vm1012_vm2, %v2437_v27, -inf }
 0xe69   : > { %2439 = vmax.xlane.f32.xlu0 %v2438_v28 }
 0xe7f   : > { %v2273_v29 = vpop.xlane.xlu1 %2272  ;;  %2449 = vrot.lane.b32.xlu0 %v4307_v11, %s4590_s3  ;;  %s831_s3 = scalar_lea.vmem %s4556_s26, %s4087_s30 }
 0xe80   : > { %v2274_v30 = vsub.f32 %v2270_v22, %v2273_v29 }
 0xe82   : > { %v2275_v31 = vmul.f32 1.442695, %v2274_v30 }
 0xe84   : > { %3886 = vpow2.f32 %v2275_v31 }
 0xe91   : > { %v3887_v21 = vpop.eup %3886 }
 0xe92   : > { %v2277_v32 = vsel %vm1012_vm2, %v3887_v21, 0.0 }
 0xe93   : > { %2278 = vadd.xlane.f32.xlu1 %v2277_v32 }
 0xef2   : > { %v2440_v33 = vpop.xlane.xlu0 %2439 }
 0xef3   : > { %v2441_v16 = vsub.f32 %v2437_v27, %v2440_v33 }
 0xef5   : > { %v2442_v34 = vmul.f32 1.442695, %v2441_v16 }
 0xef6   : > { %v2450_v42 = vpop.permute.xlu0 %2449 }
 0xef7   : > { %3888 = vpow2.f32 %v2442_v34 }
 0xf04   : > { %v3889_v35 = vpop.eup %3888 }
 0xf05   : > { %v2444_v36 = vsel %vm1012_vm2, %v3889_v35, 0.0 }
 0xf06   : > { %2445 = vadd.xlane.f32.xlu1 %v2444_v36 }
 0xf17   : > { %2282 = vrot.lane.b32.xlu1 %v4307_v11, %s4591_s1  ;;  %s4595_s1 = smov 72  }
 0xf1b   : > { %2673 = vrot.lane.b32.xlu1 %v4307_v11, %s4592_s2 }
 0xf1c   : > { %v2279_v37 = vpop.xlane.xlu1 %2278 }
 0xf1d   : > { %3890 = vrcp.f32 %v2279_v37 }
 0xf1f   : > { %2671 = vrot.lane.b32.xlu1 %v4305_v10, %s4592_s2 }
 0xf2a   : > { %v3891_v39 = vpop.eup %3890 }
 0xf2b   : > { %v2281_v41 = vmul.f32 %v3891_v39, %v3887_v21 }
 0xf8f   : > { %v2446_v38 = vpop.xlane.xlu1 %2445 }
 0xf90   : > { %3892 = vrcp.f32 %v2446_v38 }
 0xf93   : > { %v2283_v40 = vpop.permute.xlu1 %2282 }
 0xf94   : > { %3751 = vmatpush3.msra.mxu1 %v2283_v40 }
 0xf95   : > { %3753 = vmatmul.mubr.msk.f32.vlgmr.msra.gmra.mxu1 %vm1012_vm2, %v2281_v41  ;;  %3760 = vmatprep.subr.mxu1 %v3916_v1 }
 0xf96   : > { %3761 = vmatpush3.msra.mxu1 %v2450_v42  ;;  %3762 = vmatprep.mubr.msk.f32.mxu1 %vm3917_vm0, %v3916_v1 }
 0xf97   : > { %3770 = vmatprep.subr.mxu1 %v3916_v1  ;;  %v2674_v49 = vpop.permute.xlu1 %2673 }
 0xf9b   : > { %v2672_v52 = vpop.permute.xlu1 %2671 }
 0xf9d   : > { %v3893_v43 = vpop.eup %3892 }
 0xf9e   : > { %v2448_v44 = vmul.f32 %v3893_v43, %v3889_v35  ;;  %v3541_v35 = vld [vmem:[%s4547_s17] ss:$0 sm:$0xff] }
 0xfa0   : > { %3763 = vmatmul.mubr.msk.f32.vlgmr.msra.gmra.mxu1 %vm1012_vm2, %v2448_v44 }
 0xfa1   : > { %3772 = vmatprep.mubr.msk.f32.mxu1 %vm3917_vm0, %v3916_v1  ;;  %3771 = vmatpush3.msra.mxu1 %v2025_v45 }
 0xfa2   : > { %3780 = vmatprep.subr.mxu1 %v3916_v1 }
0x1055   : > { %v2354_v47 = vpop.f32.mrf.mxu1 }
0x1056   : > { %3773 = vmatmul.mubr.msk.f32.vlgmr.msra.gmra.mxu1 %vm1012_vm2, %v2354_v47  ;;  %v3191_v47 = vld [vmem:[%s4550_s20 + $0x18] sm:$0xff] }
0x1057   : > { %v3754_v48 = vpop.f32.mrf.mxu1  ;;  %3782 = vmatprep.mubr.msk.f32.mxu1 %vm3917_vm0, %v3916_v1 }
0x1058   : > { %v3190_v48 = vld [vmem:[%s4550_s20 + $0x10] sm:$0xff] }
0x1060   : > { %v2521_v50 = vpop.f32.mrf.mxu1 }
0x1061   : > { %3768 = vmatmul.mubr.msk.f32.vlgmr.msra.gmra.mxu0 %vm1012_vm2, %v2521_v50 }
0x1062   : > { %3776 = vmatpush3.xpose.msk.msra.mxu0 %vm1012_vm2, %v2674_v49  ;;  %v3764_v51 = vpop.f32.mrf.mxu1  ;;  %3777 = vmatprep.mubr.msk.f32.mxu0 %vm3917_vm0, %v3916_v1  ;;  %v3188_v49 = vld [vmem:[%s4550_s20] sm:$0xff] }
0x1063   : > { %3785 = vmatprep.subr.mxu0 %v3916_v1 }
0x1065   : > { %3778 = vmatmul.mubr.msk.f32.vlgmr.msra.gmra.mxu0 %vm1012_vm2, %v2672_v52 }
0x1066   : > { %3787 = vmatprep.mubr.msk.f32.mxu0 %vm3917_vm0, %v3916_v1  ;;  %3786 = vmatpush3.msra.mxu0 %v2027_v13  ;;  %v3193_v13 = vld [vmem:[%s4552_s22] sm:$0xff] }
0x1067   : > { %3795 = vmatprep.subr.mxu0 %v3916_v1 }
0x1116   : > { %v2667_v53 = vpop.f32.mrf.mxu1 }
0x1118   : > { %v3774_v5 = vpop.f32.mrf.mxu1 }
0x1119   : > { %v3542_v5 = vld [vmem:[%s4548_s18] ss:$0 sm:$0xff] }
0x1121   : > { %v2594_v54 = vpop.f32.mrf.mxu0 }
0x1122   : > { %v2668_v55 = vadd.f32 %v2667_v53, %v2594_v54 }
0x1123   : > { %v3769_v56 = vpop.f32.mrf.mxu0 }
0x1125   : > { %v2745_v57 = vpop.f32.mrf.mxu0 }
0x1126   : > { %v2749_v58 = vmul.f32 0.35355338, %v2745_v57 }
0x1127   : > { %v3779_v59 = vpop.f32.mrf.mxu0 }
0x1128   : > { %v2750_v60 = vadd.f32 %v4329_v18, %v2749_v58  ;;  %v3208_v58 = vld [vmem:[%s4552_s22 + $0x78] sm:$0xff]  ;;  %v3207_v59 = vld [vmem:[%s4552_s22 + $0x70] sm:$0xff] }
0x112a   : > { %v2751_v61 = vsel %vm1012_vm2, %v2750_v60, -inf }
0x112b   : > { %2752 = vmax.xlane.f32.xlu1 %v2751_v61  ;;  %v3205_v61 = vld [vmem:[%s4552_s22 + $0x60] sm:$0xff] }
0x113c   : > { %2914 = vrot.lane.b32.xlu1 %v4307_v11, %s4593_s10 }
0x1140   : > { %2912 = vrot.lane.b32.xlu1 %v4305_v10, %s4593_s10 }
0x11b4   : > { %v2753_v62 = vpop.xlane.xlu1 %2752 }
0x11b5   : > { %v2754_v63 = vsub.f32 %v2750_v60, %v2753_v62  ;;  %v3206_v60 = vld [vmem:[%s4552_s22 + $0x68] sm:$0xff]  ;;  %v3204_v62 = vld [vmem:[%s4552_s22 + $0x58] sm:$0xff] }
0x11b7   : > { %v2755_v0 = vmul.f32 1.442695, %v2754_v63  ;;  %v3203_v63 = vld [vmem:[%s4552_s22 + $0x50] sm:$0xff] }
0x11b8   : > { %v2915_v9 = vpop.permute.xlu1 %2914 }
0x11b9   : > { %3894 = vpow2.f32 %v2755_v0  ;;  %v3202_v0 = vld [vmem:[%s4552_s22 + $0x48] sm:$0xff] }
0x11bc   : > { %v2913_v12 = vpop.permute.xlu1 %2912 }
0x11c6   : > { %v3895_v2 = vpop.eup %3894 }
0x11c7   : > { %v2757_v3 = vsel %vm1012_vm2, %v3895_v2, 0.0 }
0x11c8   : > { %2758 = vadd.xlane.f32.xlu0 %v2757_v3  ;;  %v3200_v3 = vld [vmem:[%s4552_s22 + $0x38] sm:$0xff] }
0x11de   : > { %2762 = vrot.lane.b32.xlu0 %v4307_v11, %s4594_s0 }
0x1251   : > { %v2759_v6 = vpop.xlane.xlu0 %2758 }
0x1252   : > { %3896 = vrcp.f32 %v2759_v6  ;;  %v3199_v6 = vld [vmem:[%s4552_s22 + $0x30] sm:$0xff] }
0x1255   : > { %v2763_v7 = vpop.permute.xlu0 %2762 }
0x1256   : > { %3781 = vmatpush3.msra.mxu1 %v2763_v7  ;;  %v3198_v7 = vld [vmem:[%s4552_s22 + $0x28] sm:$0xff] }
0x1257   : > { %3790 = vmatprep.subr.mxu1 %v3916_v1 }
0x125f   : > { %v3897_v8 = vpop.eup %3896 }
0x1260   : > { %v2761_v10 = vmul.f32 %v3897_v8, %v3895_v2  ;;  %v3201_v2 = vld [vmem:[%s4552_s22 + $0x40] sm:$0xff] }
0x1261   : > { %v3197_v8 = vld [vmem:[%s4552_s22 + $0x20] sm:$0xff] }
0x1262   : > { %3783 = vmatmul.mubr.msk.f32.vlgmr.msra.gmra.mxu1 %vm1012_vm2, %v2761_v10  ;;  %v3195_v10 = vld [vmem:[%s4552_s22 + $0x10] sm:$0xff] }
0x1263   : > { %3791 = vmatpush3.xpose.msk.msra.mxu1 %vm1012_vm2, %v2915_v9  ;;  %3792 = vmatprep.mubr.msk.f32.mxu1 %vm3917_vm0, %v3916_v1  ;;  %v3196_v9 = vld [vmem:[%s4552_s22 + $0x18] sm:$0xff] }
0x1264   : > { %3800 = vmatprep.subr.mxu1 %v3916_v1 }
0x1266   : > { %3793 = vmatmul.mubr.msk.f32.vlgmr.msra.gmra.mxu1 %vm1012_vm2, %v2913_v12  ;;  %v3194_v12 = vld [vmem:[%s4552_s22 + $0x8] sm:$0xff] }
0x1267   : > { %3802 = vmatprep.mubr.msk.f32.mxu1 %vm3917_vm0, %v3916_v1 }
0x1322   : > { %v2834_v14 = vpop.f32.mrf.mxu1 }
0x1323   : > { %3788 = vmatmul.mubr.msk.f32.vlgmr.msra.gmra.mxu0 %vm1012_vm2, %v2834_v14  ;;  %v3544_v14 = vld [vmem:[%s4551_s21] ss:$0 sm:$0xff] }
0x1324   : > { %v3784_v15 = vpop.f32.mrf.mxu1  ;;  %3797 = vmatprep.mubr.msk.f32.mxu0 %vm3917_vm0, %v3916_v1 }
0x1326   : > { %v2986_v17 = vpop.f32.mrf.mxu1 }
0x1327   : > { %v2990_v19 = vmul.f32 0.35355338, %v2986_v17 }
0x1328   : > { %v3794_v20 = vpop.f32.mrf.mxu1 }
0x1329   : > { %v2991_v22 = vadd.f32 %v4329_v18, %v2990_v19  ;;  %v2028_v18 = vld [vmem:[%s4546_s16 + $0x18] sm:$0xff] }
0x132a   : > { %3801 = vmatpush3.msra.mxu1 %v2028_v18 }
0x132b   : > { %v2992_v23 = vsel %vm1012_vm2, %v2991_v22, -inf  ;;  %3816 = vmatprep.subr.mxu1 %v3916_v1 }
0x132c   : > { %2993 = vmax.xlane.f32.xlu0 %v2992_v23 }
0x1342   : > { %3003 = vrot.lane.b32.xlu0 %v4307_v11, %s4595_s1 }
0x13b5   : > { %v2994_v24 = vpop.xlane.xlu0 %2993 }
0x13b6   : > { %v2995_v25 = vsub.f32 %v2991_v22, %v2994_v24 }
0x13b8   : > { %v2996_v26 = vmul.f32 1.442695, %v2995_v25 }
0x13b9   : > { %v3004_v27 = vpop.permute.xlu0 %3003 }
0x13ba   : > { %3898 = vpow2.f32 %v2996_v26  ;;  %3796 = vmatpush3.msra.mxu0 %v3004_v27 }
0x13bb   : > { %3805 = vmatprep.subr.mxu0 %v3916_v1 }
0x13c7   : > { %v3899_v28 = vpop.eup %3898 }
0x13c8   : > { %v2998_v29 = vsel %vm1012_vm2, %v3899_v28, 0.0 }
0x13c9   : > { %2999 = vadd.xlane.f32.xlu1 %v2998_v29 }
0x13e3   : > { %v2907_v30 = vpop.f32.mrf.mxu0 }
0x13e4   : > { %v2911_v31 = vadd.f32 %v2907_v30, %v2668_v55  ;;  %v3543_v55 = vld [vmem:[%s4549_s19] ss:$0 sm:$0xff] }
0x13e5   : > { %v3789_v11 = vpop.f32.mrf.mxu0 }
0x1452   : > { %v3000_v21 = vpop.xlane.xlu1 %2999 }
0x1453   : > { %3900 = vrcp.f32 %v3000_v21 }
0x1460   : > { %v3901_v32 = vpop.eup %3900 }
0x1461   : > { %v3002_v33 = vmul.f32 %v3901_v32, %v3899_v28 }
0x1463   : > { %3798 = vmatmul.mubr.msk.f32.vlgmr.msra.gmra.mxu0 %vm1012_vm2, %v3002_v33 }
0x1464   : > { %3813 = vmatprep.mubr.msk.f32.mxu0 %vm3917_vm0, %v3916_v1  ;;  %3806 = vmatpush3.msra.mxu0 %v3191_v47 }
0x1465   : > { %3807 = vmatprep.subr.mxu0 %v3916_v1 }
0x1466   : > { %3808 = vmatpush3.msra.mxu0 %v3190_v48 }
0x1467   : > { %3809 = vmatprep.subr.mxu0 %v3916_v1 }
0x1523   : > { %v3075_v16 = vpop.f32.mrf.mxu0 }
0x1524   : > { %3803 = vmatmul.mubr.msk.f32.vlgmr.msra.gmra.mxu1 %vm1012_vm2, %v3075_v16 }
0x1525   : > { %v3799_v34 = vpop.f32.mrf.mxu0  ;;  %3848 = vmatprep.mubr.msk.f32.mxu1 %vm3917_vm0, %v3916_v1  ;;  %3817 = vmatpush3.msra.mxu1 %v3208_v58 }
0x1526   : > { %3818 = vmatprep.subr.mxu1 %v3916_v1 }
0x1527   : > { %3819 = vmatpush3.msra.mxu1 %v3207_v59 }
0x1528   : > { %3820 = vmatprep.subr.mxu1 %v3916_v1 }
0x1529   : > { %3821 = vmatpush3.msra.mxu1 %v3206_v60 }
0x152a   : > { %3822 = vmatprep.subr.mxu1 %v3916_v1 }
0x152b   : > { %3823 = vmatpush3.msra.mxu1 %v3205_v61 }
0x152c   : > { %3824 = vmatprep.subr.mxu1 %v3916_v1 }
0x152d   : > { %3825 = vmatpush3.msra.mxu1 %v3204_v62 }
0x152e   : > { %3826 = vmatprep.subr.mxu1 %v3916_v1 }
0x152f   : > { %3827 = vmatpush3.msra.mxu1 %v3203_v63 }
0x1530   : > { %3828 = vmatprep.subr.mxu1 %v3916_v1 }
0x1531   : > { %3829 = vmatpush3.msra.mxu1 %v3202_v0 }
0x1532   : > { %3830 = vmatprep.subr.mxu1 %v3916_v1 }
0x1533   : > { %3831 = vmatpush3.msra.mxu1 %v3201_v2 }
0x1534   : > { %3832 = vmatprep.subr.mxu1 %v3916_v1 }
0x1535   : > { %3833 = vmatpush3.msra.mxu1 %v3200_v3 }
0x1536   : > { %3834 = vmatprep.subr.mxu1 %v3916_v1 }
0x1537   : > { %3835 = vmatpush3.msra.mxu1 %v3199_v6 }
0x1538   : > { %3836 = vmatprep.subr.mxu1 %v3916_v1 }
0x1539   : > { %3837 = vmatpush3.msra.mxu1 %v3198_v7 }
0x153a   : > { %3838 = vmatprep.subr.mxu1 %v3916_v1 }
0x153b   : > { %3839 = vmatpush3.msra.mxu1 %v3197_v8 }
0x153c   : > { %3840 = vmatprep.subr.mxu1 %v3916_v1 }
0x153d   : > { %3841 = vmatpush3.msra.mxu1 %v3196_v9 }
0x153e   : > { %3842 = vmatprep.subr.mxu1 %v3916_v1 }
0x153f   : > { %3843 = vmatpush3.msra.mxu1 %v3195_v10 }
0x1540   : > { %3844 = vmatprep.subr.mxu1 %v3916_v1 }
0x1541   : > { %3845 = vmatpush3.msra.mxu1 %v3194_v12 }
0x1542   : > { %3846 = vmatprep.subr.mxu1 %v3916_v1 }
0x1543   : > { %3847 = vmatpush3.msra.mxu1 %v3193_v13 }
0x15e4   : > { %v3148_v36 = vpop.f32.mrf.mxu1 }
0x15e5   : > { %v3152_v37 = vadd.f32 %v3148_v36, %v2911_v31 }
0x15e6   : > { %v3804_v38 = vpop.f32.mrf.mxu1 }
0x15e7   : > { %v3159_v39 = vadd.f32 %v3541_v35, %v3152_v37 }
0x15e9   : > { %v3160_v40 = vadd.f32 %v3159_v39, %v4289_v4  ;;  %v3189_v4 = vld [vmem:[%s4550_s20 + $0x8] sm:$0xff] }
0x15ea   : > { %3810 = vmatpush3.msra.mxu0 %v3189_v4 }
0x15eb   : > { %v3161_v41 = vsel %vm859_vm1, %v3160_v40, 0.0  ;;  %3811 = vmatprep.subr.mxu0 %v3916_v1  ;;  %v3546_v1 = vld [vmem:[%s4553_s23] ss:$0 sm:$0xff] }
0x15ec   : > { %3162 = vadd.xlane.f32.xlu1 %v3161_v41  ;;  %3812 = vmatpush3.msra.mxu0 %v3188_v49 }
0x1675   : > { %v3163_v42 = vpop.xlane.xlu1 %3162 }
0x1676   : > { %v3164_v43 = vmul.f32 0.03125, %v3163_v42  ;;  %v3548_v42 = vld [vmem:[%s4555_s25] ss:$0 sm:$0xff] }
0x1678   : > { %v3165_v44 = vsub.f32 %v3160_v40, %v3164_v43  ;;  %v3547_v40 = vld [vmem:[%s4554_s24] ss:$0 sm:$0xff] }
0x167a   : > { %v3166_v45 = vmul.f32 %v3165_v44, %v3165_v44 }
0x167c   : > { %v3167_v46 = vsel %vm859_vm1, %v3166_v45, 0.0 }
0x167d   : > { %3168 = vadd.xlane.f32.xlu1 %v3167_v46 }
0x1706   : > { %v3169_v50 = vpop.xlane.xlu1 %3168 }
0x1707   : > { %v3170_v51 = vmul.f32 0.03125, %v3169_v50 }
0x1709   : > { %v3171_v52 = vadd.f32 1e-12, %v3170_v51 }
0x170b   : > { %3902 = vrsqrt.f32 %v3171_v52 }
0x1718   : > { %v3903_v53 = vpop.eup %3902 }
0x1719   : > { %v3173_v54 = vmul.f32 %v3903_v53, %v3165_v44 }
0x171b   : > { %v3180_v56 = vmul.f32 %v3542_v5, %v3173_v54 }
0x171d   : > { %v4440_v57 = vadd.f32 %v3543_v55, %v3180_v56 }
0x171f   : > { %3814 = vmatmul.mubr.msk.f32.vlgmr.msra.gmra.mxu0 %vm859_vm1, %v4440_v57 }
0x17df   : > { %v3287_v15 = vpop.f32.mrf.mxu0 }
0x17e0   : > { %v3288_v17 = vadd.f32 %v3544_v14, %v3287_v15 }
0x17e1   : > { %v3815_v19 = vpop.f32.mrf.mxu0 }
0x17e2   : > { %v3292_v20 = vmul.f32 0.044715, %v3288_v17  ;;  %v3291_v27 = vmul.f32 0.5, %v3288_v17 }
0x17e4   : > { %v3293_v22 = vmul.f32 %v3292_v20, %v3288_v17 }
0x17e6   : > { %v3294_v23 = vmul.f32 %v3293_v22, %v3288_v17 }
0x17e8   : > { %v3295_v24 = vadd.f32 %v3294_v23, %v3288_v17 }
0x17ea   : > { %v3296_v25 = vmul.f32 0.7978846, %v3295_v24 }
0x17ec   : > { %3904 = vtanh.f32 %v3296_v25 }
0x17f9   : > { %v3905_v26 = vpop.eup %3904 }
0x17fa   : > { %v3298_v28 = vadd.f32 1.0, %v3905_v26 }
0x17fc   : > { %v3299_v29 = vmul.f32 %v3298_v28, %v3291_v27 }
0x17fe   : > { %3849 = vmatmul.mubr.f32.vlgmr.msra.gmra.mxu1 %v3299_v29 }
0x18be   : > { %v3372_v30 = vpop.f32.mrf.mxu1 }
0x18bf   : > { %v3373_v18 = vadd.f32 %v3546_v1, %v3372_v30 }
0x18c0   : > { %v3850_v31 = vpop.f32.mrf.mxu1 }
0x18c1   : > { %v3376_v11 = vadd.f32 %v3373_v18, %v4440_v57 }
0x18c3   : > { %v3377_v21 = vsel %vm859_vm1, %v3376_v11, 0.0 }
0x18c4   : > { %3378 = vadd.xlane.f32.xlu1 %v3377_v21 }
0x194d   : > { %v3379_v32 = vpop.xlane.xlu1 %3378 }
0x194e   : > { %v3380_v33 = vmul.f32 0.03125, %v3379_v32 }
0x1950   : > { %v3381_v16 = vsub.f32 %v3376_v11, %v3380_v33 }
0x1952   : > { %v3382_v34 = vmul.f32 %v3381_v16, %v3381_v16 }
0x1954   : > { %v3383_v35 = vsel %vm859_vm1, %v3382_v34, 0.0 }
0x1955   : > { %3384 = vadd.xlane.f32.xlu1 %v3383_v35 }
0x19de   : > { %v3385_v36 = vpop.xlane.xlu1 %3384 }
0x19df   : > { %v3386_v37 = vmul.f32 0.03125, %v3385_v36 }
0x19e1   : > { %v3387_v38 = vadd.f32 1e-12, %v3386_v37 }
0x19e3   : > { %3906 = vrsqrt.f32 %v3387_v38 }
0x19f0   : > { %v3907_v39 = vpop.eup %3906 }
0x19f1   : > { %v3389_v41 = vmul.f32 %v3907_v39, %v3381_v16 }
0x19f3   : > { %v3396_v43 = vmul.f32 %v3547_v40, %v3389_v41 }
0x19f5   : > { %v3403_v44 = vadd.f32 %v3548_v42, %v3396_v43 }
0x19f7   : > { %3404 = vst.msk [vmem:[%s831_s3] sm:$0xff] %vm859_vm1, %v3403_v44 }
0x19f8 PF: > { %s36_s27 = sadd.s32 1, %s3914_s27  }
0x19f9   : > { %p33_p4 = scmp.ge.s32.totalorder %s36_s27, 4  }
0x19fb   :  { %35 = sbr.rel (!%p33_p4) target bundleno = 12 (0xc), region = 163 }

// kernel: gqa_model_gcn_forward.13
= control target key start
LH: loop header
LB: loop body
LE: loop exit
PB: predicated region body
PF: predicated region fallthrough
CT: control target
= control target key end

     0   :  { %s4702_s0 = inlined_call_operand.vmem [shape: f32[2,8,32], index: 0, kind: input, shape index: {}]   ;;  %s4703_s1 = inlined_call_operand.vmem [shape: f32[2,8,32], index: 1, kind: input, shape index: {}]   ;;  %s4704_s2 = inlined_call_operand.vmem [shape: f32[2,1,8], index: 2, kind: input, shape index: {}]   ;;  %s4705_s3 = inlined_call_operand.vmem [shape: f32[2,1,8], index: 3, kind: input, shape index: {}]   ;;  %s4706_s4 = inlined_call_operand.vmem [shape: f32[32,32], index: 4, kind: input, shape index: {}]   ;;  %s4707_s5 = inlined_call_operand.vmem [shape: f32[1,32], index: 5, kind: input, shape index: {}]   ;;  %s4708_s6 = inlined_call_operand.vmem [shape: f32[32,64], index: 6, kind: input, shape index: {}]   ;;  %s4709_s7 = inlined_call_operand.vmem [shape: f32[1,64], index: 7, kind: input, shape index: {}]   ;;  %s4710_s8 = inlined_call_operand.vmem [shape: f32[32,32], index: 8, kind: input, shape index: {}]   ;;  %s4711_s9 = inlined_call_operand.vmem [shape: f32[1,32], index: 9, kind: input, shape index: {}]   ;;  %s4712_s10 = inlined_call_operand.vmem [shape: f32[1,32], index: 10, kind: input, shape index: {}]   ;;  %s4713_s11 = inlined_call_operand.vmem [shape: f32[1,32], index: 11, kind: input, shape index: {}]   ;;  %s4714_s12 = inlined_call_operand.vmem [shape: f32[32,32], index: 12, kind: input, shape index: {}]   ;;  %s4715_s13 = inlined_call_operand.vmem [shape: f32[1,32], index: 13, kind: input, shape index: {}]   ;;  %s4716_s14 = inlined_call_operand.vmem [shape: f32[32,64], index: 14, kind: input, shape index: {}]   ;;  %s4717_s15 = inlined_call_operand.vmem [shape: f32[1,64], index: 15, kind: input, shape index: {}]   ;;  %s4718_s16 = inlined_call_operand.vmem [shape: f32[32,32], index: 16, kind: input, shape index: {}]   ;;  %s4719_s17 = inlined_call_operand.vmem [shape: f32[1,32], index: 17, kind: input, shape index: {}]   ;;  %s4720_s18 = inlined_call_operand.vmem [shape: f32[1,32], index: 18, kind: input, shape index: {}]   ;;  %s4721_s19 = inlined_call_operand.vmem [shape: f32[1,32], index: 19, kind: input, shape index: {}]   ;;  %s4722_s20 = inlined_call_operand.vmem [shape: f32[32,128], index: 20, kind: input, shape index: {}]   ;;  %s4723_s21 = inlined_call_operand.vmem [shape: f32[1,128], index: 21, kind: input, shape index: {}]   ;;  %s4724_s22 = inlined_call_operand.vmem [shape: f32[128,32], index: 22, kind: input, shape index: {}]   ;;  %s4725_s23 = inlined_call_operand.vmem [shape: f32[1,32], index: 23, kind: input, shape index: {}]   ;;  %s4726_s24 = inlined_call_operand.vmem [shape: f32[1,32], index: 24, kind: input, shape index: {}]   ;;  %s4727_s25 = inlined_call_operand.vmem [shape: f32[1,32], index: 25, kind: input, shape index: {}]   ;;  %s4728_s26 = inlined_call_operand.hbm [shape: f32[2,8,32], index: 26, kind: output, shape index: {}]  }
   0x1   :  { %4749 = sst [smem:[#allocation11_spill]] %s4702_s0 }
   0x2   :  { %4750 = sst [smem:[#allocation12_spill]] %s4703_s1 }
   0x3   :  { %4751 = sst [smem:[#allocation13_spill]] %s4704_s2 }
   0x4   :  { %4752 = sst [smem:[#allocation14_spill]] %s4705_s3 }
   0x5   :  { %4753 = sst [smem:[#allocation15_spill]] %s4706_s4 }
   0x6   :  { %4754 = sst [smem:[#allocation16_spill]] %s4707_s5 }
   0x7   :  { %4755 = sst [smem:[#allocation17_spill]] %s4708_s6 }
   0x8   :  { %4756 = sst [smem:[#allocation18_spill]] %s4709_s7 }
   0x9   :  { %4757 = sst [smem:[#allocation19_spill]] %s4710_s8 }
   0xa   :  { %4758 = sst [smem:[#allocation20_spill]] %s4711_s9 }
   0xb   :  { %4759 = sst [smem:[#allocation21_spill]] %s4712_s10 }
   0xc   :  { %4760 = sst [smem:[#allocation22_spill]] %s4713_s11 }
   0xd   :  { %4761 = sst [smem:[#allocation23_spill]] %s4714_s12 }
   0xe   :  { %4762 = sst [smem:[#allocation24_spill]] %s4728_s26 }
   0xf   :  { %31 = vsyncpa [#allocation3], 0 }
  0x10   :  { %33 = vsyncpa [#allocation3 + $0x1], 0  ;;  %s4167_s27 = smov 0   ;;  %s4169_s3 = smov 0  }
  0x11   :  { %s4171_s7 = smov 0   ;;  %s4173_s28 = smov 0  }
  0x12 LB: > { %4763 = sst [smem:[#allocation5_spill]] %s4008_s27  ;;  %s4188_s8 = sadd.s32 4294967295, %s4020_s28   ;;  %s4020_s28 = sphi %s4173_s28, %s4795_s28   ;;  %s4016_s7 = sphi %s4171_s7, %s4797_s7   ;;  %s4012_s3 = sphi %s4169_s3, %s4799_s3   ;;  %s4008_s27 = sphi %s4167_s27, %s4798_s27  }
  0x13   : > { %4764 = sst [smem:[#allocation6_spill]] %s4016_s7  ;;  %s3508_s4 = sadd.s32 4294967294, %s4020_s28  }
  0x14   : > { %4765 = sst [smem:[#allocation7_spill]] %s4020_s28  ;;  %s4192_s29 = sadd.s32 1, %s4020_s28  }
  0x15   : > { %4766 = sst [smem:[#allocation8_spill]] %s4192_s29  ;;  %s612_s0 = sadd.s32 1, %s4016_s7 }
  0x16   : > { %s609_s9 = ssub.s32 %s4020_s28, %s4192_s29  ;;  %p622_p0 = scmp.ne.s32.totalorder %s4016_s7, %s4012_s3 }
  0x17   : > { %p610_p1 = scmp.eq.s32.totalorder %s609_s9, 0  ;;  %p623_p2 = scmp.eq.s32.totalorder %s4188_s8, 1 }
  0x18   : > { %p628_p3 = scmp.ne.s32.totalorder %s4012_s3, %s4008_s27  ;;  %p629_p4 = scmp.eq.s32.totalorder %s3508_s4, 1 }
  0x19   : > { %s4203_s30 = scalar_select %p610_p1, %s4016_s7, %s612_s0  }
  0x1a   : > { %p4205_p5 = por %p623_p2, %p622_p0  ;;  %p4209_p6 = por %p629_p4, %p628_p3 }
  0x1b   : > { %4767 = sst [smem:[#allocation9_spill]] %s4203_s30  ;;  %p3511_p7 = scmp.ge.s32.totalorder %s4020_s28, 1 }
  0x1c   : > { %s4769_s5 = scalar_select %p4209_p6, 1, 0 }
  0x1d   : > { %p739_p8 = scmp.lt.s32.totalorder %s4020_s28, 3 }
  0x1e   : > { %4770 = sst [smem:[#allocation10_spill]] %s4769_s5 }
  0x1f   : > { %p740_p9 = pnand %p3511_p7, %p739_p8 }
  0x20   : > { %s4771_s1 = sld [smem:[#allocation15_spill]] (!%p740_p9)  ;;  %p818_p10 = scmp.lt.s32.totalorder (!%p740_p9), %s4188_s8, 1 }
  0x21   : > { %743 = sbr.rel (%p740_p9) target bundleno = 6676 (0x1a14), region = 124  ;;  %s4772_s5 = sld [smem:[#allocation11_spill]] (!%p740_p9) }
  0x22   : > { %s4773_s28 = sld [smem:[#allocation17_spill]] (!%p740_p9)  ;;  %s4025_s10 = smov (!%p740_p9), 120  }
  0x23   : > { %s4775_s29 = sld [smem:[#allocation12_spill]] (!%p740_p9)  ;;  %s4743_s7 = smov (!%p740_p9), 112  }
  0x24   : > { %s4779_s6 = sld [smem:[#allocation19_spill]] (!%p740_p9)  ;;  %s815_s30 = sand.u32 (!%p740_p9), 1, %s4012_s3  }
  0x25   : > { %s4781_s12 = sld [smem:[#allocation23_spill]] (!%p740_p9) }
  0x26   : > { %v839_v0 = vld [vmem:[%s4771_s1 + $0x18] sm:$0xff]  ;;  %v4022_v1 = vmov 0.0   ;;  %v838_v2 = vld [vmem:[%s4771_s1 + $0x10] sm:$0xff]  ;;  %vm4023_vm0 = vmmov 0   ;;  %s4226_s9 = scalar_select %p818_p10, %s4188_s8, 1  ;;  %v837_v3 = vld [vmem:[%s4771_s1 + $0x8] sm:$0xff] }
  0x27   : > { %3662 = vmatprep.subr.mxu0 %v4022_v1  ;;  %3670 = vmatprep.mubr.msk.f32.mxu0 %vm4023_vm0, %v4022_v1  ;;  %v836_v4 = vld [vmem:[%s4771_s1] sm:$0xff]  ;;  %vm859_vm1 = vcmask 261120   ;;  %vm1012_vm2 = vcmask 64512   ;;  %s4783_s11 = sld [smem:[#allocation22_spill]] }
  0x28   : > { %3663 = vmatpush3.msra.mxu0 %v839_v0  ;;  %3699 = vmatprep.subr.mxu1 %v4022_v1  ;;  %s3513_s4 = sshll.u32 %s4226_s9, 3  ;;  %s4774_s26 = smov %s4773_s28  ;;  %v844_v6 = vld [vmem:[%s4773_s28 + $0x18] sm:$0xff] }
  0x29   : > { %3664 = vmatprep.subr.mxu0 %v4022_v1  ;;  %3701 = vmatprep.mubr.msk.f32.mxu1 %vm4023_vm0, %v4022_v1  ;;  %s821_s27 = scalar_lea.vmem %s4772_s5, %s3513_s4  ;;  %v843_v7 = vld [vmem:[%s4774_s26 + $0x10] sm:$0xff]  ;;  %s825_s5 = scalar_lea.vmem %s4775_s29, %s3513_s4  ;;  %v842_v8 = vld [vmem:[%s4774_s26 + $0x8] sm:$0xff]  ;;  %v841_v9 = vld [vmem:[%s4774_s26] sm:$0xff] }
  0x2a   : > { %3665 = vmatpush3.msra.mxu0 %v838_v2  ;;  %v4243_v5 = vld [vmem:[%s821_s27] sm:$0xff]  ;;  %s4776_s27 = sld [smem:[#allocation18_spill]]  ;;  %s4745_s28 = smov 96   ;;  %v847_v49 = vld [vmem:[%s4779_s6 + $0x8] sm:$0xff] }
  0x2b   : > { %3666 = vmatprep.subr.mxu0 %v4022_v1  ;;  %v833_v10 = vld [vmem:[%s825_s5] sm:$0xff]  ;;  %s4777_s5 = sld [smem:[#allocation16_spill]]  ;;  %s4741_s29 = smov 104  }
  0x2c   : > { %3667 = vmatpush3.msra.mxu0 %v837_v3  ;;  %s4778_s4 = sld [smem:[#allocation13_spill]]  ;;  %v846_v53 = vld [vmem:[%s4779_s6] sm:$0xff] }
  0x2d   : > { %3668 = vmatprep.subr.mxu0 %v4022_v1 }
  0x2e   : > { %3669 = vmatpush3.msra.mxu0 %v836_v4 }
  0x2f   : > { %3671 = vmatmul.mubr.msk.f32.vlgmr.msra.gmra.mxu0 %vm859_vm1, %v4243_v5  ;;  %3673 = vmatprep.subr.mxu0 %v4022_v1 }
  0x30   : > { %3674 = vmatpush3.msra.mxu0 %v844_v6  ;;  %3681 = vmatprep.mubr.msk.f32.mxu0 %vm4023_vm0, %v4022_v1  ;;  %v3517_v13 = vld [vmem:[%s4776_s27] ss:$0 sm:$0xff]  ;;  %s4746_s27 = smov 88  }
  0x31   : > { %3675 = vmatprep.subr.mxu0 %v4022_v1  ;;  %v3515_v15 = vld [vmem:[%s4777_s5] ss:$0 sm:$0xff] }
  0x32   : > { %3676 = vmatpush3.msra.mxu0 %v843_v7  ;;  %s828_s0 = scalar_lea.vmem %s4778_s4, %s4226_s9  ;;  %s4739_s4 = smov 72  }
  0x33   : > { %3677 = vmatprep.subr.mxu0 %v4022_v1  ;;  %v4299_v21 = vld [vmem:[%s828_s0] ss:$0 sm:$0xff]  ;;  %s4740_s0 = smov 80  }
  0x34   : > { %3678 = vmatpush3.msra.mxu0 %v842_v8 }
  0x35   : > { %3679 = vmatprep.subr.mxu0 %v4022_v1 }
  0x36   : > { %3680 = vmatpush3.msra.mxu0 %v841_v9 }
  0x37   : > { %3682 = vmatmul.mubr.msk.f32.vlgmr.msra.gmra.mxu0 %vm859_vm1, %v833_v10  ;;  %3684 = vmatprep.subr.mxu0 %v4022_v1 }
  0x38   : > { %3686 = vmatprep.mubr.msk.f32.mxu0 %vm4023_vm0, %v4022_v1 }
  0xef   : > { %v929_v11 = vpop.f32.mrf.mxu0 }
  0xf0   : > { %v4285_v18 = vadd.f32 %v3515_v15, %v929_v11 }
  0xf1   : > { %v3672_v12 = vpop.f32.mrf.mxu0 }
  0xf7   : > { %v1008_v14 = vpop.f32.mrf.mxu0 }
  0xf8   : > { %v4279_v16 = vadd.f32 %v3517_v13, %v1008_v14 }
  0xf9   : > { %v3683_v17 = vpop.f32.mrf.mxu0 }
  0xfa   : > { %1108 = vrot.lane.b32.xlu1 %v4279_v16, %s4745_s28  ;;  %3685 = vmatpush3.xpose.msk.msra.mxu0 %vm1012_vm2, %v4279_v16  ;;  %v848_v17 = vld [vmem:[%s4779_s6 + $0x10] sm:$0xff]  ;;  %s4786_s28 = smov 96  }
  0xfb   : > { %3689 = vmatprep.subr.mxu0 %v4022_v1 }
  0xfd   : > { %3687 = vmatmul.mubr.msk.f32.vlgmr.msra.gmra.mxu0 %vm1012_vm2, %v4285_v18 }
  0xfe   : > { %1186 = vrot.lane.b32.xlu1 %v4279_v16, %s4025_s10  ;;  %3691 = vmatprep.mubr.msk.f32.mxu0 %vm4023_vm0, %v4022_v1 }
 0x16c   : > { %v1109_v19 = vpop.permute.xlu1 %1108 }
 0x16d   : > { %3690 = vmatpush3.msra.mxu0 %v1109_v19 }
 0x16e   : > { %3694 = vmatprep.subr.mxu0 %v4022_v1 }
 0x170   : > { %v1187_v34 = vpop.permute.xlu1 %1186 }
 0x1bd   : > { %v1085_v20 = vpop.f32.mrf.mxu0 }
 0x1be   : > { %v1089_v22 = vmul.f32 0.35355338, %v1085_v20 }
 0x1bf   : > { %v3688_v23 = vpop.f32.mrf.mxu0 }
 0x1c0   : > { %v1096_v24 = vadd.f32 %v4299_v21, %v1089_v22 }
 0x1c2   : > { %v1097_v25 = vsel %vm1012_vm2, %v1096_v24, -inf }
 0x1c3   : > { %1098 = vmax.xlane.f32.xlu0 %v1097_v25 }
 0x24c   : > { %v1099_v26 = vpop.xlane.xlu0 %1098 }
 0x24d   : > { %v1100_v27 = vsub.f32 %v1096_v24, %v1099_v26 }
 0x24f   : > { %v1101_v28 = vmul.f32 1.442695, %v1100_v27 }
 0x251   : > { %3920 = vpow2.f32 %v1101_v28 }
 0x25e   : > { %v3921_v29 = vpop.eup %3920 }
 0x25f   : > { %v1103_v30 = vsel %vm1012_vm2, %v3921_v29, 0.0 }
 0x260   : > { %1104 = vadd.xlane.f32.xlu0 %v1103_v30 }
 0x276   : > { %1184 = vrot.lane.b32.xlu0 %v4285_v18, %s4025_s10 }
 0x2e9   : > { %v1105_v31 = vpop.xlane.xlu0 %1104 }
 0x2ea   : > { %3922 = vrcp.f32 %v1105_v31 }
 0x2ed   : > { %v1185_v35 = vpop.permute.xlu0 %1184 }
 0x2f7   : > { %v3923_v32 = vpop.eup %3922 }
 0x2f8   : > { %v1107_v33 = vmul.f32 %v3923_v32, %v3921_v29 }
 0x2fa   : > { %3692 = vmatmul.mubr.msk.f32.vlgmr.msra.gmra.mxu0 %vm1012_vm2, %v1107_v33  ;;  %v849_v33 = vld [vmem:[%s4779_s6 + $0x18] sm:$0xff]  ;;  %s4791_s6 = sld [smem:[#allocation24_spill]] }
 0x2fb   : > { %3695 = vmatpush3.xpose.msk.msra.mxu0 %vm1012_vm2, %v1187_v34  ;;  %3696 = vmatprep.mubr.msk.f32.mxu0 %vm4023_vm0, %v4022_v1 }
 0x2fc   : > { %3704 = vmatprep.subr.mxu0 %v4022_v1 }
 0x2fe   : > { %3697 = vmatmul.mubr.msk.f32.vlgmr.msra.gmra.mxu0 %vm1012_vm2, %v1185_v35 }
 0x2ff   : > { %3706 = vmatprep.mubr.msk.f32.mxu0 %vm4023_vm0, %v4022_v1  ;;  %3705 = vmatpush3.msra.mxu0 %v847_v49 }
 0x300   : > { %3714 = vmatprep.subr.mxu0 %v4022_v1 }
 0x3ba   : > { %v1180_v36 = vpop.f32.mrf.mxu0 }
 0x3bc   : > { %v3693_v37 = vpop.f32.mrf.mxu0 }
 0x3be   : > { %v1258_v38 = vpop.f32.mrf.mxu0 }
 0x3bf   : > { %v1262_v39 = vmul.f32 0.35355338, %v1258_v38 }
 0x3c0   : > { %v3698_v40 = vpop.f32.mrf.mxu0 }
 0x3c1   : > { %v1263_v41 = vadd.f32 %v4299_v21, %v1262_v39 }
 0x3c3   : > { %v1264_v42 = vsel %vm1012_vm2, %v1263_v41, -inf }
 0x3c4   : > { %1265 = vmax.xlane.f32.xlu1 %v1264_v42 }
 0x3d5   : > { %1275 = vrot.lane.b32.xlu1 %v4279_v16, %s4746_s27  ;;  %s4787_s27 = smov 112  }
 0x3d9   : > { %1497 = vrot.lane.b32.xlu1 %v4285_v18, %s4743_s7 }
 0x44d   : > { %v1266_v43 = vpop.xlane.xlu1 %1265 }
 0x44e   : > { %v1267_v44 = vsub.f32 %v1263_v41, %v1266_v43 }
 0x450   : > { %v1268_v45 = vmul.f32 1.442695, %v1267_v44 }
 0x451   : > { %v1276_v46 = vpop.permute.xlu1 %1275 }
 0x452   : > { %3924 = vpow2.f32 %v1268_v45  ;;  %3700 = vmatpush3.msra.mxu1 %v1276_v46 }
 0x453   : > { %3709 = vmatprep.subr.mxu1 %v4022_v1 }
 0x455   : > { %v1498_v57 = vpop.permute.xlu1 %1497 }
 0x45f   : > { %v3925_v47 = vpop.eup %3924 }
 0x460   : > { %v1270_v48 = vsel %vm1012_vm2, %v3925_v47, 0.0 }
 0x461   : > { %1271 = vadd.xlane.f32.xlu0 %v1270_v48 }
 0x477   : > { %1499 = vrot.lane.b32.xlu0 %v4279_v16, %s4743_s7 }
 0x4ea   : > { %v1272_v50 = vpop.xlane.xlu0 %1271 }
 0x4eb   : > { %3926 = vrcp.f32 %v1272_v50 }
 0x4ee   : > { %v1500_v55 = vpop.permute.xlu0 %1499 }
 0x4f8   : > { %v3927_v51 = vpop.eup %3926 }
 0x4f9   : > { %v1274_v52 = vmul.f32 %v3927_v51, %v3925_v47 }
 0x4fb   : > { %3702 = vmatmul.mubr.msk.f32.vlgmr.msra.gmra.mxu1 %vm1012_vm2, %v1274_v52  ;;  %v2018_v52 = vld [vmem:[%s4781_s12 + $0x18] sm:$0xff] }
 0x4fc   : > { %3710 = vmatpush3.msra.mxu1 %v846_v53  ;;  %3711 = vmatprep.mubr.msk.f32.mxu1 %vm4023_vm0, %v4022_v1  ;;  %v2023_v53 = vld [vmem:[%s4716_s14 + $0x18] sm:$0xff] }
 0x4fd   : > { %3719 = vmatprep.subr.mxu1 %v4022_v1 }
 0x4ff   : > { %3712 = vmatmul.mubr.msk.f32.vlgmr.msra.gmra.mxu1 %vm1012_vm2, %v1180_v36 }
 0x500   : > { %3721 = vmatprep.mubr.msk.f32.mxu1 %vm4023_vm0, %v4022_v1 }
 0x5bb   : > { %v1347_v54 = vpop.f32.mrf.mxu1 }
 0x5bc   : > { %3707 = vmatmul.mubr.msk.f32.vlgmr.msra.gmra.mxu0 %vm1012_vm2, %v1347_v54  ;;  %v2022_v54 = vld [vmem:[%s4716_s14 + $0x10] sm:$0xff] }
 0x5bd   : > { %3715 = vmatpush3.xpose.msk.msra.mxu0 %vm1012_vm2, %v1500_v55  ;;  %v3703_v56 = vpop.f32.mrf.mxu1  ;;  %3716 = vmatprep.mubr.msk.f32.mxu0 %vm4023_vm0, %v4022_v1  ;;  %v2016_v55 = vld [vmem:[%s4781_s12 + $0x8] sm:$0xff] }
 0x5be   : > { %3724 = vmatprep.subr.mxu0 %v4022_v1  ;;  %v2021_v56 = vld [vmem:[%s4716_s14 + $0x8] sm:$0xff] }
 0x5bf   : > { %v4343_v58 = vpop.f32.mrf.mxu1 }
 0x5c0   : > { %3717 = vmatmul.mubr.msk.f32.vlgmr.msra.gmra.mxu0 %vm1012_vm2, %v1498_v57  ;;  %v2015_v57 = vld [vmem:[%s4781_s12] sm:$0xff] }
 0x5c1   : > { %v3713_v59 = vpop.f32.mrf.mxu1  ;;  %3726 = vmatprep.mubr.msk.f32.mxu0 %vm4023_vm0, %v4022_v1  ;;  %3725 = vmatpush3.msra.mxu0 %v848_v17 }
 0x5c2   : > { %3734 = vmatprep.subr.mxu0 %v4022_v1 }
 0x67c   : > { %v1420_v60 = vpop.f32.mrf.mxu0 }
 0x67e   : > { %v3708_v61 = vpop.f32.mrf.mxu0 }
 0x680   : > { %v1571_v62 = vpop.f32.mrf.mxu0 }
 0x681   : > { %v1575_v63 = vmul.f32 0.35355338, %v1571_v62 }
 0x682   : > { %v3718_v0 = vpop.f32.mrf.mxu0 }
 0x683   : > { %v1576_v2 = vadd.f32 %v4299_v21, %v1575_v63 }
 0x685   : > { %v1577_v3 = vsel %vm1012_vm2, %v1576_v2, -inf }
 0x686   : > { %1578 = vmax.xlane.f32.xlu1 %v1577_v3 }
 0x697   : > { %1588 = vrot.lane.b32.xlu1 %v4279_v16, %s4740_s0  ;;  %s3512_s0 = sshll.u32 %s815_s30, 3 }
 0x69b   : > { %1738 = vrot.lane.b32.xlu1 %v4285_v18, %s4741_s29 }
 0x70f   : > { %v1579_v4 = vpop.xlane.xlu1 %1578 }
 0x710   : > { %v1580_v6 = vsub.f32 %v1576_v2, %v1579_v4  ;;  %v3538_v2 = vld [vmem:[%s4783_s11] ss:$0 sm:$0xff] }
 0x712   : > { %v1581_v7 = vmul.f32 1.442695, %v1580_v6  ;;  %v3539_v6 = vld [vmem:[%s4715_s13] ss:$0 sm:$0xff] }
 0x713   : > { %v1589_v8 = vpop.permute.xlu1 %1588 }
 0x714   : > { %3928 = vpow2.f32 %v1581_v7  ;;  %3720 = vmatpush3.msra.mxu1 %v1589_v8  ;;  %v3541_v7 = vld [vmem:[%s4717_s15] ss:$0 sm:$0xff] }
 0x715   : > { %3729 = vmatprep.subr.mxu1 %v4022_v1 }
 0x717   : > { %v1739_v15 = vpop.permute.xlu1 %1738 }
 0x721   : > { %v3929_v9 = vpop.eup %3928 }
 0x722   : > { %v1583_v10 = vsel %vm1012_vm2, %v3929_v9, 0.0 }
 0x723   : > { %1584 = vadd.xlane.f32.xlu0 %v1583_v10 }
 0x739   : > { %1740 = vrot.lane.b32.xlu0 %v4279_v16, %s4741_s29  ;;  %s4788_s29 = smov 104  }
 0x7ac   : > { %v1585_v11 = vpop.xlane.xlu0 %1584 }
 0x7ad   : > { %3930 = vrcp.f32 %v1585_v11 }
 0x7b0   : > { %v1741_v14 = vpop.permute.xlu0 %1740 }
 0x7ba   : > { %v3931_v12 = vpop.eup %3930 }
 0x7bb   : > { %v1587_v13 = vmul.f32 %v3931_v12, %v3929_v9 }
 0x7bd   : > { %3722 = vmatmul.mubr.msk.f32.vlgmr.msra.gmra.mxu1 %vm1012_vm2, %v1587_v13 }
 0x7be   : > { %3730 = vmatpush3.xpose.msk.msra.mxu1 %vm1012_vm2, %v1741_v14  ;;  %3731 = vmatprep.mubr.msk.f32.mxu1 %vm4023_vm0, %v4022_v1 }
 0x7bf   : > { %3739 = vmatprep.subr.mxu1 %v4022_v1 }
 0x7c1   : > { %3732 = vmatmul.mubr.msk.f32.vlgmr.msra.gmra.mxu1 %vm1012_vm2, %v1739_v15 }
 0x7c2   : > { %3741 = vmatprep.mubr.msk.f32.mxu1 %vm4023_vm0, %v4022_v1  ;;  %3740 = vmatpush3.msra.mxu1 %v849_v33 }
 0x7c3   : > { %3755 = vmatprep.subr.mxu1 %v4022_v1 }
 0x87d   : > { %v1660_v18 = vpop.f32.mrf.mxu1 }
 0x87e   : > { %3727 = vmatmul.mubr.msk.f32.vlgmr.msra.gmra.mxu0 %vm1012_vm2, %v1660_v18 }
 0x87f   : > { %v3723_v19 = vpop.f32.mrf.mxu1  ;;  %3736 = vmatprep.mubr.msk.f32.mxu0 %vm4023_vm0, %v4022_v1 }
 0x881   : > { %v1812_v20 = vpop.f32.mrf.mxu1 }
 0x882   : > { %v1816_v22 = vmul.f32 0.35355338, %v1812_v20 }
 0x883   : > { %v3733_v23 = vpop.f32.mrf.mxu1 }
 0x884   : > { %v1817_v24 = vadd.f32 %v4299_v21, %v1816_v22  ;;  %v1494_v21 = vadd.f32 %v4343_v58, %v1420_v60  ;;  %v2020_v58 = vld [vmem:[%s4716_s14] sm:$0xff] }
 0x886   : > { %v1818_v25 = vsel %vm1012_vm2, %v1817_v24, -inf }
 0x887   : > { %1819 = vmax.xlane.f32.xlu1 %v1818_v25 }
 0x898   : > { %1829 = vrot.lane.b32.xlu1 %v4279_v16, %s4739_s4  ;;  %s4780_s4 = sld [smem:[#allocation20_spill]] }
 0x89e   : > { %v3536_v40 = vld [vmem:[%s4780_s4] ss:$0 sm:$0xff]  ;;  %s4782_s4 = sld [smem:[#allocation21_spill]] }
 0x8a4   : > { %v3537_v63 = vld [vmem:[%s4782_s4] ss:$0 sm:$0xff]  ;;  %s4784_s4 = sld [smem:[#allocation14_spill]] }
 0x8aa   : > { %s831_s5 = scalar_lea.vmem %s4784_s4, %s4226_s9  ;;  %s4785_s9 = smov 88  }
 0x8ab   : > { %v4474_v18 = vld [vmem:[%s831_s5] ss:$0 sm:$0xff]  ;;  %s4789_s4 = smov 80  }
 0x910   : > { %v1820_v26 = vpop.xlane.xlu1 %1819 }
 0x911   : > { %v1821_v27 = vsub.f32 %v1817_v24, %v1820_v26 }
 0x913   : > { %v1822_v28 = vmul.f32 1.442695, %v1821_v27 }
 0x914   : > { %v1830_v29 = vpop.permute.xlu1 %1829 }
 0x915   : > { %3932 = vpow2.f32 %v1822_v28  ;;  %3735 = vmatpush3.msra.mxu0 %v1830_v29 }
 0x916   : > { %3744 = vmatprep.subr.mxu0 %v4022_v1 }
 0x922   : > { %v3933_v30 = vpop.eup %3932 }
 0x923   : > { %v1824_v31 = vsel %vm1012_vm2, %v3933_v30, 0.0 }
 0x924   : > { %1825 = vadd.xlane.f32.xlu0 %v1824_v31 }
 0x93e   : > { %v1733_v32 = vpop.f32.mrf.mxu0 }
 0x93f   : > { %v1737_v16 = vadd.f32 %v1733_v32, %v1494_v21 }
 0x940   : > { %v3728_v34 = vpop.f32.mrf.mxu0 }
 0x9ad   : > { %v1826_v35 = vpop.xlane.xlu0 %1825 }
 0x9ae   : > { %3934 = vrcp.f32 %v1826_v35 }
 0x9bb   : > { %v3935_v36 = vpop.eup %3934 }
 0x9bc   : > { %v1828_v37 = vmul.f32 %v3935_v36, %v3933_v30 }
 0x9be   : > { %3737 = vmatmul.mubr.msk.f32.vlgmr.msra.gmra.mxu0 %vm1012_vm2, %v1828_v37 }
 0x9bf   : > { %3752 = vmatprep.mubr.msk.f32.mxu0 %vm4023_vm0, %v4022_v1  ;;  %3745 = vmatpush3.msra.mxu0 %v2018_v52 }
 0x9c0   : > { %3746 = vmatprep.subr.mxu0 %v4022_v1 }
 0xa7e   : > { %v1901_v38 = vpop.f32.mrf.mxu0 }
 0xa7f   : > { %3742 = vmatmul.mubr.msk.f32.vlgmr.msra.gmra.mxu1 %vm1012_vm2, %v1901_v38 }
 0xa80   : > { %v3738_v39 = vpop.f32.mrf.mxu0  ;;  %3763 = vmatprep.mubr.msk.f32.mxu1 %vm4023_vm0, %v4022_v1  ;;  %3756 = vmatpush3.msra.mxu1 %v2023_v53 }
 0xa81   : > { %3757 = vmatprep.subr.mxu1 %v4022_v1 }
 0xa82   : > { %3758 = vmatpush3.msra.mxu1 %v2022_v54 }
 0xa83   : > { %3759 = vmatprep.subr.mxu1 %v4022_v1 }
 0xa84   : > { %3760 = vmatpush3.msra.mxu1 %v2021_v56 }
 0xa85   : > { %3761 = vmatprep.subr.mxu1 %v4022_v1 }
 0xa86   : > { %3762 = vmatpush3.msra.mxu1 %v2020_v58 }
 0xa87   : > { %3771 = vmatprep.subr.mxu1 %v4022_v1 }
 0xb3f   : > { %v1974_v41 = vpop.f32.mrf.mxu1 }
 0xb40   : > { %v1978_v42 = vadd.f32 %v1974_v41, %v1737_v16 }
 0xb41   : > { %v3743_v43 = vpop.f32.mrf.mxu1 }
 0xb42   : > { %v1985_v44 = vadd.f32 %v3536_v40, %v1978_v42 }
 0xb44   : > { %v1986_v45 = vadd.f32 %v1985_v44, %v4243_v5  ;;  %v2017_v5 = vld [vmem:[%s4781_s12 + $0x10] sm:$0xff]  ;;  %s3406_s12 = scalar_lea.sflag [#allocation3], %s815_s30 }
 0xb45   : > { %3747 = vmatpush3.msra.mxu0 %v2017_v5 }
 0xb46   : > { %v1987_v46 = vsel %vm859_vm1, %v1986_v45, 0.0  ;;  %3748 = vmatprep.subr.mxu0 %v4022_v1 }
 0xb47   : > { %1988 = vadd.xlane.f32.xlu0 %v1987_v46  ;;  %3749 = vmatpush3.msra.mxu0 %v2016_v55  ;;  %v2026_v46 = vld [vmem:[%s4718_s16 + $0x8] sm:$0xff] }
 0xb48   : > { %3750 = vmatprep.subr.mxu0 %v4022_v1 }
 0xb49   : > { %3751 = vmatpush3.msra.mxu0 %v2015_v57 }
 0xb4a   : > { %3766 = vmatprep.subr.mxu0 %v4022_v1 }
 0xbd0   : > { %v1989_v47 = vpop.xlane.xlu0 %1988 }
 0xbd1   : > { %v1991_v48 = vmul.f32 0.03125, %v1989_v47 }
 0xbd3   : > { %v1992_v49 = vsub.f32 %v1986_v45, %v1991_v48  ;;  %v2025_v45 = vld [vmem:[%s4718_s16] sm:$0xff] }
 0xbd5   : > { %v1993_v50 = vmul.f32 %v1992_v49, %v1992_v49 }
 0xbd7   : > { %v1994_v51 = vsel %vm859_vm1, %v1993_v50, 0.0 }
 0xbd8   : > { %1995 = vadd.xlane.f32.xlu0 %v1994_v51 }
 0xc61   : > { %v1996_v59 = vpop.xlane.xlu0 %1995 }
 0xc62   : > { %v1997_v60 = vmul.f32 0.03125, %v1996_v59 }
 0xc64   : > { %v1998_v61 = vadd.f32 1e-12, %v1997_v60 }
 0xc66   : > { %3936 = vrsqrt.f32 %v1998_v61 }
 0xc73   : > { %v3937_v62 = vpop.eup %3936 }
 0xc74   : > { %v2000_v0 = vmul.f32 %v3937_v62, %v1992_v49 }
 0xc76   : > { %v2007_v3 = vmul.f32 %v3537_v63, %v2000_v0 }
 0xc78   : > { %v4434_v4 = vadd.f32 %v3538_v2, %v2007_v3 }
 0xc7a   : > { %3753 = vmatmul.mubr.msk.f32.vlgmr.msra.gmra.mxu0 %vm859_vm1, %v4434_v4  ;;  %3764 = vmatmul.mubr.msk.f32.vlgmr.msra.gmra.mxu1 %vm859_vm1, %v4434_v4 }
 0xc7b   : > { %3768 = vmatprep.mubr.msk.f32.mxu0 %vm4023_vm0, %v4022_v1  ;;  %3773 = vmatprep.mubr.msk.f32.mxu1 %vm4023_vm0, %v4022_v1 }
 0xd3a   : > { %v2107_v8 = vpop.f32.mrf.mxu0  ;;  %v2183_v9 = vpop.f32.mrf.mxu1 }
 0xd3b   : > { %v4450_v10 = vadd.f32 %v3539_v6, %v2107_v8  ;;  %v4452_v11 = vadd.f32 %v3541_v7, %v2183_v9 }
 0xd3c   : > { %v3754_v12 = vpop.f32.mrf.mxu0  ;;  %v3765_v13 = vpop.f32.mrf.mxu1 }
 0xd3d   : > { %2360 = vrot.lane.b32.xlu0 %v4452_v11, %s4025_s10  ;;  %3767 = vmatpush3.xpose.msk.msra.mxu0 %vm1012_vm2, %v4452_v11  ;;  %v2027_v13 = vld [vmem:[%s4718_s16 + $0x10] sm:$0xff] }
 0xd3e   : > { %2358 = vrot.lane.b32.xlu1 %v4450_v10, %s4025_s10  ;;  %3776 = vmatprep.subr.mxu0 %v4022_v1 }
 0xd40   : > { %3769 = vmatmul.mubr.msk.f32.vlgmr.msra.gmra.mxu0 %vm1012_vm2, %v4450_v10 }
 0xd41   : > { %3778 = vmatprep.mubr.msk.f32.mxu0 %vm4023_vm0, %v4022_v1 }
 0xdaf   : > { %v2361_v14 = vpop.permute.xlu0 %2360 }
 0xdb0   : > { %3777 = vmatpush3.xpose.msk.msra.mxu0 %vm1012_vm2, %v2361_v14  ;;  %v2359_v15 = vpop.permute.xlu1 %2358 }
 0xdb1   : > { %3786 = vmatprep.subr.mxu0 %v4022_v1 }
 0xdb3   : > { %3779 = vmatmul.mubr.msk.f32.vlgmr.msra.gmra.mxu0 %vm1012_vm2, %v2359_v15 }
 0xdb4   : > { %3788 = vmatprep.mubr.msk.f32.mxu0 %vm4023_vm0, %v4022_v1  ;;  %3787 = vmatpush3.msra.mxu0 %v2026_v46 }
 0xdb5   : > { %3796 = vmatprep.subr.mxu0 %v4022_v1 }
 0xe00   : > { %v2259_v17 = vpop.f32.mrf.mxu0 }
 0xe01   : > { %v2263_v19 = vmul.f32 0.35355338, %v2259_v17 }
 0xe02   : > { %v3770_v20 = vpop.f32.mrf.mxu0 }
 0xe03   : > { %v2270_v22 = vadd.f32 %v4474_v18, %v2263_v19 }
 0xe05   : > { %v2271_v23 = vsel %vm1012_vm2, %v2270_v22, -inf }
 0xe06   : > { %2272 = vmax.xlane.f32.xlu1 %v2271_v23 }
 0xe73   : > { %v2432_v24 = vpop.f32.mrf.mxu0 }
 0xe74   : > { %v2436_v25 = vmul.f32 0.35355338, %v2432_v24 }
 0xe75   : > { %v3780_v26 = vpop.f32.mrf.mxu0 }
 0xe76   : > { %v2437_v27 = vadd.f32 %v4474_v18, %v2436_v25 }
 0xe78   : > { %v2438_v28 = vsel %vm1012_vm2, %v2437_v27, -inf }
 0xe79   : > { %2439 = vmax.xlane.f32.xlu0 %v2438_v28 }
 0xe8f   : > { %v2273_v29 = vpop.xlane.xlu1 %2272  ;;  %2449 = vrot.lane.b32.xlu0 %v4452_v11, %s4785_s9  ;;  %s3569_s9 = sshll.u32 %s4188_s8, 7 }
 0xe90   : > { %v2274_v30 = vsub.f32 %v2270_v22, %v2273_v29  ;;  %s3417_s11 = scalar_lea.hbm %s4791_s6, %s3569_s9 }
 0xe92   : > { %v2275_v31 = vmul.f32 1.442695, %v2274_v30 }
 0xe94   : > { %3938 = vpow2.f32 %v2275_v31 }
 0xea1   : > { %v3939_v21 = vpop.eup %3938 }
 0xea2   : > { %v2277_v32 = vsel %vm1012_vm2, %v3939_v21, 0.0 }
 0xea3   : > { %2278 = vadd.xlane.f32.xlu1 %v2277_v32 }
 0xf02   : > { %v2440_v33 = vpop.xlane.xlu0 %2439 }
 0xf03   : > { %v2441_v16 = vsub.f32 %v2437_v27, %v2440_v33 }
 0xf05   : > { %v2442_v34 = vmul.f32 1.442695, %v2441_v16 }
 0xf06   : > { %v2450_v42 = vpop.permute.xlu0 %2449 }
 0xf07   : > { %3940 = vpow2.f32 %v2442_v34 }
 0xf14   : > { %v3941_v35 = vpop.eup %3940 }
 0xf15   : > { %v2444_v36 = vsel %vm1012_vm2, %v3941_v35, 0.0 }
 0xf16   : > { %2445 = vadd.xlane.f32.xlu1 %v2444_v36 }
 0xf27   : > { %2282 = vrot.lane.b32.xlu1 %v4452_v11, %s4786_s28  ;;  %s4790_s28 = smov 72  }
 0xf2b   : > { %2673 = vrot.lane.b32.xlu1 %v4452_v11, %s4787_s27 }
 0xf2c   : > { %v2279_v37 = vpop.xlane.xlu1 %2278 }
 0xf2d   : > { %3942 = vrcp.f32 %v2279_v37 }
 0xf2f   : > { %2671 = vrot.lane.b32.xlu1 %v4450_v10, %s4787_s27 }
 0xf3a   : > { %v3943_v39 = vpop.eup %3942 }
 0xf3b   : > { %v2281_v41 = vmul.f32 %v3943_v39, %v3939_v21 }
 0xf9f   : > { %v2446_v38 = vpop.xlane.xlu1 %2445 }
 0xfa0   : > { %3944 = vrcp.f32 %v2446_v38 }
 0xfa3   : > { %v2283_v40 = vpop.permute.xlu1 %2282 }
 0xfa4   : > { %3772 = vmatpush3.msra.mxu1 %v2283_v40 }
 0xfa5   : > { %3774 = vmatmul.mubr.msk.f32.vlgmr.msra.gmra.mxu1 %vm1012_vm2, %v2281_v41  ;;  %3781 = vmatprep.subr.mxu1 %v4022_v1 }
 0xfa6   : > { %3782 = vmatpush3.msra.mxu1 %v2450_v42  ;;  %3783 = vmatprep.mubr.msk.f32.mxu1 %vm4023_vm0, %v4022_v1 }
 0xfa7   : > { %3791 = vmatprep.subr.mxu1 %v4022_v1  ;;  %v2674_v49 = vpop.permute.xlu1 %2673 }
 0xfab   : > { %v2672_v52 = vpop.permute.xlu1 %2671 }
 0xfad   : > { %v3945_v43 = vpop.eup %3944 }
 0xfae   : > { %v2448_v44 = vmul.f32 %v3945_v43, %v3941_v35  ;;  %v3560_v35 = vld [vmem:[%s4719_s17] ss:$0 sm:$0xff] }
 0xfb0   : > { %3784 = vmatmul.mubr.msk.f32.vlgmr.msra.gmra.mxu1 %vm1012_vm2, %v2448_v44 }
 0xfb1   : > { %3793 = vmatprep.mubr.msk.f32.mxu1 %vm4023_vm0, %v4022_v1  ;;  %3792 = vmatpush3.msra.mxu1 %v2025_v45 }
 0xfb2   : > { %3801 = vmatprep.subr.mxu1 %v4022_v1 }
0x1065   : > { %v2354_v47 = vpop.f32.mrf.mxu1 }
0x1066   : > { %3794 = vmatmul.mubr.msk.f32.vlgmr.msra.gmra.mxu1 %vm1012_vm2, %v2354_v47  ;;  %v3191_v47 = vld [vmem:[%s4722_s20 + $0x18] sm:$0xff] }
0x1067   : > { %v3775_v48 = vpop.f32.mrf.mxu1  ;;  %3803 = vmatprep.mubr.msk.f32.mxu1 %vm4023_vm0, %v4022_v1 }
0x1068   : > { %v3190_v48 = vld [vmem:[%s4722_s20 + $0x10] sm:$0xff] }
0x1070   : > { %v2521_v50 = vpop.f32.mrf.mxu1 }
0x1071   : > { %3789 = vmatmul.mubr.msk.f32.vlgmr.msra.gmra.mxu0 %vm1012_vm2, %v2521_v50 }
0x1072   : > { %3797 = vmatpush3.xpose.msk.msra.mxu0 %vm1012_vm2, %v2674_v49  ;;  %v3785_v51 = vpop.f32.mrf.mxu1  ;;  %3798 = vmatprep.mubr.msk.f32.mxu0 %vm4023_vm0, %v4022_v1  ;;  %v3188_v49 = vld [vmem:[%s4722_s20] sm:$0xff] }
0x1073   : > { %3806 = vmatprep.subr.mxu0 %v4022_v1 }
0x1075   : > { %3799 = vmatmul.mubr.msk.f32.vlgmr.msra.gmra.mxu0 %vm1012_vm2, %v2672_v52 }
0x1076   : > { %3808 = vmatprep.mubr.msk.f32.mxu0 %vm4023_vm0, %v4022_v1  ;;  %3807 = vmatpush3.msra.mxu0 %v2027_v13  ;;  %v3193_v13 = vld [vmem:[%s4724_s22] sm:$0xff] }
0x1077   : > { %3816 = vmatprep.subr.mxu0 %v4022_v1 }
0x1126   : > { %v2667_v53 = vpop.f32.mrf.mxu1 }
0x1128   : > { %v3795_v5 = vpop.f32.mrf.mxu1 }
0x1129   : > { %v3561_v5 = vld [vmem:[%s4720_s18] ss:$0 sm:$0xff] }
0x1131   : > { %v2594_v54 = vpop.f32.mrf.mxu0 }
0x1132   : > { %v2668_v55 = vadd.f32 %v2667_v53, %v2594_v54 }
0x1133   : > { %v3790_v56 = vpop.f32.mrf.mxu0 }
0x1135   : > { %v2745_v57 = vpop.f32.mrf.mxu0 }
0x1136   : > { %v2749_v58 = vmul.f32 0.35355338, %v2745_v57 }
0x1137   : > { %v3800_v59 = vpop.f32.mrf.mxu0 }
0x1138   : > { %v2750_v60 = vadd.f32 %v4474_v18, %v2749_v58  ;;  %v3208_v58 = vld [vmem:[%s4724_s22 + $0x78] sm:$0xff]  ;;  %v3207_v59 = vld [vmem:[%s4724_s22 + $0x70] sm:$0xff] }
0x113a   : > { %v2751_v61 = vsel %vm1012_vm2, %v2750_v60, -inf }
0x113b   : > { %2752 = vmax.xlane.f32.xlu1 %v2751_v61  ;;  %v3205_v61 = vld [vmem:[%s4724_s22 + $0x60] sm:$0xff] }
0x114c   : > { %2914 = vrot.lane.b32.xlu1 %v4452_v11, %s4788_s29 }
0x1150   : > { %2912 = vrot.lane.b32.xlu1 %v4450_v10, %s4788_s29  ;;  %s4031_s29 = smov [#allocation2]  }
0x11c4   : > { %v2753_v62 = vpop.xlane.xlu1 %2752 }
0x11c5   : > { %v2754_v63 = vsub.f32 %v2750_v60, %v2753_v62  ;;  %v3206_v60 = vld [vmem:[%s4724_s22 + $0x68] sm:$0xff]  ;;  %v3204_v62 = vld [vmem:[%s4724_s22 + $0x58] sm:$0xff] }
0x11c7   : > { %v2755_v0 = vmul.f32 1.442695, %v2754_v63  ;;  %v3203_v63 = vld [vmem:[%s4724_s22 + $0x50] sm:$0xff] }
0x11c8   : > { %v2915_v9 = vpop.permute.xlu1 %2914 }
0x11c9   : > { %3946 = vpow2.f32 %v2755_v0  ;;  %v3202_v0 = vld [vmem:[%s4724_s22 + $0x48] sm:$0xff] }
0x11cc   : > { %v2913_v12 = vpop.permute.xlu1 %2912 }
0x11d6   : > { %v3947_v2 = vpop.eup %3946 }
0x11d7   : > { %v2757_v3 = vsel %vm1012_vm2, %v3947_v2, 0.0 }
0x11d8   : > { %2758 = vadd.xlane.f32.xlu0 %v2757_v3  ;;  %v3200_v3 = vld [vmem:[%s4724_s22 + $0x38] sm:$0xff] }
0x11ee   : > { %2762 = vrot.lane.b32.xlu0 %v4452_v11, %s4789_s4  ;;  %s3964_s4 = sshll.u32 %s4031_s29, 4  ;;  %s3965_s4 = int_to_ptr.vmem [resolvable:$false] %s3964_s4 }
0x11ef   : > { %s3966_s8 = scalar_lea.vmem %s3965_s4, 256 }
0x1261   : > { %v2759_v6 = vpop.xlane.xlu0 %2758 }
0x1262   : > { %3948 = vrcp.f32 %v2759_v6  ;;  %v3199_v6 = vld [vmem:[%s4724_s22 + $0x30] sm:$0xff] }
0x1265   : > { %v2763_v7 = vpop.permute.xlu0 %2762 }
0x1266   : > { %3802 = vmatpush3.msra.mxu1 %v2763_v7  ;;  %v3198_v7 = vld [vmem:[%s4724_s22 + $0x28] sm:$0xff] }
0x1267   : > { %3811 = vmatprep.subr.mxu1 %v4022_v1 }
0x126f   : > { %v3949_v8 = vpop.eup %3948 }
0x1270   : > { %v2761_v10 = vmul.f32 %v3949_v8, %v3947_v2  ;;  %v3201_v2 = vld [vmem:[%s4724_s22 + $0x40] sm:$0xff] }
0x1271   : > { %v3197_v8 = vld [vmem:[%s4724_s22 + $0x20] sm:$0xff] }
0x1272   : > { %3804 = vmatmul.mubr.msk.f32.vlgmr.msra.gmra.mxu1 %vm1012_vm2, %v2761_v10  ;;  %v3195_v10 = vld [vmem:[%s4724_s22 + $0x10] sm:$0xff] }
0x1273   : > { %3812 = vmatpush3.xpose.msk.msra.mxu1 %vm1012_vm2, %v2915_v9  ;;  %3813 = vmatprep.mubr.msk.f32.mxu1 %vm4023_vm0, %v4022_v1  ;;  %v3196_v9 = vld [vmem:[%s4724_s22 + $0x18] sm:$0xff] }
0x1274   : > { %3821 = vmatprep.subr.mxu1 %v4022_v1 }
0x1276   : > { %3814 = vmatmul.mubr.msk.f32.vlgmr.msra.gmra.mxu1 %vm1012_vm2, %v2913_v12  ;;  %v3194_v12 = vld [vmem:[%s4724_s22 + $0x8] sm:$0xff] }
0x1277   : > { %3823 = vmatprep.mubr.msk.f32.mxu1 %vm4023_vm0, %v4022_v1 }
0x1332   : > { %v2834_v14 = vpop.f32.mrf.mxu1 }
0x1333   : > { %3809 = vmatmul.mubr.msk.f32.vlgmr.msra.gmra.mxu0 %vm1012_vm2, %v2834_v14  ;;  %v3563_v14 = vld [vmem:[%s4723_s21] ss:$0 sm:$0xff] }
0x1334   : > { %v3805_v15 = vpop.f32.mrf.mxu1  ;;  %3818 = vmatprep.mubr.msk.f32.mxu0 %vm4023_vm0, %v4022_v1 }
0x1336   : > { %v2986_v17 = vpop.f32.mrf.mxu1 }
0x1337   : > { %v2990_v19 = vmul.f32 0.35355338, %v2986_v17 }
0x1338   : > { %v3815_v20 = vpop.f32.mrf.mxu1 }
0x1339   : > { %v2991_v22 = vadd.f32 %v4474_v18, %v2990_v19  ;;  %v2028_v18 = vld [vmem:[%s4718_s16 + $0x18] sm:$0xff] }
0x133a   : > { %3822 = vmatpush3.msra.mxu1 %v2028_v18 }
0x133b   : > { %v2992_v23 = vsel %vm1012_vm2, %v2991_v22, -inf  ;;  %3837 = vmatprep.subr.mxu1 %v4022_v1 }
0x133c   : > { %2993 = vmax.xlane.f32.xlu0 %v2992_v23 }
0x1352   : > { %3003 = vrot.lane.b32.xlu0 %v4452_v11, %s4790_s28  ;;  %s817_s28 = scalar_lea.vmem [#allocation2], %s3512_s0 }
0x1353   : > { %s3419_s27 = sshll.u32 %s817_s28, 4  ;;  %s3420_s27 = int_to_ptr.vmem [resolvable:$true] %s3419_s27 }
0x1354   : > { %s3960_s10 = scalar_lea.vmem %s3420_s27, 128  ;;  %p3967_p0 = scmp.lt.s32.totalorder %s3420_s27, %s3965_s4 }
0x1355   : > { %p3961_p11 = scmp.ne.s32.totalorder %s3420_s27, %s3960_s10  ;;  %p3968_p1 = scmp.lt.s32.totalorder %s3966_s8, %s3960_s10 }
0x1357   : > { %p3962_p12 = pnand %p3961_p11, %p4205_p5  ;;  %p3969_p2 = por %p3968_p1, %p3967_p0 }
0x1359   : > { %p3963_p13 = pneg %p3962_p12 }
0x135b   : > { %p3970_p3 = pnand %p3969_p2, %p3963_p13 }
0x13c5   : > { %v2994_v24 = vpop.xlane.xlu0 %2993 }
0x13c6   : > { %v2995_v25 = vsub.f32 %v2991_v22, %v2994_v24 }
0x13c8   : > { %v2996_v26 = vmul.f32 1.442695, %v2995_v25 }
0x13c9   : > { %v3004_v27 = vpop.permute.xlu0 %3003 }
0x13ca   : > { %3950 = vpow2.f32 %v2996_v26  ;;  %3817 = vmatpush3.msra.mxu0 %v3004_v27 }
0x13cb   : > { %3826 = vmatprep.subr.mxu0 %v4022_v1 }
0x13d7   : > { %v3951_v28 = vpop.eup %3950 }
0x13d8   : > { %v2998_v29 = vsel %vm1012_vm2, %v3951_v28, 0.0 }
0x13d9   : > { %2999 = vadd.xlane.f32.xlu1 %v2998_v29 }
0x13f3   : > { %v2907_v30 = vpop.f32.mrf.mxu0 }
0x13f4   : > { %v2911_v31 = vadd.f32 %v2907_v30, %v2668_v55  ;;  %v3562_v55 = vld [vmem:[%s4721_s19] ss:$0 sm:$0xff] }
0x13f5   : > { %v3810_v11 = vpop.f32.mrf.mxu0 }
0x1462   : > { %v3000_v21 = vpop.xlane.xlu1 %2999 }
0x1463   : > { %3952 = vrcp.f32 %v3000_v21 }
0x1470   : > { %v3953_v32 = vpop.eup %3952 }
0x1471   : > { %v3002_v33 = vmul.f32 %v3953_v32, %v3951_v28 }
0x1473   : > { %3819 = vmatmul.mubr.msk.f32.vlgmr.msra.gmra.mxu0 %vm1012_vm2, %v3002_v33 }
0x1474   : > { %3834 = vmatprep.mubr.msk.f32.mxu0 %vm4023_vm0, %v4022_v1  ;;  %3827 = vmatpush3.msra.mxu0 %v3191_v47 }
0x1475   : > { %3828 = vmatprep.subr.mxu0 %v4022_v1 }
0x1476   : > { %3829 = vmatpush3.msra.mxu0 %v3190_v48 }
0x1477   : > { %3830 = vmatprep.subr.mxu0 %v4022_v1 }
0x1533   : > { %v3075_v16 = vpop.f32.mrf.mxu0 }
0x1534   : > { %3824 = vmatmul.mubr.msk.f32.vlgmr.msra.gmra.mxu1 %vm1012_vm2, %v3075_v16 }
0x1535   : > { %v3820_v34 = vpop.f32.mrf.mxu0  ;;  %3869 = vmatprep.mubr.msk.f32.mxu1 %vm4023_vm0, %v4022_v1  ;;  %3838 = vmatpush3.msra.mxu1 %v3208_v58 }
0x1536   : > { %3839 = vmatprep.subr.mxu1 %v4022_v1 }
0x1537   : > { %3840 = vmatpush3.msra.mxu1 %v3207_v59 }
0x1538   : > { %3841 = vmatprep.subr.mxu1 %v4022_v1 }
0x1539   : > { %3842 = vmatpush3.msra.mxu1 %v3206_v60 }
0x153a   : > { %3843 = vmatprep.subr.mxu1 %v4022_v1 }
0x153b   : > { %3844 = vmatpush3.msra.mxu1 %v3205_v61 }
0x153c   : > { %3845 = vmatprep.subr.mxu1 %v4022_v1 }
0x153d   : > { %3846 = vmatpush3.msra.mxu1 %v3204_v62 }
0x153e   : > { %3847 = vmatprep.subr.mxu1 %v4022_v1 }
0x153f   : > { %3848 = vmatpush3.msra.mxu1 %v3203_v63 }
0x1540   : > { %3849 = vmatprep.subr.mxu1 %v4022_v1 }
0x1541   : > { %3850 = vmatpush3.msra.mxu1 %v3202_v0 }
0x1542   : > { %3851 = vmatprep.subr.mxu1 %v4022_v1 }
0x1543   : > { %3852 = vmatpush3.msra.mxu1 %v3201_v2 }
0x1544   : > { %3853 = vmatprep.subr.mxu1 %v4022_v1 }
0x1545   : > { %3854 = vmatpush3.msra.mxu1 %v3200_v3 }
0x1546   : > { %3855 = vmatprep.subr.mxu1 %v4022_v1 }
0x1547   : > { %3856 = vmatpush3.msra.mxu1 %v3199_v6 }
0x1548   : > { %3857 = vmatprep.subr.mxu1 %v4022_v1 }
0x1549   : > { %3858 = vmatpush3.msra.mxu1 %v3198_v7 }
0x154a   : > { %3859 = vmatprep.subr.mxu1 %v4022_v1 }
0x154b   : > { %3860 = vmatpush3.msra.mxu1 %v3197_v8 }
0x154c   : > { %3861 = vmatprep.subr.mxu1 %v4022_v1 }
0x154d   : > { %3862 = vmatpush3.msra.mxu1 %v3196_v9 }
0x154e   : > { %3863 = vmatprep.subr.mxu1 %v4022_v1 }
0x154f   : > { %3864 = vmatpush3.msra.mxu1 %v3195_v10 }
0x1550   : > { %3865 = vmatprep.subr.mxu1 %v4022_v1 }
0x1551   : > { %3866 = vmatpush3.msra.mxu1 %v3194_v12 }
0x1552   : > { %3867 = vmatprep.subr.mxu1 %v4022_v1 }
0x1553   : > { %3868 = vmatpush3.msra.mxu1 %v3193_v13 }
0x15f4   : > { %v3148_v36 = vpop.f32.mrf.mxu1 }
0x15f5   : > { %v3152_v37 = vadd.f32 %v3148_v36, %v2911_v31 }
0x15f6   : > { %v3825_v38 = vpop.f32.mrf.mxu1 }
0x15f7   : > { %v3159_v39 = vadd.f32 %v3560_v35, %v3152_v37 }
0x15f9   : > { %v3160_v40 = vadd.f32 %v3159_v39, %v4434_v4  ;;  %v3189_v4 = vld [vmem:[%s4722_s20 + $0x8] sm:$0xff] }
0x15fa   : > { %3831 = vmatpush3.msra.mxu0 %v3189_v4 }
0x15fb   : > { %v3161_v41 = vsel %vm859_vm1, %v3160_v40, 0.0  ;;  %3832 = vmatprep.subr.mxu0 %v4022_v1  ;;  %v3565_v1 = vld [vmem:[%s4725_s23] ss:$0 sm:$0xff] }
0x15fc   : > { %3162 = vadd.xlane.f32.xlu1 %v3161_v41  ;;  %3833 = vmatpush3.msra.mxu0 %v3188_v49 }
0x1685   : > { %v3163_v42 = vpop.xlane.xlu1 %3162 }
0x1686   : > { %v3164_v43 = vmul.f32 0.03125, %v3163_v42  ;;  %v3567_v42 = vld [vmem:[%s4727_s25] ss:$0 sm:$0xff] }
0x1688   : > { %v3165_v44 = vsub.f32 %v3160_v40, %v3164_v43  ;;  %v3566_v40 = vld [vmem:[%s4726_s24] ss:$0 sm:$0xff] }
0x168a   : > { %v3166_v45 = vmul.f32 %v3165_v44, %v3165_v44 }
0x168c   : > { %v3167_v46 = vsel %vm859_vm1, %v3166_v45, 0.0 }
0x168d   : > { %3168 = vadd.xlane.f32.xlu1 %v3167_v46 }
0x1716   : > { %v3169_v50 = vpop.xlane.xlu1 %3168 }
0x1717   : > { %v3170_v51 = vmul.f32 0.03125, %v3169_v50 }
0x1719   : > { %v3171_v52 = vadd.f32 1e-12, %v3170_v51 }
0x171b   : > { %3954 = vrsqrt.f32 %v3171_v52 }
0x1728   : > { %v3955_v53 = vpop.eup %3954 }
0x1729   : > { %v3173_v54 = vmul.f32 %v3955_v53, %v3165_v44 }
0x172b   : > { %v3180_v56 = vmul.f32 %v3561_v5, %v3173_v54 }
0x172d   : > { %v4585_v57 = vadd.f32 %v3562_v55, %v3180_v56 }
0x172f   : > { %3835 = vmatmul.mubr.msk.f32.vlgmr.msra.gmra.mxu0 %vm859_vm1, %v4585_v57 }
0x17ef   : > { %v3287_v15 = vpop.f32.mrf.mxu0 }
0x17f0   : > { %v3288_v17 = vadd.f32 %v3563_v14, %v3287_v15 }
0x17f1   : > { %v3836_v19 = vpop.f32.mrf.mxu0 }
0x17f2   : > { %v3292_v20 = vmul.f32 0.044715, %v3288_v17  ;;  %v3291_v27 = vmul.f32 0.5, %v3288_v17 }
0x17f4   : > { %v3293_v22 = vmul.f32 %v3292_v20, %v3288_v17 }
0x17f6   : > { %v3294_v23 = vmul.f32 %v3293_v22, %v3288_v17 }
0x17f8   : > { %v3295_v24 = vadd.f32 %v3294_v23, %v3288_v17 }
0x17fa   : > { %v3296_v25 = vmul.f32 0.7978846, %v3295_v24 }
0x17fc   : > { %3956 = vtanh.f32 %v3296_v25 }
0x1809   : > { %v3957_v26 = vpop.eup %3956 }
0x180a   : > { %v3298_v28 = vadd.f32 1.0, %v3957_v26 }
0x180c   : > { %v3299_v29 = vmul.f32 %v3298_v28, %v3291_v27 }
0x180e   : > { %3870 = vmatmul.mubr.f32.vlgmr.msra.gmra.mxu1 %v3299_v29 }
0x18ce   : > { %v3372_v30 = vpop.f32.mrf.mxu1 }
0x18cf   : > { %v3373_v18 = vadd.f32 %v3565_v1, %v3372_v30 }
0x18d0   : > { %v3871_v31 = vpop.f32.mrf.mxu1 }
0x18d1   : > { %v3376_v11 = vadd.f32 %v3373_v18, %v4585_v57 }
0x18d3   : > { %v3377_v21 = vsel %vm859_vm1, %v3376_v11, 0.0 }
0x18d4   : > { %3378 = vadd.xlane.f32.xlu1 %v3377_v21 }
0x195d   : > { %v3379_v32 = vpop.xlane.xlu1 %3378 }
0x195e   : > { %v3380_v33 = vmul.f32 0.03125, %v3379_v32 }
0x1960   : > { %v3381_v16 = vsub.f32 %v3376_v11, %v3380_v33 }
0x1962   : > { %v3382_v34 = vmul.f32 %v3381_v16, %v3381_v16 }
0x1964   : > { %v3383_v35 = vsel %vm859_vm1, %v3382_v34, 0.0 }
0x1965   : > { %3384 = vadd.xlane.f32.xlu1 %v3383_v35 }
0x19ee   : > { %v3385_v36 = vpop.xlane.xlu1 %3384 }
0x19ef   : > { %v3386_v37 = vmul.f32 0.03125, %v3385_v36 }
0x19f1   : > { %v3387_v38 = vadd.f32 1e-12, %v3386_v37 }
0x19f3   : > { %3958 = vrsqrt.f32 %v3387_v38 }
0x1a00   : > { %v3959_v39 = vpop.eup %3958 }
0x1a01   : > { %v3389_v41 = vmul.f32 %v3959_v39, %v3381_v16 }
0x1a03   : > { %v3396_v43 = vmul.f32 %v3566_v40, %v3389_v41 }
0x1a05   : > { %v3403_v44 = vadd.f32 %v3567_v42, %v3396_v43 }
0x1a07   : > { %3404 = vst.msk [vmem:[%s817_s28] sm:$0xff] %vm859_vm1, %v3403_v44 }
0x1a08   : > { %3973 = shalt.err (!%p3970_p3)
}
0x1a09   : > { %s3974_s1 = scalar_lea.hbm %s3417_s11, 128  ;;  %s3978_s5 = scalar_lea.hbm %s4791_s6, 256 }
0x1a0a   : > { %p3975_p4 = scmp.ne.s32.totalorder %s3417_s11, %s3974_s1  ;;  %p3979_p9 = scmp.lt.s32.totalorder %s3417_s11, %s4791_s6 }
0x1a0b   : > { %p3980_p10 = scmp.lt.s32.totalorder %s3978_s5, %s3974_s1 }
0x1a0c   : > { %p3976_p7 = pnand %p3975_p4, %p4205_p5 }
0x1a0d   : > { %p3981_p11 = por %p3980_p10, %p3979_p9 }
0x1a0e   : > { %p3977_p8 = pneg %p3976_p7 }
0x1a10   : > { %p3982_p12 = pnand %p3981_p11, %p3977_p8 }
0x1a12   : > { %3985 = shalt.err (!%p3982_p12)
}
0x1a13   : > { %3872 = dma.vmem_to_hbm [thread:$0]  (%p4205_p5), %s3420_s27, 128, %s3417_s11, %s3406_s12  }
0x1a14 PF: > { %s4792_s7 = sld [smem:[#allocation7_spill]] }
0x1a15   : > { %s4793_s10 = sld [smem:[#allocation5_spill]] }
0x1a1a   : > { %p3878_p13 = scmp.ge.s32.totalorder %s4792_s7, 2 }
0x1a1b   : > { %s3431_s4 = sand.u32 1, %s4793_s10  }
0x1a1c   : > { %p3875_p0 = pnand %p3878_p13, %p4209_p6  ;;  %s3432_s8 = scalar_lea.sflag [#allocation3], %s3431_s4 }
0x1a1e   : > { %p3876_p1 = pneg %p3875_p0 }
0x1a20   : > { %4003 = dma.done.wait (%p3876_p1), %s3432_s8, 128  }
0x1a21   : > { %4005 = vsyncadd (%p3876_p1), %s3432_s8, 4294967168  ;;  %s4795_s28 = sld [smem:[#allocation8_spill]]  ;;  %s4798_s27 = smov %s4012_s3 }
0x1a22   : > { %s4796_s1 = sld [smem:[#allocation6_spill]] }
0x1a23   : > { %s4797_s7 = sld [smem:[#allocation9_spill]] }
0x1a27   : > { %p36_p2 = scmp.ge.s32.totalorder %s4795_s28, 4  }
0x1a28   : > { %s4799_s3 = smov %s4796_s1 }
0x1a29   :  { %38 = sbr.rel (!%p36_p2) target bundleno = 18 (0x12), region = 168 }
0x1a2e   :  { %3437 = vsyncpa [#allocation3], 1 }
0x1a2f   :  { %3439 = vsyncpa [#allocation3 + $0x1], 1 }

</bundles_post_ra>
